<compile_context>
chip_gen: v5e
topology: v5e:2x2
jax: 0.10.0
libtpu: 0.0.40
codegen_flags: <defaults>
</compile_context>

<pallas_src>
import functools

import jax
import jax.numpy as jnp
from jax.experimental import pallas as pl
from jax.experimental.pallas import tpu as pltpu

EMBED_DIM = 192
NUM_HEADS = 3
HEAD_DIM = EMBED_DIM // NUM_HEADS
DEPTH = 12
MLP_RATIO = 4
HIDDEN_DIM = EMBED_DIM * MLP_RATIO
PATCH = 16
NUM_CLASSES = 100
HEAD_PAD = 128                       # lane-dense classifier output width
LN_EPS = 1e-6
ATTN_SCALE = HEAD_DIM ** -0.5        # 0.125, exact power of two

# MXU operand dtype (f32 accumulation everywhere).
W_DTYPE = jnp.bfloat16

# Max images per encoder grid step.  8 fits v6e/v7x scoped-VMEM defaults;
# use 4 on v5e (16 MiB scoped default) for large batches.
BT_MAX = 8


def _round_up(x, m):
    return ((x + m - 1) // m) * m


def _choose_bt(batch, bt_max=BT_MAX):
    """Largest divisor of `batch` <= bt_max, keeping batch-grid extent >= 2
    when possible (megacore utilization on v7x)."""
    bt = 1
    for cand in range(min(batch, bt_max), 0, -1):
        if batch % cand == 0:
            bt = cand
            break
    if batch // bt < 2:
        for cand in range(bt, 0, -1):
            if batch % cand == 0 and batch // cand >= 2:
                return cand
    return bt


# ------------------------------ in-kernel math ------------------------------

def _layernorm(x, g, b):
    # f32 statistics (matches torch LayerNorm, eps=1e-6).
    mean = jnp.mean(x, axis=-1, keepdims=True)
    c = x - mean
    var = jnp.mean(c * c, axis=-1, keepdims=True)
    return c * jax.lax.rsqrt(var + LN_EPS) * g + b


def _gelu_erf(x):
    # exact (erf) GELU, matching torch.nn.GELU(approximate='none')
    return 0.5 * x * (1.0 + jax.lax.erf(x * 0.7071067811865475))


# ------------------- fused encoder (12 blocks + LN + head) -------------------

def _encoder_kernel(x0_ref, small_ref, qkvw_ref, projw_ref, fc1w_ref, fc2w_ref,
                    normgb_ref, fcw_ref, fcb_ref, out_ref, res_ref,
                    *, bt, t_pad, t_real):
    """grid = (B//bt, DEPTH); one step = one transformer block on bt images.

    The (bt*t_pad, D) residual stream lives in the VMEM scratch `res_ref`
    across the depth axis; HBM traffic per batch block is: tokens in once,
    per-layer weights streamed, (bt, 128) logits out once.
    """
    layer = pl.program_id(1)
    D = EMBED_DIM

    # Depth step 0: seed the VMEM-resident residual stream from the input.
    @pl.when(layer == 0)
    def _():
        res_ref[...] = x0_ref[...]

    # Per-layer packed small params (f32): rows are
    # [ln1_g, ln1_b, ln2_g, ln2_b, proj_b, fc2_b, qkv_b, fc1_b].
    sv = small_ref[0]                              # (8, HIDDEN_DIM)
    ln1_g = sv[0:1, :D]
    ln1_b = sv[1:2, :D]
    ln2_g = sv[2:3, :D]
    ln2_b = sv[3:4, :D]
    proj_b = sv[4:5, :D]
    fc2_b = sv[5:6, :D]
    qkv_b = sv[6:7, :3 * D]
    fc1_b = sv[7:8, :]

    x = res_ref[...]                               # (bt*t_pad, D) f32 residual

    # key-padding bias: 0 for real keys, -1e30 for padded keys.
    if t_pad > t_real:
        kidx = jax.lax.broadcasted_iota(jnp.int32, (1, t_pad), 1)
        mask_bias = jnp.where(kidx < t_real, 0.0, -1e30).astype(jnp.float32)
    else:
        mask_bias = None

    # --------------------------- attention branch ---------------------------
    h = _layernorm(x, ln1_g, ln1_b)
    # ATTN_SCALE is pre-folded into the q columns of qkv_w / qkv_b.
    qkv = jnp.dot(h.astype(W_DTYPE), qkvw_ref[0],
                  preferred_element_type=jnp.float32) + qkv_b     # (bt*t_pad, 3D)

    proj_w = projw_ref[0]                          # (D, D) bf16
    attn_chunks = []
    for img in range(bt):                          # static unroll over images
        r0 = img * t_pad                           # 8-aligned sublane offset
        qkv_i = qkv[r0:r0 + t_pad, :]              # (t_pad, 3D)
        acc = jnp.zeros((t_pad, D), jnp.float32)
        for hd in range(NUM_HEADS):                # static unroll (3 heads)
            lo = hd * HEAD_DIM
            q = qkv_i[:, lo:lo + HEAD_DIM].astype(W_DTYPE)
            k = qkv_i[:, D + lo:D + lo + HEAD_DIM].astype(W_DTYPE)
            v = qkv_i[:, 2 * D + lo:2 * D + lo + HEAD_DIM].astype(W_DTYPE)
            # scores = q @ k^T, bf16 operands -> single-pass MXU, f32 accum.
            s = jax.lax.dot_general(q, k, (((1,), (1,)), ((), ())),
                                    preferred_element_type=jnp.float32)
            if mask_bias is not None:
                s = s + mask_bias
            s = s - jnp.max(s, axis=-1, keepdims=True)
            p = jnp.exp(s)
            p = p * pl.reciprocal(jnp.sum(p, axis=-1, keepdims=True), approx=True)
            ctx = jnp.dot(p.astype(W_DTYPE), v,
                          preferred_element_type=jnp.float32)     # (t_pad, Dh)
            # concat(heads) @ proj_w == sum_h ctx_h @ proj_w[h*Dh:(h+1)*Dh, :]
            acc = acc + jnp.dot(ctx.astype(W_DTYPE), proj_w[lo:lo + HEAD_DIM, :],
                                preferred_element_type=jnp.float32)
        attn_chunks.append(acc)
    attn_out = attn_chunks[0] if bt == 1 else jnp.concatenate(attn_chunks, axis=0)
    x = x + attn_out + proj_b                      # residual (f32)

    # ------------------------------ MLP branch ------------------------------
    h = _layernorm(x, ln2_g, ln2_b)
    h = jnp.dot(h.astype(W_DTYPE), fc1w_ref[0],
                preferred_element_type=jnp.float32) + fc1_b
    h = _gelu_erf(h)
    h = jnp.dot(h.astype(W_DTYPE), fc2w_ref[0],
                preferred_element_type=jnp.float32) + fc2_b
    x = x + h                                      # residual (f32)
    res_ref[...] = x

    # ------------- final LayerNorm + classifier (last layer only) -----------
    @pl.when(layer == DEPTH - 1)
    def _():
        rows = [x[img * t_pad:img * t_pad + 1, :] for img in range(bt)]
        cls = rows[0] if bt == 1 else jnp.concatenate(rows, axis=0)   # (bt, D)
        g = normgb_ref[0:1, :]
        b = normgb_ref[1:2, :]
        hc = _layernorm(cls, g, b)
        out_ref[0] = (jnp.dot(hc.astype(W_DTYPE), fcw_ref[...],
                              preferred_element_type=jnp.float32) + fcb_ref[...])


def encoder_stack(tok2d, p, *, batch, bt, t_pad, t_real):
    D = EMBED_DIM
    bg = batch // bt
    rows = bt * t_pad

    xmap = lambda i, l: (i, 0)                     # per-batch-block, depth-resident
    wmap = lambda i, l: (l, 0, 0)                  # stream layer l's weights
    cmap = lambda i, l: (0, 0)                     # constants (fetched once)

    # Advisory cost estimate (helps XLA schedule surrounding glue).
    per_tok_macs = (D * 3 * D + D * D + 2 * D * HIDDEN_DIM
                    + NUM_HEADS * 2 * t_pad * HEAD_DIM)
    flops = 2 * batch * t_pad * DEPTH * per_tok_macs + 2 * batch * D * HEAD_PAD
    transcendentals = batch * t_pad * DEPTH * (HIDDEN_DIM + NUM_HEADS * t_pad)
    weight_bytes = DEPTH * ((D * 3 * D + D * D + 2 * D * HIDDEN_DIM) * 2
                            + 8 * HIDDEN_DIM * 4)
    io_bytes = (batch * t_pad * D * 4 + batch * HEAD_PAD * 4
                + 2 * D * 4 + D * HEAD_PAD * 2 + HEAD_PAD * 4)

    kernel = functools.partial(_encoder_kernel, bt=bt, t_pad=t_pad, t_real=t_real)

    out = pl.pallas_call(
        kernel,
        out_shape=jax.ShapeDtypeStruct((bg, bt, HEAD_PAD), jnp.float32),
        grid=(bg, DEPTH),
        in_specs=[
            pl.BlockSpec((rows, D), xmap),                  # initial tokens
            pl.BlockSpec((1, 8, HIDDEN_DIM), wmap),         # packed small params
            pl.BlockSpec((1, D, 3 * D), wmap),              # qkv_w (scale folded)
            pl.BlockSpec((1, D, D), wmap),                  # proj_w
            pl.BlockSpec((1, D, HIDDEN_DIM), wmap),         # fc1_w
            pl.BlockSpec((1, HIDDEN_DIM, D), wmap),         # fc2_w
            pl.BlockSpec((2, D), cmap),                     # final norm g/b
            pl.BlockSpec((D, HEAD_PAD), cmap),              # classifier weight
            pl.BlockSpec((1, HEAD_PAD), cmap),              # classifier bias
        ],
        out_specs=pl.BlockSpec((1, bt, HEAD_PAD), lambda i, l: (i, 0, 0)),
        scratch_shapes=[pltpu.VMEM((rows, D), jnp.float32)],   # residual stream
        compiler_params=pltpu.CompilerParams(
            dimension_semantics=("parallel", "arbitrary")),
        cost_estimate=pl.CostEstimate(flops=flops,
                                      transcendentals=transcendentals,
                                      bytes_accessed=weight_bytes + io_bytes),
    )(tok2d, p["small"], p["qkv_w"], p["proj_w"], p["fc1_w"], p["fc2_w"],
      p["normgb"], p["fc_w"], p["fc_b"])
    return out.reshape(batch, HEAD_PAD)


# ------------------------------ patch embedding ------------------------------

def _patch_embed_kernel(p_ref, w_ref, b_ref, o_ref):
    o_ref[...] = (jnp.dot(p_ref[...], w_ref[...],
                          preferred_element_type=jnp.float32) + b_ref[...])


def patch_embed(patches_bf16, w, b, tm):
    M, K = patches_bf16.shape
    D = w.shape[1]
    return pl.pallas_call(
        _patch_embed_kernel,
        out_shape=jax.ShapeDtypeStruct((M, D), jnp.float32),
        grid=(M // tm,),
        in_specs=[
            pl.BlockSpec((tm, K), lambda i: (i, 0)),
            pl.BlockSpec((K, D), lambda i: (0, 0)),
            pl.BlockSpec((1, D), lambda i: (0, 0)),
        ],
        out_specs=pl.BlockSpec((tm, D), lambda i: (i, 0)),
        compiler_params=pltpu.CompilerParams(dimension_semantics=("parallel",)),
    )(patches_bf16, w, b)


# --------------------------- parameters (synthetic) --------------------------

def init_params(key, num_patches):
    """Synthetic weights laid out kernel-ready:
       * big matmul weights bf16 (MXU operands, halved DMA bytes),
       * attention scale pre-folded into qkv_w/qkv_b q-columns,
       * the eight small per-layer vectors packed into one (DEPTH, 8, 768) f32,
       * classifier weight/bias pre-padded to 128 lanes (pad region zero)."""
    T = num_patches + 1
    D = EMBED_DIM
    H = HIDDEN_DIM
    ks = jax.random.split(key, 8)

    def normal(k, shape, std=0.02, dtype=jnp.float32):
        return (std * jax.random.normal(k, shape, dtype=jnp.float32)).astype(dtype)

    # qkv weight/bias with ATTN_SCALE (exactly 0.125) folded into q columns.
    qkv_w = normal(ks[3], (DEPTH, D, 3 * D))
    qkv_w = qkv_w.at[:, :, :D].multiply(ATTN_SCALE).astype(W_DTYPE)
    qkv_b = jnp.zeros((DEPTH, 3 * D), jnp.float32)
    qkv_b = qkv_b.at[:, :D].multiply(ATTN_SCALE)

    ln1_g = jnp.ones((DEPTH, D), jnp.float32)
    ln1_b = jnp.zeros((DEPTH, D), jnp.float32)
    ln2_g = jnp.ones((DEPTH, D), jnp.float32)
    ln2_b = jnp.zeros((DEPTH, D), jnp.float32)
    proj_b = jnp.zeros((DEPTH, D), jnp.float32)
    fc2_b = jnp.zeros((DEPTH, D), jnp.float32)
    fc1_b = jnp.zeros((DEPTH, H), jnp.float32)

    def row(v):   # (DEPTH, w) -> (DEPTH, 1, H) zero-padded to width H
        return jnp.pad(v, ((0, 0), (0, H - v.shape[-1])))[:, None, :]

    small = jnp.concatenate(
        [row(ln1_g), row(ln1_b), row(ln2_g), row(ln2_b),
         row(proj_b), row(fc2_b), row(qkv_b), row(fc1_b)], axis=1)   # (DEPTH,8,H)

    fc_w = normal(ks[7], (D, NUM_CLASSES))
    fc_w = jnp.pad(fc_w, ((0, 0), (0, HEAD_PAD - NUM_CLASSES))).astype(W_DTYPE)

    return {
        # conv16x16/stride16 weight stored pre-reshaped as (3*P*P, D).
        "patch_w": normal(ks[0], (3 * PATCH * PATCH, D), dtype=W_DTYPE),
        "patch_b": jnp.zeros((1, D), jnp.float32),
        "cls_token": normal(ks[1], (1, 1, D)),
        "pos_embed": normal(ks[2], (1, T, D)),
        "small": small,
        "qkv_w": qkv_w,
        "proj_w": normal(ks[4], (DEPTH, D, D), dtype=W_DTYPE),
        "fc1_w": normal(ks[5], (DEPTH, D, H), dtype=W_DTYPE),
        "fc2_w": normal(ks[6], (DEPTH, H, D), dtype=W_DTYPE),
        "normgb": jnp.concatenate([jnp.ones((1, D), jnp.float32),
                                   jnp.zeros((1, D), jnp.float32)], axis=0),
        "fc_w": fc_w,
        "fc_b": jnp.zeros((1, HEAD_PAD), jnp.float32),
    }


# ---------------------------------- forward ----------------------------------

def vit_forward(params, x):
    B, C, H, W = x.shape
    Hp, Wp = H // PATCH, W // PATCH
    N = Hp * Wp
    T = N + 1
    T_pad = _round_up(T, 8)

    # Patch embedding: conv16x16/stride16 == unfold (XLA glue) + Pallas matmul.
    patches = x.reshape(B, C, Hp, PATCH, Wp, PATCH)
    patches = patches.transpose(0, 2, 4, 1, 3, 5).reshape(B * N, C * PATCH * PATCH)
    rows = B * N
    tm = min(512, _round_up(rows, 8))
    rows_p = _round_up(rows, tm)
    patches = jnp.pad(patches, ((0, rows_p - rows), (0, 0))).astype(W_DTYPE)
    tok = patch_embed(patches, params["patch_w"], params["patch_b"], tm)[:rows]
    tok = tok.reshape(B, N, EMBED_DIM)

    # cls token + positional embedding (dropout p=0 -> no-op), pad T to mult-of-8.
    cls = jnp.broadcast_to(params["cls_token"], (B, 1, EMBED_DIM))
    tok = jnp.concatenate([cls, tok], axis=1) + params["pos_embed"]    # (B, T, D)
    tok = jnp.pad(tok, ((0, 0), (0, T_pad - T), (0, 0)))               # (B, Tp, D)
    tok2d = tok.reshape(B * T_pad, EMBED_DIM)

    # All 12 encoder blocks + final LN + classifier in one fused pallas_call.
    bt = _choose_bt(B)
    logits_padded = encoder_stack(tok2d, params, batch=B, bt=bt,
                                  t_pad=T_pad, t_real=T)               # (B, 128)
    return logits_padded[:, :NUM_CLASSES]


if __name__ == "__main__":
    key = jax.random.PRNGKey(0)
    pkey, xkey = jax.random.split(key)

    # small image consistent with the module: NCHW, 3 channels, patch 16
    B, C, H, W = 2, 3, 32, 32          # -> 2x2 = 4 patches, 5 tokens (padded to 8)
    x = jax.random.normal(xkey, (B, C, H, W), dtype=jnp.float32)
    params = init_params(pkey, (H // PATCH) * (W // PATCH))

    fwd = jax.jit(vit_forward)
    out = jax.block_until_ready(fwd(params, x))
    assert out.shape == (B, NUM_CLASSES) and out.dtype == jnp.float32
    assert bool(jnp.all(jnp.isfinite(out)))
    print("KERNEL_OK")
</pallas_src>

<mosaic_0001>
module attributes {stable_mosaic.version = 11 : i64} {
  func.func @_patch_embed_kernel(%arg0: i32, %arg1: memref<8x768xbf16, #tpu.memory_space<vmem>>, %arg2: memref<768x192xbf16, #tpu.memory_space<vmem>>, %arg3: memref<1x192xf32, #tpu.memory_space<vmem>>, %arg4: memref<8x192xf32, #tpu.memory_space<vmem>>) attributes {dimension_semantics = [#tpu.dimension_semantics<parallel>], iteration_bounds = array<i64: 1>, scalar_prefetch = 0 : i64, scratch_operands = 0 : i64, tpu.core_type = #tpu.core_type<tc>, window_params = [{transform_indices = @transform_0, window_bounds = array<i64: 8, 768>}, {pipeline_mode = #tpu.pipeline_mode<synchronous>, transform_indices = @transform_1, window_bounds = array<i64: 768, 192>}, {pipeline_mode = #tpu.pipeline_mode<synchronous>, transform_indices = @transform_2, window_bounds = array<i64: 1, 192>}, {transform_indices = @transform_3, window_bounds = array<i64: 8, 192>}]} {
    %c0 = arith.constant 0 : index
    %c0_0 = arith.constant 0 : index
    %0 = vector.load %arg1[%c0, %c0_0] : memref<8x768xbf16, #tpu.memory_space<vmem>>, vector<8x768xbf16>
    %c0_1 = arith.constant 0 : index
    %c0_2 = arith.constant 0 : index
    %1 = vector.load %arg2[%c0_1, %c0_2] : memref<768x192xbf16, #tpu.memory_space<vmem>>, vector<768x192xbf16>
    %cst = arith.constant dense<0.000000e+00> : vector<8x192xf32>
    %2 = tpu.matmul %0, %1, %cst {dimension_numbers = #tpu.dot_dimension_numbers<[1], [0], [0], [1], [0, 0, 1, 1], [], []>} : vector<8x768xbf16>, vector<768x192xbf16>, vector<8x192xf32> -> vector<8x192xf32>
    %c0_3 = arith.constant 0 : index
    %c0_4 = arith.constant 0 : index
    %3 = vector.load %arg3[%c0_3, %c0_4] : memref<1x192xf32, #tpu.memory_space<vmem>>, vector<1x192xf32>
    %4 = vector.broadcast %3 : vector<1x192xf32> to vector<8x192xf32>
    %5 = arith.addf %2, %4 : vector<8x192xf32>
    %c0_5 = arith.constant 0 : index
    %c0_6 = arith.constant 0 : index
    %6 = vector.load %arg4[%c0_5, %c0_6] : memref<8x192xf32, #tpu.memory_space<vmem>>, vector<8x192xf32>
    tpu.vector_store %arg4[%c0_5, %c0_6], %5 {strides = array<i32>} : memref<8x192xf32, #tpu.memory_space<vmem>>, vector<8x192xf32>,
    return
  }
  func.func @transform_0(%arg0: i32) -> (i32, i32) {
    %c0_i32 = arith.constant 0 : i32
    %c0_i32_0 = arith.constant 0 : i32
    return %arg0, %c0_i32 : i32, i32
  }
  func.func @transform_1(%arg0: i32) -> (i32, i32) {
    %c0_i32 = arith.constant 0 : i32
    %c0_i32_0 = arith.constant 0 : i32
    %c0_i32_1 = arith.constant 0 : i32
    return %c0_i32, %c0_i32_0 : i32, i32
  }
  func.func @transform_2(%arg0: i32) -> (i32, i32) {
    %c0_i32 = arith.constant 0 : i32
    %c0_i32_0 = arith.constant 0 : i32
    %c0_i32_1 = arith.constant 0 : i32
    return %c0_i32, %c0_i32_0 : i32, i32
  }
  func.func @transform_3(%arg0: i32) -> (i32, i32) {
    %c0_i32 = arith.constant 0 : i32
    %c0_i32_0 = arith.constant 0 : i32
    return %arg0, %c0_i32 : i32, i32
  }
}

module attributes {stable_mosaic.version = 11 : i64} {
  func.func @_encoder_kernel(%arg0: i32, %arg1: i32, %arg2: memref<8x192xf32, #tpu.memory_space<vmem>>, %arg3: memref<1x8x768xf32, #tpu.memory_space<vmem>>, %arg4: memref<1x192x576xbf16, #tpu.memory_space<vmem>>, %arg5: memref<1x192x192xbf16, #tpu.memory_space<vmem>>, %arg6: memref<1x192x768xbf16, #tpu.memory_space<vmem>>, %arg7: memref<1x768x192xbf16, #tpu.memory_space<vmem>>, %arg8: memref<2x192xf32, #tpu.memory_space<vmem>>, %arg9: memref<192x128xbf16, #tpu.memory_space<vmem>>, %arg10: memref<1x128xf32, #tpu.memory_space<vmem>>, %arg11: memref<1x1x128xf32, #tpu.memory_space<vmem>>, %arg12: memref<8x192xf32, #tpu.memory_space<vmem>>) attributes {dimension_semantics = [#tpu.dimension_semantics<parallel>, #tpu.dimension_semantics<arbitrary>], iteration_bounds = array<i64: 2, 12>, scalar_prefetch = 0 : i64, scratch_operands = 1 : i64, tpu.core_type = #tpu.core_type<tc>, window_params = [{transform_indices = @transform_0, window_bounds = array<i64: 8, 192>}, {transform_indices = @transform_1, window_bounds = array<i64: 1, 8, 768>}, {transform_indices = @transform_2, window_bounds = array<i64: 1, 192, 576>}, {transform_indices = @transform_3, window_bounds = array<i64: 1, 192, 192>}, {transform_indices = @transform_4, window_bounds = array<i64: 1, 192, 768>}, {transform_indices = @transform_5, window_bounds = array<i64: 1, 768, 192>}, {pipeline_mode = #tpu.pipeline_mode<synchronous>, transform_indices = @transform_6, window_bounds = array<i64: 2, 192>}, {pipeline_mode = #tpu.pipeline_mode<synchronous>, transform_indices = @transform_7, window_bounds = array<i64: 192, 128>}, {pipeline_mode = #tpu.pipeline_mode<synchronous>, transform_indices = @transform_8, window_bounds = array<i64: 1, 128>}, {transform_indices = @transform_9, window_bounds = array<i64: 1, 1, 128>}]} {
    %c0_i32 = arith.constant 0 : i32
    %0 = arith.cmpi eq, %arg1, %c0_i32 : i32
    %1 = arith.extui %0 : i1 to i32
    %c0_i32_0 = arith.constant 0 : i32
    %2 = arith.cmpi ne, %1, %c0_i32_0 : i32
    scf.if %2 {
      %c0_53 = arith.constant 0 : index
      %c0_54 = arith.constant 0 : index
      %172 = vector.load %arg2[%c0_53, %c0_54] : memref<8x192xf32, #tpu.memory_space<vmem>>, vector<8x192xf32>
      %c0_55 = arith.constant 0 : index
      %c0_56 = arith.constant 0 : index
      %173 = vector.load %arg12[%c0_55, %c0_56] : memref<8x192xf32, #tpu.memory_space<vmem>>, vector<8x192xf32>
      tpu.vector_store %arg12[%c0_55, %c0_56], %172 {strides = array<i32>} : memref<8x192xf32, #tpu.memory_space<vmem>>, vector<8x192xf32>,
    } else {
    }
    %c0 = arith.constant 0 : index
    %c0_1 = arith.constant 0 : index
    %c0_2 = arith.constant 0 : index
    %3 = vector.load %arg3[%c0, %c0_1, %c0_2] : memref<1x8x768xf32, #tpu.memory_space<vmem>>, vector<1x8x768xf32>
    %4 = vector.shape_cast %3 : vector<1x8x768xf32> to vector<8x768xf32>
    %5 = vector.extract_strided_slice %4 {offsets = [0, 0], sizes = [1, 192], strides = [1, 1]} : vector<8x768xf32> to vector<1x192xf32>
    %6 = vector.extract_strided_slice %4 {offsets = [1, 0], sizes = [1, 192], strides = [1, 1]} : vector<8x768xf32> to vector<1x192xf32>
    %7 = vector.extract_strided_slice %4 {offsets = [2, 0], sizes = [1, 192], strides = [1, 1]} : vector<8x768xf32> to vector<1x192xf32>
    %8 = vector.extract_strided_slice %4 {offsets = [3, 0], sizes = [1, 192], strides = [1, 1]} : vector<8x768xf32> to vector<1x192xf32>
    %9 = vector.extract_strided_slice %4 {offsets = [4, 0], sizes = [1, 192], strides = [1, 1]} : vector<8x768xf32> to vector<1x192xf32>
    %10 = vector.extract_strided_slice %4 {offsets = [5, 0], sizes = [1, 192], strides = [1, 1]} : vector<8x768xf32> to vector<1x192xf32>
    %11 = vector.extract_strided_slice %4 {offsets = [6, 0], sizes = [1, 576], strides = [1, 1]} : vector<8x768xf32> to vector<1x576xf32>
    %12 = vector.extract_strided_slice %4 {offsets = [7, 0], sizes = [1, 768], strides = [1, 1]} : vector<8x768xf32> to vector<1x768xf32>
    %c0_3 = arith.constant 0 : index
    %c0_4 = arith.constant 0 : index
    %13 = vector.load %arg12[%c0_3, %c0_4] : memref<8x192xf32, #tpu.memory_space<vmem>>, vector<8x192xf32>
    %14 = tpu.iota {dimensions = array<i32: 1>} : vector<1x8xi32>
    %c5_i32 = arith.constant 5 : i32
    %15 = vector.broadcast %c5_i32 : i32 to vector<1x8xi32>
    %16 = arith.cmpi slt, %14, %15 : vector<1x8xi32>
    %cst = arith.constant 0.000000e+00 : f32
    %cst_5 = arith.constant -1.000000e+30 : f32
    %17 = vector.broadcast %cst : f32 to vector<1x8xf32>
    %18 = vector.broadcast %cst_5 : f32 to vector<1x8xf32>
    %19 = arith.select %16, %17, %18 : vector<1x8xi1>, vector<1x8xf32>
    %cst_6 = arith.constant dense<0.000000e+00> : vector<8xf32>
    %20 = vector.multi_reduction <add>, %13, %cst_6 [1] : vector<8x192xf32> to vector<8xf32>
    %21 = vector.shape_cast %20 : vector<8xf32> to vector<8x1xf32>
    %cst_7 = arith.constant 1.920000e+02 : f32
    %22 = vector.broadcast %cst_7 : f32 to vector<8x1xf32>
    %23 = arith.divf %21, %22 : vector<8x1xf32>
    %24 = vector.broadcast %23 : vector<8x1xf32> to vector<8x192xf32>
    %25 = arith.subf %13, %24 : vector<8x192xf32>
    %26 = arith.mulf %25, %25 : vector<8x192xf32>
    %cst_8 = arith.constant dense<0.000000e+00> : vector<8xf32>
    %27 = vector.multi_reduction <add>, %26, %cst_8 [1] : vector<8x192xf32> to vector<8xf32>
    %28 = vector.shape_cast %27 : vector<8xf32> to vector<8x1xf32>
    %cst_9 = arith.constant 1.920000e+02 : f32
    %29 = vector.broadcast %cst_9 : f32 to vector<8x1xf32>
    %30 = arith.divf %28, %29 : vector<8x1xf32>
    %cst_10 = arith.constant 9.99999997E-7 : f32
    %31 = vector.broadcast %cst_10 : f32 to vector<8x1xf32>
    %32 = arith.addf %30, %31 : vector<8x1xf32>
    %33 = math.rsqrt %32 : vector<8x1xf32>
    %34 = vector.broadcast %33 : vector<8x1xf32> to vector<8x192xf32>
    %35 = arith.mulf %25, %34 : vector<8x192xf32>
    %36 = vector.broadcast %5 : vector<1x192xf32> to vector<8x192xf32>
    %37 = arith.mulf %35, %36 : vector<8x192xf32>
    %38 = vector.broadcast %6 : vector<1x192xf32> to vector<8x192xf32>
    %39 = arith.addf %37, %38 : vector<8x192xf32>
    %40 = arith.truncf %39 : vector<8x192xf32> to vector<8x192xbf16>
    %c0_11 = arith.constant 0 : index
    %c0_12 = arith.constant 0 : index
    %c0_13 = arith.constant 0 : index
    %41 = vector.load %arg4[%c0_11, %c0_12, %c0_13] : memref<1x192x576xbf16, #tpu.memory_space<vmem>>, vector<1x192x576xbf16>
    %42 = vector.shape_cast %41 : vector<1x192x576xbf16> to vector<192x576xbf16>
    %cst_14 = arith.constant dense<0.000000e+00> : vector<8x576xf32>
    %43 = tpu.matmul %40, %42, %cst_14 {dimension_numbers = #tpu.dot_dimension_numbers<[1], [0], [0], [1], [0, 0, 1, 1], [], []>} : vector<8x192xbf16>, vector<192x576xbf16>, vector<8x576xf32> -> vector<8x576xf32>
    %44 = vector.broadcast %11 : vector<1x576xf32> to vector<8x576xf32>
    %45 = arith.addf %43, %44 : vector<8x576xf32>
    %c0_15 = arith.constant 0 : index
    %c0_16 = arith.constant 0 : index
    %c0_17 = arith.constant 0 : index
    %46 = vector.load %arg5[%c0_15, %c0_16, %c0_17] : memref<1x192x192xbf16, #tpu.memory_space<vmem>>, vector<1x192x192xbf16>
    %47 = vector.shape_cast %46 : vector<1x192x192xbf16> to vector<192x192xbf16>
    %cst_18 = arith.constant 0.000000e+00 : f32
    %48 = vector.broadcast %cst_18 : f32 to vector<8x192xf32>
    %49 = vector.extract_strided_slice %45 {offsets = [0, 0], sizes = [8, 64], strides = [1, 1]} : vector<8x576xf32> to vector<8x64xf32>
    %50 = arith.truncf %49 : vector<8x64xf32> to vector<8x64xbf16>
    %51 = vector.extract_strided_slice %45 {offsets = [0, 192], sizes = [8, 64], strides = [1, 1]} : vector<8x576xf32> to vector<8x64xf32>
    %52 = arith.truncf %51 : vector<8x64xf32> to vector<8x64xbf16>
    %53 = vector.extract_strided_slice %45 {offsets = [0, 384], sizes = [8, 64], strides = [1, 1]} : vector<8x576xf32> to vector<8x64xf32>
    %54 = arith.truncf %53 : vector<8x64xf32> to vector<8x64xbf16>
    %cst_19 = arith.constant dense<0.000000e+00> : vector<8x8xf32>
    %55 = tpu.matmul %50, %52, %cst_19 {dimension_numbers = #tpu.dot_dimension_numbers<[1], [1], [0], [0], [0, 0, 1, 0], [], []>} : vector<8x64xbf16>, vector<8x64xbf16>, vector<8x8xf32> -> vector<8x8xf32>
    %56 = vector.broadcast %19 : vector<1x8xf32> to vector<8x8xf32>
    %57 = arith.addf %55, %56 : vector<8x8xf32>
    %cst_20 = arith.constant dense<0xFF800000> : vector<8xf32>
    %58 = vector.multi_reduction <maximumf>, %57, %cst_20 [1] : vector<8x8xf32> to vector<8xf32>
    %59 = vector.shape_cast %58 : vector<8xf32> to vector<8x1xf32>
    %60 = vector.broadcast %59 : vector<8x1xf32> to vector<8x8xf32>
    %61 = arith.subf %57, %60 : vector<8x8xf32>
    %62 = math.exp %61 : vector<8x8xf32>
    %cst_21 = arith.constant dense<0.000000e+00> : vector<8xf32>
    %63 = vector.multi_reduction <add>, %62, %cst_21 [1] : vector<8x8xf32> to vector<8xf32>
    %64 = vector.shape_cast %63 : vector<8xf32> to vector<8x1xf32>
    %65 = tpu.reciprocal %64 {approx = true} : vector<8x1xf32> -> vector<8x1xf32>
    %66 = vector.broadcast %65 : vector<8x1xf32> to vector<8x8xf32>
    %67 = arith.mulf %62, %66 : vector<8x8xf32>
    %68 = arith.truncf %67 : vector<8x8xf32> to vector<8x8xbf16>
    %cst_22 = arith.constant dense<0.000000e+00> : vector<8x64xf32>
    %69 = tpu.matmul %68, %54, %cst_22 {dimension_numbers = #tpu.dot_dimension_numbers<[1], [0], [0], [1], [0, 0, 1, 1], [], []>} : vector<8x8xbf16>, vector<8x64xbf16>, vector<8x64xf32> -> vector<8x64xf32>
    %70 = arith.truncf %69 : vector<8x64xf32> to vector<8x64xbf16>
    %71 = vector.extract_strided_slice %47 {offsets = [0, 0], sizes = [64, 192], strides = [1, 1]} : vector<192x192xbf16> to vector<64x192xbf16>
    %cst_23 = arith.constant dense<0.000000e+00> : vector<8x192xf32>
    %72 = tpu.matmul %70, %71, %cst_23 {dimension_numbers = #tpu.dot_dimension_numbers<[1], [0], [0], [1], [0, 0, 1, 1], [], []>} : vector<8x64xbf16>, vector<64x192xbf16>, vector<8x192xf32> -> vector<8x192xf32>
    %73 = arith.addf %48, %72 : vector<8x192xf32>
    %74 = vector.extract_strided_slice %45 {offsets = [0, 64], sizes = [8, 64], strides = [1, 1]} : vector<8x576xf32> to vector<8x64xf32>
    %75 = arith.truncf %74 : vector<8x64xf32> to vector<8x64xbf16>
    %76 = vector.extract_strided_slice %45 {offsets = [0, 256], sizes = [8, 64], strides = [1, 1]} : vector<8x576xf32> to vector<8x64xf32>
    %77 = arith.truncf %76 : vector<8x64xf32> to vector<8x64xbf16>
    %78 = vector.extract_strided_slice %45 {offsets = [0, 448], sizes = [8, 64], strides = [1, 1]} : vector<8x576xf32> to vector<8x64xf32>
    %79 = arith.truncf %78 : vector<8x64xf32> to vector<8x64xbf16>
    %cst_24 = arith.constant dense<0.000000e+00> : vector<8x8xf32>
    %80 = tpu.matmul %75, %77, %cst_24 {dimension_numbers = #tpu.dot_dimension_numbers<[1], [1], [0], [0], [0, 0, 1, 0], [], []>} : vector<8x64xbf16>, vector<8x64xbf16>, vector<8x8xf32> -> vector<8x8xf32>
    %81 = vector.broadcast %19 : vector<1x8xf32> to vector<8x8xf32>
    %82 = arith.addf %80, %81 : vector<8x8xf32>
    %cst_25 = arith.constant dense<0xFF800000> : vector<8xf32>
    %83 = vector.multi_reduction <maximumf>, %82, %cst_25 [1] : vector<8x8xf32> to vector<8xf32>
    %84 = vector.shape_cast %83 : vector<8xf32> to vector<8x1xf32>
    %85 = vector.broadcast %84 : vector<8x1xf32> to vector<8x8xf32>
    %86 = arith.subf %82, %85 : vector<8x8xf32>
    %87 = math.exp %86 : vector<8x8xf32>
    %cst_26 = arith.constant dense<0.000000e+00> : vector<8xf32>
    %88 = vector.multi_reduction <add>, %87, %cst_26 [1] : vector<8x8xf32> to vector<8xf32>
    %89 = vector.shape_cast %88 : vector<8xf32> to vector<8x1xf32>
    %90 = tpu.reciprocal %89 {approx = true} : vector<8x1xf32> -> vector<8x1xf32>
    %91 = vector.broadcast %90 : vector<8x1xf32> to vector<8x8xf32>
    %92 = arith.mulf %87, %91 : vector<8x8xf32>
    %93 = arith.truncf %92 : vector<8x8xf32> to vector<8x8xbf16>
    %cst_27 = arith.constant dense<0.000000e+00> : vector<8x64xf32>
    %94 = tpu.matmul %93, %79, %cst_27 {dimension_numbers = #tpu.dot_dimension_numbers<[1], [0], [0], [1], [0, 0, 1, 1], [], []>} : vector<8x8xbf16>, vector<8x64xbf16>, vector<8x64xf32> -> vector<8x64xf32>
    %95 = arith.truncf %94 : vector<8x64xf32> to vector<8x64xbf16>
    %96 = vector.extract_strided_slice %47 {offsets = [64, 0], sizes = [64, 192], strides = [1, 1]} : vector<192x192xbf16> to vector<64x192xbf16>
    %cst_28 = arith.constant dense<0.000000e+00> : vector<8x192xf32>
    %97 = tpu.matmul %95, %96, %cst_28 {dimension_numbers = #tpu.dot_dimension_numbers<[1], [0], [0], [1], [0, 0, 1, 1], [], []>} : vector<8x64xbf16>, vector<64x192xbf16>, vector<8x192xf32> -> vector<8x192xf32>
    %98 = arith.addf %73, %97 : vector<8x192xf32>
    %99 = vector.extract_strided_slice %45 {offsets = [0, 128], sizes = [8, 64], strides = [1, 1]} : vector<8x576xf32> to vector<8x64xf32>
    %100 = arith.truncf %99 : vector<8x64xf32> to vector<8x64xbf16>
    %101 = vector.extract_strided_slice %45 {offsets = [0, 320], sizes = [8, 64], strides = [1, 1]} : vector<8x576xf32> to vector<8x64xf32>
    %102 = arith.truncf %101 : vector<8x64xf32> to vector<8x64xbf16>
    %103 = vector.extract_strided_slice %45 {offsets = [0, 512], sizes = [8, 64], strides = [1, 1]} : vector<8x576xf32> to vector<8x64xf32>
    %104 = arith.truncf %103 : vector<8x64xf32> to vector<8x64xbf16>
    %cst_29 = arith.constant dense<0.000000e+00> : vector<8x8xf32>
    %105 = tpu.matmul %100, %102, %cst_29 {dimension_numbers = #tpu.dot_dimension_numbers<[1], [1], [0], [0], [0, 0, 1, 0], [], []>} : vector<8x64xbf16>, vector<8x64xbf16>, vector<8x8xf32> -> vector<8x8xf32>
    %106 = vector.broadcast %19 : vector<1x8xf32> to vector<8x8xf32>
    %107 = arith.addf %105, %106 : vector<8x8xf32>
    %cst_30 = arith.constant dense<0xFF800000> : vector<8xf32>
    %108 = vector.multi_reduction <maximumf>, %107, %cst_30 [1] : vector<8x8xf32> to vector<8xf32>
    %109 = vector.shape_cast %108 : vector<8xf32> to vector<8x1xf32>
    %110 = vector.broadcast %109 : vector<8x1xf32> to vector<8x8xf32>
    %111 = arith.subf %107, %110 : vector<8x8xf32>
    %112 = math.exp %111 : vector<8x8xf32>
    %cst_31 = arith.constant dense<0.000000e+00> : vector<8xf32>
    %113 = vector.multi_reduction <add>, %112, %cst_31 [1] : vector<8x8xf32> to vector<8xf32>
    %114 = vector.shape_cast %113 : vector<8xf32> to vector<8x1xf32>
    %115 = tpu.reciprocal %114 {approx = true} : vector<8x1xf32> -> vector<8x1xf32>
    %116 = vector.broadcast %115 : vector<8x1xf32> to vector<8x8xf32>
    %117 = arith.mulf %112, %116 : vector<8x8xf32>
    %118 = arith.truncf %117 : vector<8x8xf32> to vector<8x8xbf16>
    %cst_32 = arith.constant dense<0.000000e+00> : vector<8x64xf32>
    %119 = tpu.matmul %118, %104, %cst_32 {dimension_numbers = #tpu.dot_dimension_numbers<[1], [0], [0], [1], [0, 0, 1, 1], [], []>} : vector<8x8xbf16>, vector<8x64xbf16>, vector<8x64xf32> -> vector<8x64xf32>
    %120 = arith.truncf %119 : vector<8x64xf32> to vector<8x64xbf16>
    %121 = vector.extract_strided_slice %47 {offsets = [128, 0], sizes = [64, 192], strides = [1, 1]} : vector<192x192xbf16> to vector<64x192xbf16>
    %cst_33 = arith.constant dense<0.000000e+00> : vector<8x192xf32>
    %122 = tpu.matmul %120, %121, %cst_33 {dimension_numbers = #tpu.dot_dimension_numbers<[1], [0], [0], [1], [0, 0, 1, 1], [], []>} : vector<8x64xbf16>, vector<64x192xbf16>, vector<8x192xf32> -> vector<8x192xf32>
    %123 = arith.addf %98, %122 : vector<8x192xf32>
    %124 = arith.addf %13, %123 : vector<8x192xf32>
    %125 = vector.broadcast %9 : vector<1x192xf32> to vector<8x192xf32>
    %126 = arith.addf %124, %125 : vector<8x192xf32>
    %cst_34 = arith.constant dense<0.000000e+00> : vector<8xf32>
    %127 = vector.multi_reduction <add>, %126, %cst_34 [1] : vector<8x192xf32> to vector<8xf32>
    %128 = vector.shape_cast %127 : vector<8xf32> to vector<8x1xf32>
    %cst_35 = arith.constant 1.920000e+02 : f32
    %129 = vector.broadcast %cst_35 : f32 to vector<8x1xf32>
    %130 = arith.divf %128, %129 : vector<8x1xf32>
    %131 = vector.broadcast %130 : vector<8x1xf32> to vector<8x192xf32>
    %132 = arith.subf %126, %131 : vector<8x192xf32>
    %133 = arith.mulf %132, %132 : vector<8x192xf32>
    %cst_36 = arith.constant dense<0.000000e+00> : vector<8xf32>
    %134 = vector.multi_reduction <add>, %133, %cst_36 [1] : vector<8x192xf32> to vector<8xf32>
    %135 = vector.shape_cast %134 : vector<8xf32> to vector<8x1xf32>
    %cst_37 = arith.constant 1.920000e+02 : f32
    %136 = vector.broadcast %cst_37 : f32 to vector<8x1xf32>
    %137 = arith.divf %135, %136 : vector<8x1xf32>
    %cst_38 = arith.constant 9.99999997E-7 : f32
    %138 = vector.broadcast %cst_38 : f32 to vector<8x1xf32>
    %139 = arith.addf %137, %138 : vector<8x1xf32>
    %140 = math.rsqrt %139 : vector<8x1xf32>
    %141 = vector.broadcast %140 : vector<8x1xf32> to vector<8x192xf32>
    %142 = arith.mulf %132, %141 : vector<8x192xf32>
    %143 = vector.broadcast %7 : vector<1x192xf32> to vector<8x192xf32>
    %144 = arith.mulf %142, %143 : vector<8x192xf32>
    %145 = vector.broadcast %8 : vector<1x192xf32> to vector<8x192xf32>
    %146 = arith.addf %144, %145 : vector<8x192xf32>
    %147 = arith.truncf %146 : vector<8x192xf32> to vector<8x192xbf16>
    %c0_39 = arith.constant 0 : index
    %c0_40 = arith.constant 0 : index
    %c0_41 = arith.constant 0 : index
    %148 = vector.load %arg6[%c0_39, %c0_40, %c0_41] : memref<1x192x768xbf16, #tpu.memory_space<vmem>>, vector<1x192x768xbf16>
    %149 = vector.shape_cast %148 : vector<1x192x768xbf16> to vector<192x768xbf16>
    %cst_42 = arith.constant dense<0.000000e+00> : vector<8x768xf32>
    %150 = tpu.matmul %147, %149, %cst_42 {dimension_numbers = #tpu.dot_dimension_numbers<[1], [0], [0], [1], [0, 0, 1, 1], [], []>} : vector<8x192xbf16>, vector<192x768xbf16>, vector<8x768xf32> -> vector<8x768xf32>
    %151 = vector.broadcast %12 : vector<1x768xf32> to vector<8x768xf32>
    %152 = arith.addf %150, %151 : vector<8x768xf32>
    %cst_43 = arith.constant 5.000000e-01 : f32
    %153 = vector.broadcast %cst_43 : f32 to vector<8x768xf32>
    %154 = arith.mulf %153, %152 : vector<8x768xf32>
    %cst_44 = arith.constant 0.707106769 : f32
    %155 = vector.broadcast %cst_44 : f32 to vector<8x768xf32>
    %156 = arith.mulf %152, %155 : vector<8x768xf32>
    %157 = math.erf %156 : vector<8x768xf32>
    %cst_45 = arith.constant 1.000000e+00 : f32
    %158 = vector.broadcast %cst_45 : f32 to vector<8x768xf32>
    %159 = arith.addf %158, %157 : vector<8x768xf32>
    %160 = arith.mulf %154, %159 : vector<8x768xf32>
    %161 = arith.truncf %160 : vector<8x768xf32> to vector<8x768xbf16>
    %c0_46 = arith.constant 0 : index
    %c0_47 = arith.constant 0 : index
    %c0_48 = arith.constant 0 : index
    %162 = vector.load %arg7[%c0_46, %c0_47, %c0_48] : memref<1x768x192xbf16, #tpu.memory_space<vmem>>, vector<1x768x192xbf16>
    %163 = vector.shape_cast %162 : vector<1x768x192xbf16> to vector<768x192xbf16>
    %cst_49 = arith.constant dense<0.000000e+00> : vector<8x192xf32>
    %164 = tpu.matmul %161, %163, %cst_49 {dimension_numbers = #tpu.dot_dimension_numbers<[1], [0], [0], [1], [0, 0, 1, 1], [], []>} : vector<8x768xbf16>, vector<768x192xbf16>, vector<8x192xf32> -> vector<8x192xf32>
    %165 = vector.broadcast %10 : vector<1x192xf32> to vector<8x192xf32>
    %166 = arith.addf %164, %165 : vector<8x192xf32>
    %167 = arith.addf %126, %166 : vector<8x192xf32>
    %c0_50 = arith.constant 0 : index
    %c0_51 = arith.constant 0 : index
    %168 = vector.load %arg12[%c0_50, %c0_51] : memref<8x192xf32, #tpu.memory_space<vmem>>, vector<8x192xf32>
    tpu.vector_store %arg12[%c0_50, %c0_51], %167 {strides = array<i32>} : memref<8x192xf32, #tpu.memory_space<vmem>>, vector<8x192xf32>,
    %c11_i32 = arith.constant 11 : i32
    %169 = arith.cmpi eq, %arg1, %c11_i32 : i32
    %170 = arith.extui %169 : i1 to i32
    %c0_i32_52 = arith.constant 0 : i32
    %171 = arith.cmpi ne, %170, %c0_i32_52 : i32
    scf.if %171 {
      %172 = vector.extract_strided_slice %167 {offsets = [0, 0], sizes = [1, 192], strides = [1, 1]} : vector<8x192xf32> to vector<1x192xf32>
      %c0_53 = arith.constant 0 : index
      %c0_54 = arith.constant 0 : index
      %173 = vector.load %arg8[%c0_53, %c0_54] : memref<2x192xf32, #tpu.memory_space<vmem>>, vector<1x192xf32>
      %c1 = arith.constant 1 : index
      %c0_55 = arith.constant 0 : index
      %174 = vector.load %arg8[%c1, %c0_55] : memref<2x192xf32, #tpu.memory_space<vmem>>, vector<1x192xf32>
      %cst_56 = arith.constant dense<0.000000e+00> : vector<1xf32>
      %175 = vector.multi_reduction <add>, %172, %cst_56 [1] : vector<1x192xf32> to vector<1xf32>
      %176 = vector.shape_cast %175 : vector<1xf32> to vector<1x1xf32>
      %cst_57 = arith.constant 1.920000e+02 : f32
      %177 = vector.broadcast %cst_57 : f32 to vector<1x1xf32>
      %178 = arith.divf %176, %177 : vector<1x1xf32>
      %179 = vector.broadcast %178 : vector<1x1xf32> to vector<1x192xf32>
      %180 = arith.subf %172, %179 : vector<1x192xf32>
      %181 = arith.mulf %180, %180 : vector<1x192xf32>
      %cst_58 = arith.constant dense<0.000000e+00> : vector<1xf32>
      %182 = vector.multi_reduction <add>, %181, %cst_58 [1] : vector<1x192xf32> to vector<1xf32>
      %183 = vector.shape_cast %182 : vector<1xf32> to vector<1x1xf32>
      %cst_59 = arith.constant 1.920000e+02 : f32
      %184 = vector.broadcast %cst_59 : f32 to vector<1x1xf32>
      %185 = arith.divf %183, %184 : vector<1x1xf32>
      %cst_60 = arith.constant 9.99999997E-7 : f32
      %186 = vector.broadcast %cst_60 : f32 to vector<1x1xf32>
      %187 = arith.addf %185, %186 : vector<1x1xf32>
      %188 = math.rsqrt %187 : vector<1x1xf32>
      %189 = vector.broadcast %188 : vector<1x1xf32> to vector<1x192xf32>
      %190 = arith.mulf %180, %189 : vector<1x192xf32>
      %191 = arith.mulf %190, %173 : vector<1x192xf32>
      %192 = arith.addf %191, %174 : vector<1x192xf32>
      %193 = arith.truncf %192 : vector<1x192xf32> to vector<1x192xbf16>
      %c0_61 = arith.constant 0 : index
      %c0_62 = arith.constant 0 : index
      %194 = vector.load %arg9[%c0_61, %c0_62] : memref<192x128xbf16, #tpu.memory_space<vmem>>, vector<192x128xbf16>
      %cst_63 = arith.constant dense<0.000000e+00> : vector<1x128xf32>
      %195 = tpu.matmul %193, %194, %cst_63 {dimension_numbers = #tpu.dot_dimension_numbers<[1], [0], [0], [1], [0, 0, 1, 1], [], []>} : vector<1x192xbf16>, vector<192x128xbf16>, vector<1x128xf32> -> vector<1x128xf32>
      %c0_64 = arith.constant 0 : index
      %c0_65 = arith.constant 0 : index
      %196 = vector.load %arg10[%c0_64, %c0_65] : memref<1x128xf32, #tpu.memory_space<vmem>>, vector<1x128xf32>
      %197 = arith.addf %195, %196 : vector<1x128xf32>
      %c0_66 = arith.constant 0 : index
      %c0_67 = arith.constant 0 : index
      %c0_68 = arith.constant 0 : index
      %198 = vector.load %arg11[%c0_66, %c0_67, %c0_68] : memref<1x1x128xf32, #tpu.memory_space<vmem>>, vector<1x1x128xf32>
      %199 = vector.shape_cast %198 : vector<1x1x128xf32> to vector<1x128xf32>
      %200 = vector.shape_cast %197 : vector<1x128xf32> to vector<1x1x128xf32>
      tpu.vector_store %arg11[%c0_66, %c0_67, %c0_68], %200 {strides = array<i32>} : memref<1x1x128xf32, #tpu.memory_space<vmem>>, vector<1x1x128xf32>,
    } else {
    }
    return
  }
  func.func @transform_0(%arg0: i32, %arg1: i32) -> (i32, i32) {
    %c0_i32 = arith.constant 0 : i32
    %c0_i32_0 = arith.constant 0 : i32
    return %arg0, %c0_i32 : i32, i32
  }
  func.func @transform_1(%arg0: i32, %arg1: i32) -> (i32, i32, i32) {
    %c0_i32 = arith.constant 0 : i32
    %c0_i32_0 = arith.constant 0 : i32
    %c0_i32_1 = arith.constant 0 : i32
    return %arg1, %c0_i32, %c0_i32_0 : i32, i32, i32
  }
  func.func @transform_2(%arg0: i32, %arg1: i32) -> (i32, i32, i32) {
    %c0_i32 = arith.constant 0 : i32
    %c0_i32_0 = arith.constant 0 : i32
    %c0_i32_1 = arith.constant 0 : i32
    return %arg1, %c0_i32, %c0_i32_0 : i32, i32, i32
  }
  func.func @transform_3(%arg0: i32, %arg1: i32) -> (i32, i32, i32) {
    %c0_i32 = arith.constant 0 : i32
    %c0_i32_0 = arith.constant 0 : i32
    %c0_i32_1 = arith.constant 0 : i32
    return %arg1, %c0_i32, %c0_i32_0 : i32, i32, i32
  }
  func.func @transform_4(%arg0: i32, %arg1: i32) -> (i32, i32, i32) {
    %c0_i32 = arith.constant 0 : i32
    %c0_i32_0 = arith.constant 0 : i32
    %c0_i32_1 = arith.constant 0 : i32
    return %arg1, %c0_i32, %c0_i32_0 : i32, i32, i32
  }
  func.func @transform_5(%arg0: i32, %arg1: i32) -> (i32, i32, i32) {
    %c0_i32 = arith.constant 0 : i32
    %c0_i32_0 = arith.constant 0 : i32
    %c0_i32_1 = arith.constant 0 : i32
    return %arg1, %c0_i32, %c0_i32_0 : i32, i32, i32
  }
  func.func @transform_6(%arg0: i32, %arg1: i32) -> (i32, i32) {
    %c0_i32 = arith.constant 0 : i32
    %c0_i32_0 = arith.constant 0 : i32
    %c0_i32_1 = arith.constant 0 : i32
    return %c0_i32, %c0_i32_0 : i32, i32
  }
  func.func @transform_7(%arg0: i32, %arg1: i32) -> (i32, i32) {
    %c0_i32 = arith.constant 0 : i32
    %c0_i32_0 = arith.constant 0 : i32
    %c0_i32_1 = arith.constant 0 : i32
    return %c0_i32, %c0_i32_0 : i32, i32
  }
  func.func @transform_8(%arg0: i32, %arg1: i32) -> (i32, i32) {
    %c0_i32 = arith.constant 0 : i32
    %c0_i32_0 = arith.constant 0 : i32
    %c0_i32_1 = arith.constant 0 : i32
    return %c0_i32, %c0_i32_0 : i32, i32
  }
  func.func @transform_9(%arg0: i32, %arg1: i32) -> (i32, i32, i32) {
    %c0_i32 = arith.constant 0 : i32
    %c0_i32_0 = arith.constant 0 : i32
    %c0_i32_1 = arith.constant 0 : i32
    return %arg0, %c0_i32, %c0_i32_0 : i32, i32, i32
  }
}

</mosaic_0001>

<bundles_post_ra>
// kernel: vit_forward.2
= control target key start
LH: loop header
LB: loop body
LE: loop exit
PB: predicated region body
PF: predicated region fallthrough
CT: control target
= control target key end

     0   :  { %8 = vsyncpa [#allocation3], 0  ;;  %s1305_s15 = smov [#allocation2]   ;;  %s1944_s0 = inlined_call_operand.vmem [shape: bf16[8,768], index: 0, kind: input, shape index: {}]   ;;  %s1945_s1 = inlined_call_operand.vmem [shape: bf16[768,192], index: 1, kind: input, shape index: {}]   ;;  %s1946_s2 = inlined_call_operand.hbm [shape: f32[1,192], index: 2, kind: input, shape index: {}]   ;;  %s1947_s3 = inlined_call_operand.vmem [shape: f32[8,192], index: 3, kind: output, shape index: {}]  }
   0x1   :  { %s18_s14 = sshll.u32 %s1946_s2, 4  ;;  %s20_s16 = sshll.u32 %s1305_s15, 4  ;;  %s19_s14 = int_to_ptr.hbm [resolvable:$true] %s18_s14  ;;  %s21_s16 = int_to_ptr.vmem [resolvable:$true] %s20_s16 }
   0x2   :  { %23 = dma.hbm_to_vmem [thread:$0]  %s19_s14, 32, %s21_s16, [#allocation3]  }
   0x3   :  { %1303 = dma.done.wait [#allocation3], 32  }
   0x4   :  { %1304 = vsyncadd [#allocation3], 4294967264  ;;  %v856_v0 = vld [vmem:[%s1945_s1 + $0x70] sm:$0xf]  ;;  %v1197_v1 = vld [vmem:[%s1945_s1 + $0x74] sm:$0xf0] }
   0x5   :  { %v920_v2 = vld [vmem:[%s1945_s1 + $0xf0] sm:$0xf]  ;;  %v857_v3 = vor.u32 %v1197_v1, %v856_v0  ;;  %v1213_v4 = vld [vmem:[%s1945_s1 + $0xf4] sm:$0xf0]  ;;  %v848_v11 = vld [vmem:[%s1945_s1 + $0x60] sm:$0xf] }
   0x6   :  { %v984_v5 = vld [vmem:[%s1945_s1 + $0x170] sm:$0xf]  ;;  %v1229_v6 = vld [vmem:[%s1945_s1 + $0x174] sm:$0xf0]  ;;  %v921_v7 = vor.u32 %v1213_v4, %v920_v2  ;;  %v1195_v13 = vld [vmem:[%s1945_s1 + $0x64] sm:$0xf0] }
   0x7   :  { %v985_v8 = vor.u32 %v1229_v6, %v984_v5  ;;  %v1048_v9 = vld [vmem:[%s1945_s1 + $0x1f0] sm:$0xf]  ;;  %v1245_v10 = vld [vmem:[%s1945_s1 + $0x1f4] sm:$0xf0]  ;;  %634 = vmatpush.bf16.msra.mxu0 %v857_v3  ;;  %v912_v14 = vld [vmem:[%s1945_s1 + $0xe0] sm:$0xf]  ;;  %v849_v16 = vor.u32 %v1195_v13, %v848_v11 }
   0x8   :  { %v1049_v12 = vor.u32 %v1245_v10, %v1048_v9  ;;  %v1211_v15 = vld [vmem:[%s1945_s1 + $0xe4] sm:$0xf0]  ;;  %647 = vmatpush.bf16.msra.mxu1 %v921_v7  ;;  %v976_v18 = vld [vmem:[%s1945_s1 + $0x160] sm:$0xf]  ;;  %v840_v23 = vld [vmem:[%s1945_s1 + $0x50] sm:$0xf] }
   0x9   :  { %660 = vmatpush.bf16.msra.mxu2 %v985_v8  ;;  %v913_v17 = vor.u32 %v1211_v15, %v912_v14  ;;  %v1227_v19 = vld [vmem:[%s1945_s1 + $0x164] sm:$0xf0]  ;;  %v1040_v20 = vld [vmem:[%s1945_s1 + $0x1e0] sm:$0xf]  ;;  %v1193_v24 = vld [vmem:[%s1945_s1 + $0x54] sm:$0xf0] }
   0xa   :  { %673 = vmatpush.bf16.msra.mxu3 %v1049_v12  ;;  %v977_v21 = vor.u32 %v1227_v19, %v976_v18  ;;  %v1243_v22 = vld [vmem:[%s1945_s1 + $0x1e4] sm:$0xf0]  ;;  %v904_v26 = vld [vmem:[%s1945_s1 + $0xd0] sm:$0xf]  ;;  %v1209_v27 = vld [vmem:[%s1945_s1 + $0xd4] sm:$0xf0]  ;;  %v841_v29 = vor.u32 %v1193_v24, %v840_v23 }
   0xb   :  { %v1041_v25 = vor.u32 %v1243_v22, %v1040_v20  ;;  %v968_v28 = vld [vmem:[%s1945_s1 + $0x150] sm:$0xf]  ;;  %635 = vmatpush.bf16.msra.mxu0 %v849_v16  ;;  %v1225_v30 = vld [vmem:[%s1945_s1 + $0x154] sm:$0xf0]  ;;  %v905_v33 = vor.u32 %v1209_v27, %v904_v26  ;;  %v832_v35 = vld [vmem:[%s1945_s1 + $0x40] sm:$0xf] }
   0xc   :  { %v1032_v31 = vld [vmem:[%s1945_s1 + $0x1d0] sm:$0xf]  ;;  %v1241_v32 = vld [vmem:[%s1945_s1 + $0x1d4] sm:$0xf0]  ;;  %648 = vmatpush.bf16.msra.mxu1 %v913_v17  ;;  %v969_v34 = vor.u32 %v1225_v30, %v968_v28  ;;  %v1191_v36 = vld [vmem:[%s1945_s1 + $0x44] sm:$0xf0] }
   0xd   :  { %661 = vmatpush.bf16.msra.mxu2 %v977_v21  ;;  %v896_v37 = vld [vmem:[%s1945_s1 + $0xc0] sm:$0xf]  ;;  %v1033_v38 = vor.u32 %v1241_v32, %v1032_v31  ;;  %v1207_v39 = vld [vmem:[%s1945_s1 + $0xc4] sm:$0xf0]  ;;  %v833_v44 = vor.u32 %v1191_v36, %v832_v35  ;;  %v824_v47 = vld [vmem:[%s1945_s1 + $0x30] sm:$0xf] }
   0xe   :  { %674 = vmatpush.bf16.msra.mxu3 %v1041_v25  ;;  %v960_v40 = vld [vmem:[%s1945_s1 + $0x140] sm:$0xf]  ;;  %v1223_v41 = vld [vmem:[%s1945_s1 + $0x144] sm:$0xf0]  ;;  %v897_v45 = vor.u32 %v1207_v39, %v896_v37  ;;  %v1189_v48 = vld [vmem:[%s1945_s1 + $0x34] sm:$0xf0] }
   0xf   :  { %v1024_v42 = vld [vmem:[%s1945_s1 + $0x1c0] sm:$0xf]  ;;  %v1239_v43 = vld [vmem:[%s1945_s1 + $0x1c4] sm:$0xf0]  ;;  %636 = vmatpush.bf16.msra.mxu0 %v841_v29  ;;  %v961_v46 = vor.u32 %v1223_v41, %v960_v40  ;;  %v888_v49 = vld [vmem:[%s1945_s1 + $0xb0] sm:$0xf]  ;;  %v825_v56 = vor.u32 %v1189_v48, %v824_v47 }
  0x10   :  { %649 = vmatpush.bf16.msra.mxu1 %v905_v33  ;;  %v1025_v50 = vor.u32 %v1239_v43, %v1024_v42  ;;  %v1205_v51 = vld [vmem:[%s1945_s1 + $0xb4] sm:$0xf0]  ;;  %v952_v52 = vld [vmem:[%s1945_s1 + $0x130] sm:$0xf]  ;;  %v816_v59 = vld [vmem:[%s1945_s1 + $0x20] sm:$0xf] }
  0x11   :  { %662 = vmatpush.bf16.msra.mxu2 %v969_v34  ;;  %v1221_v53 = vld [vmem:[%s1945_s1 + $0x134] sm:$0xf0]  ;;  %v1016_v54 = vld [vmem:[%s1945_s1 + $0x1b0] sm:$0xf]  ;;  %v889_v57 = vor.u32 %v1205_v51, %v888_v49  ;;  %v1187_v60 = vld [vmem:[%s1945_s1 + $0x24] sm:$0xf0] }
  0x12   :  { %675 = vmatpush.bf16.msra.mxu3 %v1033_v38  ;;  %v1237_v55 = vld [vmem:[%s1945_s1 + $0x1b4] sm:$0xf0]  ;;  %v953_v58 = vor.u32 %v1221_v53, %v952_v52  ;;  %v880_v61 = vld [vmem:[%s1945_s1 + $0xa0] sm:$0xf]  ;;  %v1203_v63 = vld [vmem:[%s1945_s1 + $0xa4] sm:$0xf0]  ;;  %v817_v4 = vor.u32 %v1187_v60, %v816_v59 }
  0x13   :  { %637 = vmatpush.bf16.msra.mxu0 %v833_v44  ;;  %v1017_v62 = vor.u32 %v1237_v55, %v1016_v54  ;;  %v944_v0 = vld [vmem:[%s1945_s1 + $0x120] sm:$0xf]  ;;  %v1219_v1 = vld [vmem:[%s1945_s1 + $0x124] sm:$0xf0]  ;;  %v881_v5 = vor.u32 %v1203_v63, %v880_v61  ;;  %v808_v7 = vld [vmem:[%s1945_s1 + $0x10] sm:$0xf] }
  0x14   :  { %650 = vmatpush.bf16.msra.mxu1 %v897_v45  ;;  %v1008_v2 = vld [vmem:[%s1945_s1 + $0x1a0] sm:$0xf]  ;;  %v1235_v3 = vld [vmem:[%s1945_s1 + $0x1a4] sm:$0xf0]  ;;  %v945_v6 = vor.u32 %v1219_v1, %v944_v0  ;;  %v1185_v8 = vld [vmem:[%s1945_s1 + $0x14] sm:$0xf0] }
  0x15   :  { %663 = vmatpush.bf16.msra.mxu2 %v961_v46  ;;  %v872_v9 = vld [vmem:[%s1945_s1 + $0x90] sm:$0xf]  ;;  %v1009_v10 = vor.u32 %v1235_v3, %v1008_v2  ;;  %v1201_v11 = vld [vmem:[%s1945_s1 + $0x94] sm:$0xf0]  ;;  %v809_v16 = vor.u32 %v1185_v8, %v808_v7  ;;  %v800_v17 = vld [vmem:[%s1945_s1] sm:$0xf] }
  0x16   :  { %676 = vmatpush.bf16.msra.mxu3 %v1025_v50  ;;  %v936_v12 = vld [vmem:[%s1945_s1 + $0x110] sm:$0xf]  ;;  %v1217_v13 = vld [vmem:[%s1945_s1 + $0x114] sm:$0xf0]  ;;  %v1183_v18 = vld [vmem:[%s1945_s1 + $0x4] sm:$0xf0]  ;;  %v873_v19 = vor.u32 %v1201_v11, %v872_v9 }
  0x17   :  { %638 = vmatpush.bf16.msra.mxu0 %v825_v56  ;;  %v1000_v14 = vld [vmem:[%s1945_s1 + $0x190] sm:$0xf]  ;;  %v1233_v15 = vld [vmem:[%s1945_s1 + $0x194] sm:$0xf0]  ;;  %v937_v20 = vor.u32 %v1217_v13, %v936_v12  ;;  %v864_v21 = vld [vmem:[%s1945_s1 + $0x80] sm:$0xf]  ;;  %v801_v31 = vor.u32 %v1183_v18, %v800_v17 }
  0x18   :  { %651 = vmatpush.bf16.msra.mxu1 %v889_v57  ;;  %v1199_v22 = vld [vmem:[%s1945_s1 + $0x84] sm:$0xf0]  ;;  %v928_v23 = vld [vmem:[%s1945_s1 + $0x100] sm:$0xf]  ;;  %v1001_v24 = vor.u32 %v1233_v15, %v1000_v14  ;;  %v1112_v28 = vld [vmem:[%s1945_s1 + $0x270] sm:$0xf] }
  0x19   :  { %664 = vmatpush.bf16.msra.mxu2 %v953_v58  ;;  %v1215_v25 = vld [vmem:[%s1945_s1 + $0x104] sm:$0xf0]  ;;  %v992_v26 = vld [vmem:[%s1945_s1 + $0x180] sm:$0xf]  ;;  %v1261_v29 = vld [vmem:[%s1945_s1 + $0x274] sm:$0xf0]  ;;  %v865_v35 = vor.u32 %v1199_v22, %v864_v21 }
  0x1a   :  { %677 = vmatpush.bf16.msra.mxu3 %v1017_v62  ;;  %v1231_v27 = vld [vmem:[%s1945_s1 + $0x184] sm:$0xf0]  ;;  %v1176_v30 = vld [vmem:[%s1945_s1 + $0x2f0] sm:$0xf]  ;;  %v1277_v32 = vld [vmem:[%s1945_s1 + $0x2f4] sm:$0xf0]  ;;  %v929_v36 = vor.u32 %v1215_v25, %v928_v23  ;;  %v1113_v40 = vor.u32 %v1261_v29, %v1112_v28 }
  0x1b   :  { %639 = vmatpush.bf16.msra.mxu0 %v817_v4  ;;  %v1196_v33 = vld [vmem:[%s1945_s1 + $0x74] sm:$0xf]  ;;  %v858_v34 = vld [vmem:[%s1945_s1 + $0x78] sm:$0xf0]  ;;  %v993_v39 = vor.u32 %v1231_v27, %v992_v26  ;;  %v1177_v41 = vor.u32 %v1277_v32, %v1176_v30  ;;  %v1104_v43 = vld [vmem:[%s1945_s1 + $0x260] sm:$0xf] }
  0x1c   :  { %652 = vmatpush.bf16.msra.mxu1 %v881_v5  ;;  %v1212_v37 = vld [vmem:[%s1945_s1 + $0xf4] sm:$0xf]  ;;  %v922_v38 = vld [vmem:[%s1945_s1 + $0xf8] sm:$0xf0]  ;;  %v861_v42 = vor.u32 %v1196_v33, %v858_v34  ;;  %v1259_v44 = vld [vmem:[%s1945_s1 + $0x264] sm:$0xf0] }
  0x1d   :  { %665 = vmatpush.bf16.msra.mxu2 %v945_v6  ;;  %v1168_v45 = vld [vmem:[%s1945_s1 + $0x2e0] sm:$0xf]  ;;  %v925_v46 = vor.u32 %v1212_v37, %v922_v38  ;;  %v1275_v47 = vld [vmem:[%s1945_s1 + $0x2e4] sm:$0xf0]  ;;  %v1194_v48 = vld [vmem:[%s1945_s1 + $0x64] sm:$0xf]  ;;  %v1105_v52 = vor.u32 %v1259_v44, %v1104_v43 }
  0x1e   :  { %678 = vmatpush.bf16.msra.mxu3 %v1009_v10  ;;  %v850_v49 = vld [vmem:[%s1945_s1 + $0x68] sm:$0xf0]  ;;  %v1210_v50 = vld [vmem:[%s1945_s1 + $0xe4] sm:$0xf]  ;;  %v1096_v53 = vld [vmem:[%s1945_s1 + $0x250] sm:$0xf]  ;;  %v1169_v55 = vor.u32 %v1275_v47, %v1168_v45 }
  0x1f   :  { %640 = vmatpush.bf16.msra.mxu0 %v809_v16  ;;  %v914_v51 = vld [vmem:[%s1945_s1 + $0xe8] sm:$0xf0]  ;;  %v1257_v54 = vld [vmem:[%s1945_s1 + $0x254] sm:$0xf0]  ;;  %v853_v56 = vor.u32 %v1194_v48, %v850_v49  ;;  %v1160_v57 = vld [vmem:[%s1945_s1 + $0x2d0] sm:$0xf] }
  0x20   :  { %653 = vmatpush.bf16.msra.mxu1 %v873_v19  ;;  %v1273_v58 = vld [vmem:[%s1945_s1 + $0x2d4] sm:$0xf0]  ;;  %v28_v59 = vld [vmem:[%s1944_s0] sm:$0xff]  ;;  %v917_v60 = vor.u32 %v1210_v50, %v914_v51  ;;  %v1192_v61 = vld [vmem:[%s1945_s1 + $0x54] sm:$0xf]  ;;  %v1097_v6 = vor.u32 %v1257_v54, %v1096_v53  ;;  %vm791_vm0 = vcmask 523264  }
  0x21   :  { %666 = vmatpush.bf16.msra.mxu2 %v937_v20  ;;  %v842_v62 = vld [vmem:[%s1945_s1 + $0x58] sm:$0xf0]  ;;  %v136_v63 = vunpack.c.l.b16 %v28_v59  ;;  %v29_v0 = vld [vmem:[%s1944_s0 + $0x8] sm:$0xff]  ;;  %v137_v1 = vunpack.c.h.b16 %v28_v59  ;;  %v1208_v2 = vld [vmem:[%s1945_s1 + $0xd4] sm:$0xf]  ;;  %v1161_v7 = vor.u32 %v1273_v58, %v1160_v57 }
  0x22   :  { %679 = vmatpush.bf16.msra.mxu3 %v1001_v24  ;;  %v906_v3 = vld [vmem:[%s1945_s1 + $0xd8] sm:$0xf0]  ;;  %v138_v4 = vunpack.c.l.b16 %v29_v0  ;;  %v139_v5 = vunpack.c.h.b16 %v29_v0  ;;  %v845_v10 = vor.u32 %v1192_v61, %v842_v62  ;;  %v1088_v11 = vld [vmem:[%s1945_s1 + $0x240] sm:$0xf]  ;;  %v1255_v12 = vld [vmem:[%s1945_s1 + $0x244] sm:$0xf0] }
  0x23   :  { %641 = vmatpush.bf16.msra.mxu0 %v801_v31  ;;  %v1599_v8 = vpack.c.b16 %v136_v63, %v136_v63  ;;  %v1601_v9 = vpack.c.b16 %v137_v1, %v137_v1  ;;  %v1152_v13 = vld [vmem:[%s1945_s1 + $0x2c0] sm:$0xf]  ;;  %v909_v16 = vor.u32 %v1208_v2, %v906_v3  ;;  %v1271_v17 = vld [vmem:[%s1945_s1 + $0x2c4] sm:$0xf0]  ;;  %v1190_v18 = vld [vmem:[%s1945_s1 + $0x44] sm:$0xf]  ;;  %v1089_v22 = vor.u32 %v1255_v12, %v1088_v11 }
  0x24   :  { %654 = vmatpush.bf16.msra.mxu1 %v865_v35  ;;  %v1612_v14 = vpack.c.b16 %v138_v4, %v138_v4  ;;  %v1614_v15 = vpack.c.b16 %v139_v5, %v139_v5  ;;  %v834_v19 = vld [vmem:[%s1945_s1 + $0x48] sm:$0xf0]  ;;  %v1206_v20 = vld [vmem:[%s1945_s1 + $0xc4] sm:$0xf]  ;;  %v1153_v23 = vor.u32 %v1271_v17, %v1152_v13  ;;  %v1080_v25 = vld [vmem:[%s1945_s1 + $0x230] sm:$0xf] }
  0x25   :  { %667 = vmatpush.bf16.msra.mxu2 %v929_v36  ;;  %v898_v21 = vld [vmem:[%s1945_s1 + $0xc8] sm:$0xf0]  ;;  %v837_v24 = vor.u32 %v1190_v18, %v834_v19  ;;  %v1253_v26 = vld [vmem:[%s1945_s1 + $0x234] sm:$0xf0]  ;;  %v1144_v27 = vld [vmem:[%s1945_s1 + $0x2b0] sm:$0xf] }
  0x26   :  { %680 = vmatpush.bf16.msra.mxu3 %v993_v39  ;;  %642 = vmatmul.bf16.vlgmr.msra.gmra.mxu0 %v1599_v8  ;;  %v901_v28 = vor.u32 %v1206_v20, %v898_v21  ;;  %v1269_v29 = vld [vmem:[%s1945_s1 + $0x2b4] sm:$0xf0]  ;;  %v1188_v30 = vld [vmem:[%s1945_s1 + $0x34] sm:$0xf]  ;;  %v826_v31 = vld [vmem:[%s1945_s1 + $0x38] sm:$0xf0]  ;;  %v1081_v34 = vor.u32 %v1253_v26, %v1080_v25 }
  0x27   :  { %686 = vmatpush.bf16.msrb.mxu0 %v1113_v40  ;;  %655 = vmatmul.bf16.vlgmr.msra.gmra.mxu1 %v1601_v9  ;;  %v1204_v32 = vld [vmem:[%s1945_s1 + $0xb4] sm:$0xf]  ;;  %v890_v33 = vld [vmem:[%s1945_s1 + $0xb8] sm:$0xf0]  ;;  %v1145_v35 = vor.u32 %v1269_v29, %v1144_v27  ;;  %v829_v36 = vor.u32 %v1188_v30, %v826_v31  ;;  %v1072_v37 = vld [vmem:[%s1945_s1 + $0x220] sm:$0xf] }
  0x28   :  { %699 = vmatpush.bf16.msrb.mxu1 %v1177_v41  ;;  %668 = vmatmul.bf16.vlgmr.msra.gmra.mxu2 %v1612_v14  ;;  %v1251_v38 = vld [vmem:[%s1945_s1 + $0x224] sm:$0xf0]  ;;  %v1136_v39 = vld [vmem:[%s1945_s1 + $0x2a0] sm:$0xf]  ;;  %v893_v40 = vor.u32 %v1204_v32, %v890_v33  ;;  %v818_v43 = vld [vmem:[%s1945_s1 + $0x28] sm:$0xf0] }
  0x29   :  { %712 = vmatpush.bf16.msrb.mxu2 %v861_v42  ;;  %681 = vmatmul.bf16.vlgmr.msra.gmra.mxu3 %v1614_v15  ;;  %v1267_v41 = vld [vmem:[%s1945_s1 + $0x2a4] sm:$0xf0]  ;;  %v1186_v42 = vld [vmem:[%s1945_s1 + $0x24] sm:$0xf]  ;;  %v882_v45 = vld [vmem:[%s1945_s1 + $0xa8] sm:$0xf0] }
  0x2a   :  { %725 = vmatpush.bf16.msrb.mxu3 %v925_v46  ;;  %v1202_v44 = vld [vmem:[%s1945_s1 + $0xa4] sm:$0xf]  ;;  %v1073_v46 = vor.u32 %v1251_v38, %v1072_v37  ;;  %v1137_v47 = vor.u32 %v1267_v41, %v1136_v39  ;;  %v821_v48 = vor.u32 %v1186_v42, %v818_v43  ;;  %v1064_v49 = vld [vmem:[%s1945_s1 + $0x210] sm:$0xf]  ;;  %v1249_v50 = vld [vmem:[%s1945_s1 + $0x214] sm:$0xf0] }
  0x2b   :  { %687 = vmatpush.bf16.msrb.mxu0 %v1105_v52  ;;  %v1128_v51 = vld [vmem:[%s1945_s1 + $0x290] sm:$0xf]  ;;  %v885_v52 = vor.u32 %v1202_v44, %v882_v45  ;;  %v1265_v53 = vld [vmem:[%s1945_s1 + $0x294] sm:$0xf0]  ;;  %v1184_v54 = vld [vmem:[%s1945_s1 + $0x14] sm:$0xf]  ;;  %v1065_v58 = vor.u32 %v1249_v50, %v1064_v49 }
  0x2c   :  { %700 = vmatpush.bf16.msrb.mxu1 %v1169_v55  ;;  %v810_v55 = vld [vmem:[%s1945_s1 + $0x18] sm:$0xf0]  ;;  %v1056_v59 = vld [vmem:[%s1945_s1 + $0x200] sm:$0xf]  ;;  %v1129_v62 = vor.u32 %v1265_v53, %v1128_v51  ;;  %v1263_v0 = vld [vmem:[%s1945_s1 + $0x284] sm:$0xf0] }
  0x2d   :  { %713 = vmatpush.bf16.msrb.mxu2 %v853_v56  ;;  %v1200_v56 = vld [vmem:[%s1945_s1 + $0x94] sm:$0xf]  ;;  %v874_v57 = vld [vmem:[%s1945_s1 + $0x98] sm:$0xf0]  ;;  %v1120_v61 = vld [vmem:[%s1945_s1 + $0x280] sm:$0xf]  ;;  %v813_v63 = vor.u32 %v1184_v54, %v810_v55 }
  0x2e   :  { %726 = vmatpush.bf16.msrb.mxu3 %v917_v60  ;;  %v1247_v60 = vld [vmem:[%s1945_s1 + $0x204] sm:$0xf0]  ;;  %v1182_v1 = vld [vmem:[%s1945_s1 + $0x4] sm:$0xf]  ;;  %v30_v2 = vld [vmem:[%s1944_s0 + $0x10] sm:$0xff]  ;;  %v877_v3 = vor.u32 %v1200_v56, %v874_v57  ;;  %v1121_v19 = vor.u32 %v1263_v0, %v1120_v61 }
  0x2f   :  { %688 = vmatpush.bf16.msrb.mxu0 %v1097_v6  ;;  %v802_v4 = vld [vmem:[%s1945_s1 + $0x8] sm:$0xf0]  ;;  %v1198_v5 = vld [vmem:[%s1945_s1 + $0x84] sm:$0xf]  ;;  %v1244_v11 = vld [vmem:[%s1945_s1 + $0x1f4] sm:$0xf]  ;;  %v1057_v12 = vor.u32 %v1247_v60, %v1056_v59  ;;  %v140_v18 = vunpack.c.l.b16 %v30_v2  ;;  %v141_v25 = vunpack.c.h.b16 %v30_v2 }
  0x30   :  { %701 = vmatpush.bf16.msrb.mxu1 %v1161_v7  ;;  %v866_v6 = vld [vmem:[%s1945_s1 + $0x88] sm:$0xf0]  ;;  %v1228_v7 = vld [vmem:[%s1945_s1 + $0x174] sm:$0xf]  ;;  %v1050_v13 = vld [vmem:[%s1945_s1 + $0x1f8] sm:$0xf0]  ;;  %v805_v20 = vor.u32 %v1182_v1, %v802_v4 }
  0x31   :  { %714 = vmatpush.bf16.msrb.mxu2 %v845_v10  ;;  %v986_v10 = vld [vmem:[%s1945_s1 + $0x178] sm:$0xf0]  ;;  %v1276_v21 = vld [vmem:[%s1945_s1 + $0x2f4] sm:$0xf]  ;;  %v1053_v26 = vor.u32 %v1244_v11, %v1050_v13  ;;  %v978_v29 = vld [vmem:[%s1945_s1 + $0x168] sm:$0xf0]  ;;  %v1784_v39 = vpack.c.b16 %v141_v25, %v141_v25 }
  0x32   :  { %727 = vmatpush.bf16.msrb.mxu3 %v909_v16  ;;  %v1260_v16 = vld [vmem:[%s1945_s1 + $0x274] sm:$0xf]  ;;  %v1114_v17 = vld [vmem:[%s1945_s1 + $0x278] sm:$0xf0]  ;;  %v1242_v30 = vld [vmem:[%s1945_s1 + $0x1e4] sm:$0xf] }
  0x33   :  { %689 = vmatpush.bf16.msrb.mxu0 %v1089_v22  ;;  %v1178_v22 = vld [vmem:[%s1945_s1 + $0x2f8] sm:$0xf0]  ;;  %v1117_v27 = vor.u32 %v1260_v16, %v1114_v17  ;;  %v1042_v32 = vld [vmem:[%s1945_s1 + $0x1e8] sm:$0xf0]  ;;  %v1258_v33 = vld [vmem:[%s1945_s1 + $0x264] sm:$0xf] }
  0x34   :  { %702 = vmatpush.bf16.msrb.mxu1 %v1153_v23  ;;  %v869_v23 = vor.u32 %v1198_v5, %v866_v6  ;;  %v1181_v31 = vor.u32 %v1276_v21, %v1178_v22  ;;  %v1170_v37 = vld [vmem:[%s1945_s1 + $0x2e8] sm:$0xf0]  ;;  %v1224_v42 = vld [vmem:[%s1945_s1 + $0x154] sm:$0xf]  ;;  %v970_v43 = vld [vmem:[%s1945_s1 + $0x158] sm:$0xf0] }
  0x35   :  { %715 = vmatpush.bf16.msrb.mxu2 %v837_v24  ;;  %v989_v24 = vor.u32 %v1228_v7, %v986_v10  ;;  %v1240_v44 = vld [vmem:[%s1945_s1 + $0x1d4] sm:$0xf]  ;;  %v1162_v50 = vld [vmem:[%s1945_s1 + $0x2d8] sm:$0xf0]  ;;  %v973_v51 = vor.u32 %v1224_v42, %v970_v43  ;;  %v1238_v54 = vld [vmem:[%s1945_s1 + $0x1c4] sm:$0xf] }
  0x36   :  { %728 = vmatpush.bf16.msrb.mxu3 %v901_v28  ;;  %v1226_v28 = vld [vmem:[%s1945_s1 + $0x164] sm:$0xf]  ;;  %v1272_v49 = vld [vmem:[%s1945_s1 + $0x2d4] sm:$0xf]  ;;  %v1026_v56 = vld [vmem:[%s1945_s1 + $0x1c8] sm:$0xf0] }
  0x37   :  { %690 = vmatpush.bf16.msrb.mxu0 %v1081_v34  ;;  %v1106_v34 = vld [vmem:[%s1945_s1 + $0x268] sm:$0xf0]  ;;  %v981_v38 = vor.u32 %v1226_v28, %v978_v29  ;;  %v1165_v55 = vor.u32 %v1272_v49, %v1162_v50  ;;  %v1254_v57 = vld [vmem:[%s1945_s1 + $0x244] sm:$0xf]  ;;  %v1220_v0 = vld [vmem:[%s1945_s1 + $0x134] sm:$0xf] }
  0x38   :  { %703 = vmatpush.bf16.msrb.mxu1 %v1145_v35  ;;  %v1776_v35 = vpack.c.b16 %v140_v18, %v140_v18  ;;  %v1109_v41 = vor.u32 %v1258_v33, %v1106_v34  ;;  %v1270_v59 = vld [vmem:[%s1945_s1 + $0x2c4] sm:$0xf]  ;;  %v1154_v60 = vld [vmem:[%s1945_s1 + $0x2c8] sm:$0xf0]  ;;  %v954_v1 = vld [vmem:[%s1945_s1 + $0x138] sm:$0xf0] }
  0x39   :  { %716 = vmatpush.bf16.msrb.mxu2 %v829_v36  ;;  %v1274_v36 = vld [vmem:[%s1945_s1 + $0x2e4] sm:$0xf]  ;;  %v1236_v2 = vld [vmem:[%s1945_s1 + $0x1b4] sm:$0xf]  ;;  %v1018_v4 = vld [vmem:[%s1945_s1 + $0x1b8] sm:$0xf0]  ;;  %v957_v11 = vor.u32 %v1220_v0, %v954_v1 }
  0x3a   :  { %729 = vmatpush.bf16.msrb.mxu3 %v893_v40  ;;  %v1045_v40 = vor.u32 %v1242_v30, %v1042_v32  ;;  %v1173_v45 = vor.u32 %v1274_v36, %v1170_v37  ;;  %v1252_v5 = vld [vmem:[%s1945_s1 + $0x234] sm:$0xf]  ;;  %v1082_v6 = vld [vmem:[%s1945_s1 + $0x238] sm:$0xf0]  ;;  %v1218_v16 = vld [vmem:[%s1945_s1 + $0x124] sm:$0xf] }
  0x3b   :  { %691 = vmatpush.bf16.msrb.mxu0 %v1073_v46  ;;  %v1034_v46 = vld [vmem:[%s1945_s1 + $0x1d8] sm:$0xf0]  ;;  %v1268_v7 = vld [vmem:[%s1945_s1 + $0x2b4] sm:$0xf]  ;;  %v1085_v13 = vor.u32 %v1252_v5, %v1082_v6  ;;  %v946_v17 = vld [vmem:[%s1945_s1 + $0x128] sm:$0xf0] }
  0x3c   :  { %704 = vmatpush.bf16.msrb.mxu1 %v1137_v47  ;;  %v1256_v47 = vld [vmem:[%s1945_s1 + $0x254] sm:$0xf]  ;;  %v1146_v10 = vld [vmem:[%s1945_s1 + $0x2b8] sm:$0xf0]  ;;  %v1234_v18 = vld [vmem:[%s1945_s1 + $0x1a4] sm:$0xf]  ;;  %v949_v25 = vor.u32 %v1218_v16, %v946_v17 }
  0x3d   :  { %717 = vmatpush.bf16.msrb.mxu2 %v821_v48  ;;  %v1098_v48 = vld [vmem:[%s1945_s1 + $0x258] sm:$0xf0]  ;;  %v1250_v21 = vld [vmem:[%s1945_s1 + $0x224] sm:$0xf]  ;;  %v1074_v22 = vld [vmem:[%s1945_s1 + $0x228] sm:$0xf0] }
  0x3e   :  { %730 = vmatpush.bf16.msrb.mxu3 %v885_v52  ;;  %v1037_v52 = vor.u32 %v1240_v44, %v1034_v46  ;;  %v1101_v53 = vor.u32 %v1256_v47, %v1098_v48  ;;  %v1216_v28 = vld [vmem:[%s1945_s1 + $0x114] sm:$0xf]  ;;  %v938_v29 = vld [vmem:[%s1945_s1 + $0x118] sm:$0xf0]  ;;  %v1214_v42 = vld [vmem:[%s1945_s1 + $0x104] sm:$0xf] }
  0x3f   :  { %692 = vmatpush.bf16.msrb.mxu0 %v1065_v58  ;;  %v1090_v58 = vld [vmem:[%s1945_s1 + $0x248] sm:$0xf0]  ;;  %v1232_v30 = vld [vmem:[%s1945_s1 + $0x194] sm:$0xf]  ;;  %v1002_v32 = vld [vmem:[%s1945_s1 + $0x198] sm:$0xf0] }
  0x40   :  { %705 = vmatpush.bf16.msrb.mxu1 %v1129_v62  ;;  %v1029_v62 = vor.u32 %v1238_v54, %v1026_v56  ;;  %v1248_v33 = vld [vmem:[%s1945_s1 + $0x214] sm:$0xf]  ;;  %v1066_v34 = vld [vmem:[%s1945_s1 + $0x218] sm:$0xf0]  ;;  %v930_v43 = vld [vmem:[%s1945_s1 + $0x108] sm:$0xf0] }
  0x41   :  { %718 = vmatpush.bf16.msrb.mxu2 %v813_v63  ;;  %v1093_v63 = vor.u32 %v1254_v57, %v1090_v58  ;;  %v1264_v36 = vld [vmem:[%s1945_s1 + $0x294] sm:$0xf]  ;;  %v1130_v37 = vld [vmem:[%s1945_s1 + $0x298] sm:$0xf0]  ;;  %v1230_v44 = vld [vmem:[%s1945_s1 + $0x184] sm:$0xf] }
  0x42   :  { %731 = vmatpush.bf16.msrb.mxu3 %v877_v3  ;;  %v1157_v3 = vor.u32 %v1270_v59, %v1154_v60  ;;  %v994_v46 = vld [vmem:[%s1945_s1 + $0x188] sm:$0xf0]  ;;  %v1246_v47 = vld [vmem:[%s1945_s1 + $0x204] sm:$0xf] }
  0x43   :  { %693 = vmatpush.bf16.msrb.mxu0 %v1057_v12  ;;  %v1021_v12 = vor.u32 %v1236_v2, %v1018_v4  ;;  %v1058_v48 = vld [vmem:[%s1945_s1 + $0x208] sm:$0xf0]  ;;  %v1262_v49 = vld [vmem:[%s1945_s1 + $0x284] sm:$0xf] }
  0x44   :  { %706 = vmatpush.bf16.msrb.mxu1 %v1121_v19  ;;  %v1149_v19 = vor.u32 %v1268_v7, %v1146_v10  ;;  %v1122_v50 = vld [vmem:[%s1945_s1 + $0x288] sm:$0xf0] }
  0x45   :  { %719 = vmatpush.bf16.msrb.mxu2 %v805_v20  ;;  %v1010_v20 = vld [vmem:[%s1945_s1 + $0x1a8] sm:$0xf0] }
  0x46   :  { %732 = vmatpush.bf16.msrb.mxu3 %v869_v23  ;;  %694 = vmatmul.bf16.vlgmr.msrb.gmra.mxu0 %v1776_v35  ;;  %v1266_v23 = vld [vmem:[%s1945_s1 + $0x2a4] sm:$0xf] }
  0x47   :  { %738 = vmatpush.bf16.msra.mxu0 %v989_v24  ;;  %707 = vmatmul.bf16.vlgmr.msrb.gmra.mxu1 %v1784_v39  ;;  %v1138_v24 = vld [vmem:[%s1945_s1 + $0x2a8] sm:$0xf0] }
  0x48   :  { %751 = vmatpush.bf16.msra.mxu1 %v1053_v26  ;;  %720 = vmatmul.bf16.vlgmr.msrb.gmra.mxu2 %v1599_v8  ;;  %v1222_v8 = vld [vmem:[%s1945_s1 + $0x144] sm:$0xf]  ;;  %v1013_v26 = vor.u32 %v1234_v18, %v1010_v20 }
  0x49   :  { %764 = vmatpush.bf16.msra.mxu2 %v1117_v27  ;;  %733 = vmatmul.bf16.vlgmr.msrb.gmra.mxu3 %v1601_v9  ;;  %v962_v9 = vld [vmem:[%s1945_s1 + $0x148] sm:$0xf0]  ;;  %v1077_v27 = vor.u32 %v1250_v21, %v1074_v22 }
  0x4a   :  { %777 = vmatpush.bf16.msra.mxu3 %v1181_v31  ;;  %v965_v61 = vor.u32 %v1222_v8, %v962_v9  ;;  %v1141_v31 = vor.u32 %v1266_v23, %v1138_v24  ;;  %v1125_v8 = vor.u32 %v1262_v49, %v1122_v50 }
  0x4b   :  { %739 = vmatpush.bf16.msra.mxu0 %v981_v38  ;;  %v941_v38 = vor.u32 %v1216_v28, %v938_v29 }
  0x4c   :  { %752 = vmatpush.bf16.msra.mxu1 %v1045_v40  ;;  %v1005_v40 = vor.u32 %v1232_v30, %v1002_v32 }
  0x4d   :  { %765 = vmatpush.bf16.msra.mxu2 %v1109_v41  ;;  %v1069_v41 = vor.u32 %v1248_v33, %v1066_v34 }
  0x4e   :  { %778 = vmatpush.bf16.msra.mxu3 %v1173_v45  ;;  %v1133_v45 = vor.u32 %v1264_v36, %v1130_v37 }
  0x4f   :  { %740 = vmatpush.bf16.msra.mxu0 %v973_v51  ;;  %v933_v51 = vor.u32 %v1214_v42, %v930_v43 }
  0x50   :  { %753 = vmatpush.bf16.msra.mxu1 %v1037_v52  ;;  %v997_v52 = vor.u32 %v1230_v44, %v994_v46 }
  0x51   :  { %766 = vmatpush.bf16.msra.mxu2 %v1101_v53  ;;  %v1061_v53 = vor.u32 %v1246_v47, %v1058_v48 }
  0x52   :  { %779 = vmatpush.bf16.msra.mxu3 %v1165_v55  ;;  %v127_v55 = vld [vmem:[#allocation2] sm:$0x3] }
  0x53   :  { %741 = vmatpush.bf16.msra.mxu0 %v965_v61  ;;  %v129_v56 = vperm.slane %v127_v55, 0 }
  0x54   :  { %754 = vmatpush.bf16.msra.mxu1 %v1029_v62 }
  0x55   :  { %767 = vmatpush.bf16.msra.mxu2 %v1093_v63 }
  0x56   :  { %780 = vmatpush.bf16.msra.mxu3 %v1157_v3 }
  0x57   :  { %742 = vmatpush.bf16.msra.mxu0 %v957_v11  ;;  %v130_v11 = vperm.slane %v127_v55, 1 }
  0x58   :  { %755 = vmatpush.bf16.msra.mxu1 %v1021_v12 }
  0x59   :  { %768 = vmatpush.bf16.msra.mxu2 %v1085_v13 }
  0x5a   :  { %781 = vmatpush.bf16.msra.mxu3 %v1149_v19 }
  0x5b   :  { %743 = vmatpush.bf16.msra.mxu0 %v949_v25 }
  0x5c   :  { %756 = vmatpush.bf16.msra.mxu1 %v1013_v26 }
  0x5d   :  { %769 = vmatpush.bf16.msra.mxu2 %v1077_v27 }
  0x5e   :  { %782 = vmatpush.bf16.msra.mxu3 %v1141_v31 }
  0x5f   :  { %744 = vmatpush.bf16.msra.mxu0 %v941_v38 }
  0x60   :  { %757 = vmatpush.bf16.msra.mxu1 %v1005_v40 }
  0x61   :  { %770 = vmatpush.bf16.msra.mxu2 %v1069_v41 }
  0x62   :  { %783 = vmatpush.bf16.msra.mxu3 %v1133_v45 }
  0x63   :  { %745 = vmatpush.bf16.msra.mxu0 %v933_v51 }
  0x64   :  { %758 = vmatpush.bf16.msra.mxu1 %v997_v52 }
  0x65   :  { %771 = vmatpush.bf16.msra.mxu2 %v1061_v53 }
  0x66   :  { %784 = vmatpush.bf16.msra.mxu3 %v1125_v8  ;;  %746 = vmatmul.bf16.vlgmr.msra.gmra.mxu0 %v1612_v14 }
  0x67   :  { %759 = vmatmul.bf16.vlgmr.msra.gmra.mxu1 %v1614_v15 }
  0x68   :  { %772 = vmatmul.bf16.vlgmr.msra.gmra.mxu2 %v1776_v35 }
  0x69   :  { %785 = vmatmul.bf16.vlgmr.msra.gmra.mxu3 %v1784_v39 }
  0xa3   :  { %v643_v9 = vpop.f32.mrf.mxu0 }
  0xa4   :  { %v656_v54 = vpop.f32.mrf.mxu1  ;;  %v644_v61 = vadd.f32 %v643_v9, %v129_v56 }
  0xa6   :  { %v657_v62 = vadd.f32 %v656_v54, %v644_v61 }
  0xab   :  { %v669_v57 = vpop.f32.mrf.mxu2  ;;  %v645_v59 = vpop.f32.mrf.mxu0 }
  0xac   :  { %v682_v58 = vpop.f32.mrf.mxu3  ;;  %v658_v60 = vpop.f32.mrf.mxu1  ;;  %v670_v1 = vadd.f32 %v669_v57, %v657_v62 }
  0xae   :  { %v683_v14 = vadd.f32 %v682_v58, %v670_v1 }
  0xb3   :  { %v671_v63 = vpop.f32.mrf.mxu2 }
  0xb4   :  { %v684_v0 = vpop.f32.mrf.mxu3 }
  0xc3   :  { %v695_v2 = vpop.f32.mrf.mxu0 }
  0xc4   :  { %v696_v15 = vadd.f32 %v695_v2, %v683_v14  ;;  %v708_v3 = vpop.f32.mrf.mxu1 }
  0xc6   :  { %v709_v35 = vadd.f32 %v708_v3, %v696_v15 }
  0xc8   :  { %790 = vst [vmem:[%s1947_s3] sm:$0xff] %v709_v35 }
  0xcb   :  { %v721_v39 = vpop.f32.mrf.mxu2  ;;  %v697_v5 = vpop.f32.mrf.mxu0 }
  0xcc   :  { %v734_v4 = vpop.f32.mrf.mxu3  ;;  %v710_v6 = vpop.f32.mrf.mxu1  ;;  %v722_v12 = vadd.f32 %v721_v39, %v130_v11 }
  0xce   :  { %v735_v13 = vadd.f32 %v734_v4, %v722_v12 }
  0xd3   :  { %v723_v7 = vpop.f32.mrf.mxu2 }
  0xd4   :  { %v736_v10 = vpop.f32.mrf.mxu3 }
  0xe3   :  { %v747_v16 = vpop.f32.mrf.mxu0 }
  0xe4   :  { %v760_v17 = vpop.f32.mrf.mxu1  ;;  %v748_v18 = vadd.f32 %v747_v16, %v735_v13 }
  0xe6   :  { %v761_v19 = vadd.f32 %v760_v17, %v748_v18 }
  0xeb   :  { %v773_v20 = vpop.f32.mrf.mxu2  ;;  %v749_v23 = vpop.f32.mrf.mxu0 }
  0xec   :  { %v774_v21 = vadd.f32 %v773_v20, %v761_v19  ;;  %v786_v22 = vpop.f32.mrf.mxu3  ;;  %v762_v24 = vpop.f32.mrf.mxu1 }
  0xee   :  { %v787_v25 = vadd.f32 %v786_v22, %v774_v21 }
  0xf0   :  { %792 = vst.msk [vmem:[%s1947_s3 + $0x8] sm:$0xff] %vm791_vm0, %v787_v25 }
  0xf3   :  { %v775_v26 = vpop.f32.mrf.mxu2 }
  0xf4   :  { %v788_v27 = vpop.f32.mrf.mxu3 }
  0xf5   :  { %797 = vsyncpa [#allocation3], 1 }

// kernel: vit_forward.3
= control target key start
LH: loop header
LB: loop body
LE: loop exit
PB: predicated region body
PF: predicated region fallthrough
CT: control target
= control target key end

     0   :  { %s6189_s0 = inlined_call_operand.vmem [shape: f32[16,192], index: 0, kind: input, shape index: {}]   ;;  %s6190_s1 = inlined_call_operand.vmem [shape: f32[12,8,768], index: 1, kind: input, shape index: {}]   ;;  %s6191_s2 = inlined_call_operand.vmem [shape: bf16[12,192,576], index: 2, kind: input, shape index: {}]   ;;  %s6192_s3 = inlined_call_operand.vmem [shape: bf16[12,192,192], index: 3, kind: input, shape index: {}]   ;;  %s6193_s4 = inlined_call_operand.vmem [shape: bf16[12,192,768], index: 4, kind: input, shape index: {}]   ;;  %s6194_s5 = inlined_call_operand.vmem [shape: bf16[12,768,192], index: 5, kind: input, shape index: {}]   ;;  %s6195_s6 = inlined_call_operand.vmem [shape: f32[2,192], index: 6, kind: input, shape index: {}]   ;;  %s6196_s7 = inlined_call_operand.vmem [shape: bf16[192,128], index: 7, kind: input, shape index: {}]   ;;  %s6197_s8 = inlined_call_operand.vmem [shape: f32[1,128], index: 8, kind: input, shape index: {}]   ;;  %s6198_s9 = inlined_call_operand.hbm [shape: f32[2,1,128], index: 9, kind: output, shape index: {}]  }
   0x1   :  { %6209 = sst [smem:[#allocation16_spill]] %s6189_s0 }
   0x2   :  { %14 = vsyncpa [#allocation4], 0 }
   0x3   :  { %16 = vsyncpa [#allocation4 + $0x1], 0  ;;  %s5041_s30 = smov 0   ;;  %s5043_s10 = smov 0  }
   0x4   :  { %s5045_s11 = smov 0   ;;  %s5047_s12 = smov 0  }
   0x5   :  { %s5049_s13 = smov 0   ;;  %s5051_s14 = smov 0  }
   0x6   :  { %s5053_s15 = smov 0   ;;  %s5055_s16 = smov 0  }
   0x7 LB: > { %6210 = sst [smem:[#allocation6_spill]] %s4958_s30  ;;  %s3404_s17 = sadd.s32 4294967295, %s4986_s16   ;;  %s4986_s16 = sphi %s5055_s16, %s22_s16   ;;  %s4982_s15 = sphi %s5053_s15, %s6246_s15   ;;  %s4978_s14 = sphi %s5051_s14, %s6245_s14   ;;  %s4974_s13 = sphi %s5049_s13, %s6244_s13   ;;  %s4970_s12 = sphi %s5047_s12, %s6243_s12   ;;  %s4966_s11 = sphi %s5045_s11, %s6242_s11   ;;  %s4962_s10 = sphi %s5043_s10, %s6248_s10   ;;  %s4958_s30 = sphi %s5041_s30, %s6247_s30  }
   0x8   : > { %6211 = sst [smem:[#allocation7_spill]] %s4966_s11  ;;  %s3405_s18 = sadd.s32 4294967294, %s4986_s16  }
   0x9   : > { %6212 = sst [smem:[#allocation8_spill]] %s4978_s14  ;;  %s31_s19 = sadd.s32 1, %s4978_s14 }
   0xa   : > { %6213 = sst [smem:[#allocation9_spill]] %s4982_s15  ;;  %p32_p0 = scmp.ge.s32.totalorder %s31_s19, 12 }
   0xb   : > { %6214 = sst [smem:[#allocation10_spill]] %s4986_s16  ;;  %s34_s20 = sadd.s32 1, %s4982_s15 }
   0xc   : > { %p270_p1 = scmp.ne.s32.totalorder %s4966_s11, %s4962_s10  ;;  %p271_p2 = scmp.eq.s32.totalorder %s3404_s17, 23 }
   0xd   : > { %s6250_s19 = smov (%p32_p0, %s31_s19), 0  ;;  %s6252_s20 = smov (!%p32_p0, %s34_s20), %s4982_s15 }
   0xe   : > { %6215 = sst [smem:[#allocation11_spill]] %s6250_s19  ;;  %p5090_p3 = por %p271_p2, %p270_p1 }
   0xf   : > { %p276_p4 = scmp.ne.s32.totalorder %s4962_s10, %s4958_s30  ;;  %p36_p5 = scmp.ge.s32.totalorder %s6252_s20, 2 }
  0x10   : > { %s6216_s21 = scalar_select %p5090_p3, 1, 0 }
  0x11   : > { %p277_p6 = scmp.eq.s32.totalorder %s3405_s18, 23  ;;  %p3408_p7 = scmp.ge.s32.totalorder %s4986_s16, 1 }
  0x12   : > { %6217 = sst [smem:[#allocation12_spill]] %s6216_s21  ;;  %p352_p8 = scmp.lt.s32.totalorder %s4986_s16, 25 }
  0x13   : > { %s6254_s20 = smov (%p36_p5, %s6252_s20), 0  ;;  %p5100_p9 = por %p277_p6, %p276_p4 }
  0x14   : > { %6218 = sst [smem:[#allocation13_spill]] %s6254_s20  ;;  %p353_p10 = pnand %p3408_p7, %p352_p8 }
  0x15   : > { %s6219_s22 = scalar_select %p5100_p9, 1, 0 }
  0x16   : > { %s257_s23 = ssub.s32 %s4982_s15, %s6254_s20  ;;  %s260_s24 = sadd.s32 1, %s4966_s11 }
  0x17   : > { %6220 = sst [smem:[#allocation14_spill]] %s6219_s22  ;;  %p258_p11 = scmp.eq.s32.totalorder %s257_s23, 0 }
  0x18   : > { %356 = sbr.rel (%p353_p10) target bundleno = 2859 (0xb2b), region = 56  ;;  %p412_p12 = scmp.lt.s32.totalorder (!%p353_p10), %s4974_s13, 1 }
  0x19   : > { %s5108_s25 = scalar_select %p258_p11, %s4966_s11, %s260_s24  }
  0x1a   : > { %p417_p13 = scmp.lt.s32.totalorder (!%p353_p10), %s4970_s12, 11  ;;  %s6222_s0 = sld [smem:[#allocation16_spill]] (!%p353_p10) }
  0x1b   : > { %6221 = sst [smem:[#allocation15_spill]] %s5108_s25  ;;  %s6223_s11 = sand.u32 (!%p353_p10), 1, %s4962_s10  }
  0x1c   : > { %s5145_s26 = scalar_lea.vmem (!%p353_p10), [#allocation3], %s6223_s11  ;;  %p3416_p0 = scmp.ne.s32.totalorder (!%p353_p10), %s4970_s12, 0 }
  0x1d   : > { %s413_s27 = scalar_select %p412_p12, %s4974_s13, 1 }
  0x1e   : > { %s418_s28 = scalar_select %p417_p13, %s4970_s12, 11 }
  0x1f   : > { %s4507_s29 = sshll.u32 %s413_s27, 4 }
  0x20   : > { %s416_s20 = scalar_lea.vmem %s6222_s0, %s4507_s29  ;;  %s4772_s23 = smul.u32 48, %s418_s28 }
  0x21   : > { %s4773_s24 = smul.u32 480, %s418_s28 }
  0x22   : > { %s5121_s14 = scalar_lea.vmem %s6190_s1, %s4772_s23  ;;  %s4774_s25 = smul.u32 192, %s418_s28 }
  0x23   : > { %s5126_s22 = scalar_lea.vmem %s6191_s2, %s4773_s24  ;;  %s4775_s30 = smul.u32 576, %s418_s28 }
  0x24   : > { %s5131_s21 = scalar_lea.vmem %s6192_s3, %s4774_s25  ;;  %s4776_s29 = smul.u32 768, %s418_s28 }
  0x25   : > { %s5136_s0 = scalar_lea.vmem %s6193_s4, %s4775_s30  ;;  %446 = sbr.rel (%p3416_p0) target bundleno = 45 (0x2d), region = 60 }
  0x26   : > { %s5141_s23 = scalar_lea.vmem %s6194_s5, %s4776_s29 }
  0x2a   : > { %v447_v0 = vld [vmem:[%s416_s20] sm:$0xff]  ;;  %v448_v1 = vld [vmem:[%s416_s20 + $0x8] sm:$0xff]  ;;  %vm450_vm0 = vcmask 523264  }
  0x2b   : > { %449 = vst [vmem:[#allocation2] sm:$0xff] %v447_v0 }
  0x2c   : > { %451 = vst.msk [vmem:[#allocation2 + $0x8] sm:$0xff] %vm450_vm0, %v448_v1 }
  0x2d PF: > { %vm464_vm1 = vcmask 523264   ;;  %v4988_v6 = vmov 192.0   ;;  %v3559_v7 = vld [vmem:[%s5126_s22 + $0x118] sm:$0xf]  ;;  %v4545_v8 = vld [vmem:[%s5126_s22 + $0x128] sm:$0xf0] }
  0x2e   : > { %4851 = vrcp.f32 %v4988_v6  ;;  %v3539_v9 = vld [vmem:[%s5126_s22 + $0xf0] sm:$0xf]  ;;  %v3560_v11 = vor.u32 %v4545_v8, %v3559_v7  ;;  %v4540_v12 = vld [vmem:[%s5126_s22 + $0x100] sm:$0xf0]  ;;  %v4543_v13 = vld [vmem:[%s5126_s22 + $0x11c] sm:$0xf] }
  0x2f   : > { %v3540_v14 = vor.u32 %v4540_v12, %v3539_v9  ;;  %v3561_v15 = vld [vmem:[%s5126_s22 + $0x12c] sm:$0xf0]  ;;  %v3519_v17 = vld [vmem:[%s5126_s22 + $0xc8] sm:$0xf]  ;;  %v4535_v18 = vld [vmem:[%s5126_s22 + $0xd8] sm:$0xf0] }
  0x30   : > { %901 = vmatpush.bf16.msra.mxu0 %v3560_v11  ;;  %v3564_v19 = vor.u32 %v4543_v13, %v3561_v15  ;;  %v3520_v20 = vor.u32 %v4535_v18, %v3519_v17  ;;  %v3499_v22 = vld [vmem:[%s5126_s22 + $0xa0] sm:$0xf]  ;;  %v4530_v23 = vld [vmem:[%s5126_s22 + $0xb0] sm:$0xf0]  ;;  %v3479_v36 = vld [vmem:[%s5126_s22 + $0x78] sm:$0xf] }
  0x31   : > { %v3500_v24 = vor.u32 %v4530_v23, %v3499_v22  ;;  %v4525_v37 = vld [vmem:[%s5126_s22 + $0x88] sm:$0xf0]  ;;  %v3639_v38 = vld [vmem:[%s5126_s22 + $0x1b8] sm:$0xf]  ;;  %v4538_v42 = vld [vmem:[%s5126_s22 + $0xf4] sm:$0xf] }
  0x32   : > { %v458_v2 = vld [vmem:[#allocation2] sm:$0xff]  ;;  %927 = vmatpush.bf16.msra.mxu2 %v3564_v19  ;;  %v4565_v39 = vld [vmem:[%s5126_s22 + $0x1c8] sm:$0xf0]  ;;  %v3480_v40 = vor.u32 %v4525_v37, %v3479_v36  ;;  %v3541_v43 = vld [vmem:[%s5126_s22 + $0x104] sm:$0xf0]  ;;  %s4989_s30 = smov 64  }
  0x33   : > { %v459_v3 = vld [vmem:[#allocation2 + $0x8] sm:$0xff]  ;;  %v3640_v41 = vor.u32 %v4565_v39, %v3639_v38  ;;  %v3544_v44 = vor.u32 %v4538_v42, %v3541_v43  ;;  %v4563_v45 = vld [vmem:[%s5126_s22 + $0x1bc] sm:$0xf]  ;;  %v3641_v46 = vld [vmem:[%s5126_s22 + $0x1cc] sm:$0xf0]  ;;  %vm1096_vm6 = vcmask 1043456  }
  0x34   : > { %v465_v4 = vsel %vm464_vm1, %v459_v3, 0.0  ;;  %v4852_v10 = vpop.eup %4851  ;;  %902 = vmatpush.bf16.msra.mxu0 %v3540_v14  ;;  %v3644_v47 = vor.u32 %v4563_v45, %v3641_v46  ;;  %v3459_v48 = vld [vmem:[%s5126_s22 + $0x50] sm:$0xf]  ;;  %v4520_v49 = vld [vmem:[%s5126_s22 + $0x60] sm:$0xf0]  ;;  %vm1080_vm8 = vcmask 64512  }
  0x35   : > { %v466_v5 = vadd.f32 %v465_v4, %v458_v2  ;;  %v470_v16 = vmul.f32 192.0, %v4852_v10  ;;  %vm474_vm2 = vweird.f32 %v4852_v10  ;;  %918 = vmatpush.bf16.msra.mxu1 %v3640_v41  ;;  %v3619_v50 = vld [vmem:[%s5126_s22 + $0x190] sm:$0xf]  ;;  %v3460_v51 = vor.u32 %v4520_v49, %v3459_v48  ;;  %v4560_v52 = vld [vmem:[%s5126_s22 + $0x1a0] sm:$0xf0]  ;;  %p4454_p1 = scmp.ne.s32.totalorder %s4970_s12, 11 }
  0x36   : > { %928 = vmatpush.bf16.msra.mxu2 %v3544_v44  ;;  %v4533_v53 = vld [vmem:[%s5126_s22 + $0xcc] sm:$0xf]  ;;  %v3521_v54 = vld [vmem:[%s5126_s22 + $0xdc] sm:$0xf0]  ;;  %944 = vmatpush.bf16.msra.mxu3 %v3644_v47  ;;  %v3620_v55 = vor.u32 %v4560_v52, %v3619_v50  ;;  %v4558_v57 = vld [vmem:[%s5126_s22 + $0x194] sm:$0xf] }
  0x37   : > { %467 = vadd.xlane.f32.xlu0 %v466_v5  ;;  %v471_v21 = vsub.f32 1.0, %v470_v16  ;;  %v3524_v56 = vor.u32 %v4533_v53, %v3521_v54  ;;  %v3621_v58 = vld [vmem:[%s5126_s22 + $0x1a4] sm:$0xf0]  ;;  %v4515_v61 = vld [vmem:[%s5126_s22 + $0x38] sm:$0xf0] }
  0x38   : > { %903 = vmatpush.bf16.msra.mxu0 %v3520_v20  ;;  %v3624_v59 = vor.u32 %v4558_v57, %v3621_v58  ;;  %v3439_v60 = vld [vmem:[%s5126_s22 + $0x28] sm:$0xf]  ;;  %v4555_v0 = vld [vmem:[%s5126_s22 + $0x178] sm:$0xf0]  ;;  %v4528_v1 = vld [vmem:[%s5126_s22 + $0xa4] sm:$0xf] }
  0x39   : > { %v472_v25 = vmul.f32 %v4852_v10, %v471_v21  ;;  %919 = vmatpush.bf16.msra.mxu1 %v3620_v55  ;;  %v3599_v62 = vld [vmem:[%s5126_s22 + $0x168] sm:$0xf]  ;;  %v3440_v63 = vor.u32 %v4515_v61, %v3439_v60  ;;  %v4553_v5 = vld [vmem:[%s5126_s22 + $0x16c] sm:$0xf]  ;;  %v3601_v6 = vld [vmem:[%s5126_s22 + $0x17c] sm:$0xf0] }
  0x3a   : > { %929 = vmatpush.bf16.msra.mxu2 %v3524_v56  ;;  %945 = vmatpush.bf16.msra.mxu3 %v3624_v59  ;;  %v3604_v7 = vor.u32 %v4553_v5, %v3601_v6  ;;  %v3419_v8 = vld [vmem:[%s5126_s22] sm:$0xf]  ;;  %v4510_v9 = vld [vmem:[%s5126_s22 + $0x10] sm:$0xf0]  ;;  %v4523_v13 = vld [vmem:[%s5126_s22 + $0x7c] sm:$0xf] }
  0x3b   : > { %v473_v26 = vadd.f32 %v4852_v10, %v472_v25  ;;  %v3420_v11 = vor.u32 %v4510_v9, %v3419_v8  ;;  %v4550_v12 = vld [vmem:[%s5126_s22 + $0x150] sm:$0xf0]  ;;  %v3481_v14 = vld [vmem:[%s5126_s22 + $0x8c] sm:$0xf0]  ;;  %v3567_v17 = vld [vmem:[%s5126_s22 + $0x120] sm:$0xf] }
  0x3c   : > { %904 = vmatpush.bf16.msra.mxu0 %v3500_v24  ;;  %v3484_v16 = vor.u32 %v4523_v13, %v3481_v14  ;;  %v4546_v18 = vld [vmem:[%s5126_s22 + $0x130] sm:$0xf0]  ;;  %v4544_v19 = vld [vmem:[%s5126_s22 + $0x124] sm:$0xf]  ;;  %v3569_v21 = vld [vmem:[%s5126_s22 + $0x134] sm:$0xf0] }
  0x3d   : > { %v5159_v27 = vsel %vm474_vm2, %v4852_v10, %v473_v26  ;;  %v3579_v10 = vld [vmem:[%s5126_s22 + $0x140] sm:$0xf]  ;;  %v3568_v20 = vor.u32 %v4546_v18, %v3567_v17  ;;  %v4548_v22 = vld [vmem:[%s5126_s22 + $0x144] sm:$0xf]  ;;  %v3581_v23 = vld [vmem:[%s5126_s22 + $0x154] sm:$0xf0]  ;;  %v3572_v24 = vor.u32 %v4544_v19, %v3569_v21 }
  0x3e   : > { %946 = vmatpush.bf16.msra.mxu3 %v3604_v7  ;;  %v3580_v15 = vor.u32 %v4550_v12, %v3579_v10  ;;  %v3584_v25 = vor.u32 %v4548_v22, %v3581_v23  ;;  %v3647_v26 = vld [vmem:[%s5126_s22 + $0x1c0] sm:$0xf]  ;;  %v4541_v36 = vld [vmem:[%s5126_s22 + $0x108] sm:$0xf0]  ;;  %v4539_v37 = vld [vmem:[%s5126_s22 + $0xfc] sm:$0xf] }
  0x3f   : > { %v3549_v38 = vld [vmem:[%s5126_s22 + $0x10c] sm:$0xf0]  ;;  %v3627_v41 = vld [vmem:[%s5126_s22 + $0x198] sm:$0xf]  ;;  %v4561_v42 = vld [vmem:[%s5126_s22 + $0x1a8] sm:$0xf0] }
  0x40   : > { %905 = vmatpush.bf16.msra.mxu0 %v3480_v40  ;;  %v3552_v40 = vor.u32 %v4539_v37, %v3549_v38  ;;  %v3628_v43 = vor.u32 %v4561_v42, %v3627_v41  ;;  %v4513_v44 = vld [vmem:[%s5126_s22 + $0x2c] sm:$0xf]  ;;  %v3441_v45 = vld [vmem:[%s5126_s22 + $0x3c] sm:$0xf0]  ;;  %v3527_v46 = vld [vmem:[%s5126_s22 + $0xd0] sm:$0xf] }
  0x41   : > { %v3444_v47 = vor.u32 %v4513_v44, %v3441_v45  ;;  %v4536_v48 = vld [vmem:[%s5126_s22 + $0xe0] sm:$0xf0]  ;;  %v4534_v49 = vld [vmem:[%s5126_s22 + $0xd4] sm:$0xf]  ;;  %v3529_v50 = vld [vmem:[%s5126_s22 + $0xe4] sm:$0xf0] }
  0x42   : > { %947 = vmatpush.bf16.msra.mxu3 %v3584_v25  ;;  %v3532_v52 = vor.u32 %v4534_v49, %v3529_v50  ;;  %v3607_v53 = vld [vmem:[%s5126_s22 + $0x170] sm:$0xf]  ;;  %v4556_v54 = vld [vmem:[%s5126_s22 + $0x180] sm:$0xf0]  ;;  %v3421_v57 = vld [vmem:[%s5126_s22 + $0x14] sm:$0xf0] }
  0x43   : > { %v3608_v55 = vor.u32 %v4556_v54, %v3607_v53  ;;  %v4508_v56 = vld [vmem:[%s5126_s22 + $0x4] sm:$0xf]  ;;  %v3507_v58 = vld [vmem:[%s5126_s22 + $0xa8] sm:$0xf]  ;;  %v4531_v60 = vld [vmem:[%s5126_s22 + $0xb8] sm:$0xf0] }
  0x44   : > { %906 = vmatpush.bf16.msra.mxu0 %v3460_v51  ;;  %v3528_v51 = vor.u32 %v4536_v48, %v3527_v46  ;;  %v3424_v59 = vor.u32 %v4508_v56, %v3421_v57  ;;  %v4529_v61 = vld [vmem:[%s5126_s22 + $0xac] sm:$0xf]  ;;  %v4526_v5 = vld [vmem:[%s5126_s22 + $0x90] sm:$0xf0]  ;;  %v4524_v6 = vld [vmem:[%s5126_s22 + $0x84] sm:$0xf] }
  0x45   : > { %v3489_v8 = vld [vmem:[%s5126_s22 + $0x94] sm:$0xf0]  ;;  %v4564_v9 = vld [vmem:[%s5126_s22 + $0x1c4] sm:$0xf]  ;;  %v4519_v17 = vld [vmem:[%s5126_s22 + $0x5c] sm:$0xf] }
  0x46   : > { %v3649_v10 = vld [vmem:[%s5126_s22 + $0x1d4] sm:$0xf0]  ;;  %v3492_v12 = vor.u32 %v4524_v6, %v3489_v8  ;;  %v3469_v19 = vld [vmem:[%s5126_s22 + $0x6c] sm:$0xf0]  ;;  %v3427_v37 = vld [vmem:[%s5126_s22 + $0x8] sm:$0xf] }
  0x47   : > { %v3652_v13 = vor.u32 %v4564_v9, %v3649_v10  ;;  %v3629_v21 = vld [vmem:[%s5126_s22 + $0x1ac] sm:$0xf0]  ;;  %v3472_v23 = vor.u32 %v4519_v17, %v3469_v19  ;;  %v4511_v38 = vld [vmem:[%s5126_s22 + $0x18] sm:$0xf0]  ;;  %v3429_v41 = vld [vmem:[%s5126_s22 + $0x1c] sm:$0xf0] }
  0x48   : > { %907 = vmatpush.bf16.msra.mxu0 %v3440_v63  ;;  %v3508_v63 = vor.u32 %v4531_v60, %v3507_v58  ;;  %v3447_v25 = vld [vmem:[%s5126_s22 + $0x30] sm:$0xf]  ;;  %v4549_v42 = vld [vmem:[%s5126_s22 + $0x14c] sm:$0xf]  ;;  %v5259_v50 = vld [vmem:[%s5121_s14] sm:$0xff] }
  0x49   : > { %v499_v54 = vperm.slane %v5259_v50, 0  ;;  %v3555_v6 = vld [vmem:[%s5126_s22 + $0x100] sm:$0xf]  ;;  %v4542_v8 = vld [vmem:[%s5126_s22 + $0x110] sm:$0xf0] }
  0x4a   : > { %v3635_v9 = vld [vmem:[%s5126_s22 + $0x1a0] sm:$0xf]  ;;  %v4562_v10 = vld [vmem:[%s5126_s22 + $0x1b0] sm:$0xf0] }
  0x4c   : > { %908 = vmatpush.bf16.msra.mxu0 %v3420_v11 }
  0x50   : > { %979 = vmatpush.bf16.msrb.mxu0 %v3572_v24 }
  0x54   : > { %980 = vmatpush.bf16.msrb.mxu0 %v3552_v40  ;;  %v3428_v40 = vor.u32 %v4511_v38, %v3427_v37  ;;  %v3435_v37 = vld [vmem:[%s5126_s22 + $0x10] sm:$0xf]  ;;  %v4512_v38 = vld [vmem:[%s5126_s22 + $0x20] sm:$0xf0] }
  0x58   : > { %981 = vmatpush.bf16.msrb.mxu0 %v3532_v52 }
  0xaa   : > { %v468_v28 = vpop.xlane.xlu0 %467 }
  0xab   : > { %v476_v29 = vmul.f32 %v5159_v27, %v468_v28  ;;  %v4566_v28 = vld [vmem:[%s5126_s22 + $0x1d0] sm:$0xf0] }
  0xad   : > { %v5162_v30 = vsub.f32 %v458_v2, %v476_v29  ;;  %v5164_v31 = vsub.f32 %v459_v3, %v476_v29  ;;  %v3501_v2 = vld [vmem:[%s5126_s22 + $0xb4] sm:$0xf0]  ;;  %v3600_v3 = vor.u32 %v4555_v0, %v3599_v62  ;;  %v3648_v29 = vor.u32 %v4566_v28, %v3647_v26  ;;  %v3509_v62 = vld [vmem:[%s5126_s22 + $0xbc] sm:$0xf0]  ;;  %v4516_v26 = vld [vmem:[%s5126_s22 + $0x40] sm:$0xf0] }
  0xae   : > { %v3504_v4 = vor.u32 %v4528_v1, %v3501_v2  ;;  %v3512_v0 = vor.u32 %v4529_v61, %v3509_v62  ;;  %v3587_v1 = vld [vmem:[%s5126_s22 + $0x148] sm:$0xf]  ;;  %v4551_v2 = vld [vmem:[%s5126_s22 + $0x158] sm:$0xf0]  ;;  %v4514_v28 = vld [vmem:[%s5126_s22 + $0x34] sm:$0xf] }
  0xaf   : > { %v479_v32 = vmul.f32 %v5162_v30, %v5162_v30  ;;  %v480_v33 = vmul.f32 %v5164_v31, %v5164_v31  ;;  %920 = vmatpush.bf16.msra.mxu1 %v3600_v3  ;;  %970 = vmatpush.bf16.msrb.mxu3 %v3648_v29  ;;  %v3588_v3 = vor.u32 %v4551_v2, %v3587_v1  ;;  %v3655_v1 = vld [vmem:[%s5126_s22 + $0x1c8] sm:$0xf]  ;;  %v4567_v2 = vld [vmem:[%s5126_s22 + $0x1d8] sm:$0xf0] }
  0xb0   : > { %930 = vmatpush.bf16.msra.mxu2 %v3504_v4  ;;  %982 = vmatpush.bf16.msrb.mxu0 %v3512_v0  ;;  %v3487_v4 = vld [vmem:[%s5126_s22 + $0x80] sm:$0xf]  ;;  %v3448_v29 = vor.u32 %v4516_v26, %v3447_v25  ;;  %v4547_v0 = vld [vmem:[%s5126_s22 + $0x138] sm:$0xf0]  ;;  %v3495_v25 = vld [vmem:[%s5126_s22 + $0x88] sm:$0xf] }
  0xb1   : > { %v481_v34 = vsel %vm464_vm1, %v480_v33, 0.0  ;;  %v3461_v33 = vld [vmem:[%s5126_s22 + $0x64] sm:$0xf0]  ;;  %v3488_v7 = vor.u32 %v4526_v5, %v3487_v4  ;;  %v4527_v26 = vld [vmem:[%s5126_s22 + $0x98] sm:$0xf0] }
  0xb2   : > { %v482_v35 = vadd.f32 %v481_v34, %v479_v32  ;;  %v4518_v32 = vld [vmem:[%s5126_s22 + $0x54] sm:$0xf]  ;;  %v3547_v34 = vld [vmem:[%s5126_s22 + $0xf8] sm:$0xf] }
  0xb3   : > { %921 = vmatpush.bf16.msra.mxu1 %v3580_v15  ;;  %v3548_v39 = vor.u32 %v4541_v36, %v3547_v34  ;;  %971 = vmatpush.bf16.msrb.mxu3 %v3628_v43  ;;  %v3467_v15 = vld [vmem:[%s5126_s22 + $0x58] sm:$0xf]  ;;  %v3609_v34 = vld [vmem:[%s5126_s22 + $0x184] sm:$0xf0]  ;;  %v3589_v43 = vld [vmem:[%s5126_s22 + $0x15c] sm:$0xf0] }
  0xb4   : > { %483 = vadd.xlane.f32.xlu0 %v482_v35  ;;  %931 = vmatpush.bf16.msra.mxu2 %v3484_v16  ;;  %v3464_v35 = vor.u32 %v4518_v32, %v3461_v33  ;;  %v4521_v16 = vld [vmem:[%s5126_s22 + $0x68] sm:$0xf0]  ;;  %v3449_v32 = vld [vmem:[%s5126_s22 + $0x44] sm:$0xf0]  ;;  %v4554_v33 = vld [vmem:[%s5126_s22 + $0x174] sm:$0xf]  ;;  %v3592_v46 = vor.u32 %v4549_v42, %v3589_v43 }
  0xb5   : > { %983 = vmatpush.bf16.msrb.mxu0 %v3492_v12  ;;  %v3468_v18 = vor.u32 %v4521_v16, %v3467_v15  ;;  %v3612_v36 = vor.u32 %v4554_v33, %v3609_v34  ;;  %v3535_v12 = vld [vmem:[%s5126_s22 + $0xd8] sm:$0xf]  ;;  %v4557_v16 = vld [vmem:[%s5126_s22 + $0x188] sm:$0xf0] }
  0xb6   : > { %v3615_v15 = vld [vmem:[%s5126_s22 + $0x178] sm:$0xf] }
  0xb7   : > { %953 = vmatpush.bf16.msrb.mxu1 %v3568_v20  ;;  %972 = vmatpush.bf16.msrb.mxu3 %v3608_v55  ;;  %v4559_v20 = vld [vmem:[%s5126_s22 + $0x19c] sm:$0xf]  ;;  %v3616_v19 = vor.u32 %v4557_v16, %v3615_v15  ;;  %v3455_v34 = vld [vmem:[%s5126_s22 + $0x38] sm:$0xf] }
  0xb8   : > { %932 = vmatpush.bf16.msra.mxu2 %v3464_v35  ;;  %v3632_v24 = vor.u32 %v4559_v20, %v3629_v21  ;;  %v3452_v35 = vor.u32 %v4514_v28, %v3449_v32  ;;  %v4532_v20 = vld [vmem:[%s5126_s22 + $0xc0] sm:$0xf0]  ;;  %v3595_v21 = vld [vmem:[%s5126_s22 + $0x150] sm:$0xf]  ;;  %v3496_v28 = vor.u32 %v4527_v26, %v3495_v25  ;;  %v4522_v32 = vld [vmem:[%s5126_s22 + $0x70] sm:$0xf0] }
  0xb9   : > { %984 = vmatpush.bf16.msrb.mxu0 %v3472_v23  ;;  %v3684_v25 = vld [vmem:[%s5131_s21 + $0x60] sm:$0xf]  ;;  %v4581_v26 = vld [vmem:[%s5131_s21 + $0x64] sm:$0xf0] }
  0xbb   : > { %954 = vmatpush.bf16.msrb.mxu1 %v3548_v39  ;;  %973 = vmatpush.bf16.msrb.mxu3 %v3588_v3  ;;  %v4509_v39 = vld [vmem:[%s5126_s22 + $0xc] sm:$0xf] }
  0xbc   : > { %933 = vmatpush.bf16.msra.mxu2 %v3444_v47  ;;  %v3432_v45 = vor.u32 %v4509_v39, %v3429_v41  ;;  %v3436_v39 = vor.u32 %v4512_v38, %v3435_v37 }
  0xbd   : > { %985 = vmatpush.bf16.msrb.mxu0 %v3452_v35  ;;  %v4517_v35 = vld [vmem:[%s5126_s22 + $0x48] sm:$0xf0] }
  0xbf   : > { %955 = vmatpush.bf16.msrb.mxu1 %v3528_v51  ;;  %v5262_v51 = vld [vmem:[%s5121_s14 + $0x8] sm:$0xff] }
  0xc0   : > { %934 = vmatpush.bf16.msra.mxu2 %v3424_v59  ;;  %v500_v55 = vperm.slane %v5262_v51, 0  ;;  %v503_v59 = vperm.slane %v5259_v50, 1  ;;  %v504_v60 = vperm.slane %v5262_v51, 1 }
  0xc1   : > { %986 = vmatpush.bf16.msrb.mxu0 %v3432_v45  ;;  %v582_v45 = vperm.slane %v5262_v51, 6 }
  0xc3   : > { %956 = vmatpush.bf16.msrb.mxu1 %v3508_v63  ;;  %v3575_v63 = vld [vmem:[%s5126_s22 + $0x128] sm:$0xf] }
  0xc4   : > { %996 = vmatpush.bf16.msrb.mxu2 %v3652_v13  ;;  %v3636_v13 = vor.u32 %v4562_v10, %v3635_v9 }
  0xc7   : > { %957 = vmatpush.bf16.msrb.mxu1 %v3488_v7  ;;  %v3656_v7 = vor.u32 %v4567_v2, %v3655_v1 }
  0xc8   : > { %997 = vmatpush.bf16.msrb.mxu2 %v3632_v24 }
  0xcb   : > { %958 = vmatpush.bf16.msrb.mxu1 %v3468_v18  ;;  %v3515_v18 = vld [vmem:[%s5126_s22 + $0xb0] sm:$0xf] }
  0xcc   : > { %998 = vmatpush.bf16.msrb.mxu2 %v3612_v36  ;;  %v3516_v23 = vor.u32 %v4532_v20, %v3515_v18  ;;  %v3456_v36 = vor.u32 %v4517_v35, %v3455_v34  ;;  %v3692_v20 = vld [vmem:[%s5131_s21 + $0x70] sm:$0xf]  ;;  %v3668_v34 = vld [vmem:[%s5131_s21 + $0x40] sm:$0xf]  ;;  %v4577_v35 = vld [vmem:[%s5131_s21 + $0x44] sm:$0xf0] }
  0xcf   : > { %959 = vmatpush.bf16.msrb.mxu1 %v3448_v29  ;;  %v3475_v29 = vld [vmem:[%s5126_s22 + $0x60] sm:$0xf] }
  0xd0   : > { %999 = vmatpush.bf16.msrb.mxu2 %v3592_v46  ;;  %v3476_v33 = vor.u32 %v4522_v32, %v3475_v29  ;;  %v3676_v29 = vld [vmem:[%s5131_s21 + $0x50] sm:$0xf]  ;;  %v4579_v32 = vld [vmem:[%s5131_s21 + $0x54] sm:$0xf0] }
  0xd3   : > { %960 = vmatpush.bf16.msrb.mxu1 %v3428_v40  ;;  %v581_v40 = vperm.slane %v5259_v50, 6 }
 0x127   : > { %v484_v11 = vpop.xlane.xlu0 %483 }
 0x128   : > { %v485_v14 = vmul.f32 %v484_v11, %v5159_v27  ;;  %v3556_v11 = vor.u32 %v4542_v8, %v3555_v6 }
 0x12a   : > { %v486_v22 = vadd.f32 1e-06, %v485_v14  ;;  %v4537_v14 = vld [vmem:[%s5126_s22 + $0xe8] sm:$0xf0] }
 0x12b   : > { %v3536_v17 = vor.u32 %v4537_v14, %v3535_v12 }
 0x12c   : > { %4853 = vrsqrt.f32 %v486_v22  ;;  %vm493_vm4 = vweird.f32 %v486_v22 }
 0x132   : > { %v4854_v44 = vpop.eup %4853 }
 0x133   : > { %v488_v47 = vmul.f32 %v4854_v44, %v486_v22  ;;  %vm494_vm3 = vweird.f32 %v4854_v44  ;;  %v4552_v22 = vld [vmem:[%s5126_s22 + $0x160] sm:$0xf0] }
 0x134   : > { %vm495_vm5 = vmor %vm493_vm4, %vm494_vm3  ;;  %v3596_v24 = vor.u32 %v4552_v22, %v3595_v21  ;;  %v4583_v21 = vld [vmem:[%s5131_s21 + $0x74] sm:$0xf0] }
 0x135   : > { %v489_v48 = vmul.f32 %v4854_v44, %v488_v47  ;;  %v3693_v22 = vor.u32 %v4583_v21, %v3692_v20  ;;  %v4573_v20 = vld [vmem:[%s5131_s21 + $0x24] sm:$0xf0] }
 0x137   : > { %v490_v49 = vmul.f32 0.5, %v489_v48 }
 0x139   : > { %v491_v52 = vsub.f32 1.5, %v490_v49 }
 0x13b   : > { %v492_v53 = vmul.f32 %v4854_v44, %v491_v52 }
 0x13d   : > { %v496_v56 = vsel %vm495_vm5, %v4854_v44, %v492_v53 }
 0x13e   : > { %v497_v57 = vmul.f32 %v496_v56, %v5162_v30  ;;  %v498_v58 = vmul.f32 %v496_v56, %v5164_v31  ;;  %v3576_v31 = vor.u32 %v4547_v0, %v3575_v63 }
 0x140   : > { %v501_v61 = vmul.f32 %v499_v54, %v497_v57  ;;  %v502_v62 = vmul.f32 %v500_v55, %v498_v58  ;;  %v454_v58 = vld [vmem:[%s5121_s14 + $0x10] sm:$0xff] }
 0x142   : > { %v505_v3 = vadd.f32 %v503_v59, %v501_v61  ;;  %v506_v4 = vadd.f32 %v504_v60, %v502_v62  ;;  %v455_v59 = vld [vmem:[%s5121_s14 + $0x18] sm:$0xff]  ;;  %v583_v62 = vperm.slane %v454_v58, 6 }
 0x143   : > { %v584_v63 = vperm.slane %v455_v59, 6  ;;  %v3694_v58 = vld [vmem:[%s5131_s21 + $0x78] sm:$0xf0] }
 0x144   : > { %v507_v5 = vpack.c.bf16 %v505_v3, %v505_v3  ;;  %v508_v30 = vpack.c.bf16 %v506_v4, %v506_v4 }
 0x146   : > { %909 = vmatmul.bf16.vlgmr.msra.gmra.mxu0 %v507_v5  ;;  %3657 = vmatmul.msk.bf16.vlgmr.msra.gmra.mxu1 %vm464_vm1, %v508_v30 }
 0x147   : > { %935 = vmatmul.bf16.vlgmr.msra.gmra.mxu2 %v507_v5  ;;  %3658 = vmatmul.msk.bf16.vlgmr.msra.gmra.mxu3 %vm464_vm1, %v508_v30 }
 0x148   : > { %1005 = vmatpush.bf16.msra.mxu3 %v3576_v31  ;;  %1022 = vmatpush.bf16.msra.mxu1 %v3656_v7 }
 0x14c   : > { %1006 = vmatpush.bf16.msra.mxu3 %v3556_v11  ;;  %1023 = vmatpush.bf16.msra.mxu1 %v3636_v13  ;;  %v456_v13 = vld [vmem:[%s5121_s14 + $0x20] sm:$0xff] }
 0x14d   : > { %v585_v14 = vperm.slane %v456_v13, 6  ;;  %v3726_v13 = vld [vmem:[%s5131_s21 + $0x30] sm:$0xf] }
 0x150   : > { %1007 = vmatpush.bf16.msra.mxu3 %v3536_v17  ;;  %1024 = vmatpush.bf16.msra.mxu1 %v3616_v19 }
 0x154   : > { %1008 = vmatpush.bf16.msra.mxu3 %v3516_v23  ;;  %1025 = vmatpush.bf16.msra.mxu1 %v3596_v24 }
 0x156   : > { %961 = vmatmul.bf16.vlgmr.msrb.gmra.mxu1 %v507_v5  ;;  %987 = vmatmul.bf16.vlgmr.msrb.gmra.mxu0 %v507_v5 }
 0x157   : > { %3659 = vmatmul.msk.bf16.vlgmr.msrb.gmra.mxu3 %vm464_vm1, %v508_v30  ;;  %3660 = vmatmul.msk.bf16.vlgmr.msrb.gmra.mxu2 %vm464_vm1, %v508_v30 }
 0x158   : > { %1009 = vmatpush.bf16.msra.mxu3 %v3496_v28  ;;  %v3685_v28 = vor.u32 %v4581_v26, %v3684_v25  ;;  %v3710_v26 = vld [vmem:[%s5131_s21 + $0x10] sm:$0xf] }
 0x15c   : > { %1010 = vmatpush.bf16.msra.mxu3 %v3476_v33  ;;  %v3677_v33 = vor.u32 %v4579_v32, %v3676_v29  ;;  %v4570_v29 = vld [vmem:[%s5131_s21 + $0x14] sm:$0xf]  ;;  %v3712_v32 = vld [vmem:[%s5131_s21 + $0x18] sm:$0xf0] }
 0x160   : > { %1011 = vmatpush.bf16.msra.mxu3 %v3456_v36  ;;  %v3669_v36 = vor.u32 %v4577_v35, %v3668_v34  ;;  %v3715_v34 = vor.u32 %v4570_v29, %v3712_v32 }
 0x164   : > { %1012 = vmatpush.bf16.msra.mxu3 %v3436_v39 }
 0x166   : > { %3661 = vmatmul.msk.bf16.vlgmr.msra.gmra.mxu1 %vm464_vm1, %v508_v30 }
 0x167   : > { %1013 = vmatmul.bf16.vlgmr.msra.gmra.mxu3 %v507_v5 }
 0x168   : > { %1219 = vmatpush.bf16.msrb.mxu3 %v3693_v22  ;;  %v4572_v22 = vld [vmem:[%s5131_s21 + $0x24] sm:$0xf] }
 0x16c   : > { %1220 = vmatpush.bf16.msrb.mxu3 %v3685_v28  ;;  %v4571_v28 = vld [vmem:[%s5131_s21 + $0x14] sm:$0xf0] }
 0x170   : > { %1221 = vmatpush.bf16.msrb.mxu3 %v3677_v33  ;;  %v3711_v33 = vor.u32 %v4571_v28, %v3710_v26  ;;  %v3746_v26 = vld [vmem:[%s5131_s21 + $0x90] sm:$0xf]  ;;  %v4587_v28 = vld [vmem:[%s5131_s21 + $0x94] sm:$0xf0] }
 0x171   : > { %v3747_v32 = vor.u32 %v4587_v28, %v3746_v26  ;;  %v3870_v26 = vld [vmem:[%s5136_s0 + $0xd8] sm:$0xf0] }
 0x174   : > { %1222 = vmatpush.bf16.msrb.mxu3 %v3669_v36 }
 0x1c3   : > { %v910_v41 = vpop.f32.mrf.mxu0  ;;  %v923_v42 = vpop.f32.mrf.mxu1 }
 0x1c4   : > { %v911_v43 = vadd.f32 %v910_v41, %v581_v40 }
 0x1c6   : > { %v924_v44 = vadd.f32 %v923_v42, %v911_v43  ;;  %v460_v42 = vlaneseq }
 0x1c8   : > { %v1055_v46 = vpack.c.bf16 %v924_v44, %v924_v44  ;;  %v461_v43 = vand.u32 127, %v460_v42  ;;  %v4990_v44 = vmov -1e+30  }
 0x1ca   : > { %v936_v47 = vpop.f32.mrf.mxu2  ;;  %v949_v48 = vpop.f32.mrf.mxu3  ;;  %1116 = vrot.lane.b32.xlu1 %v1055_v46, %s4989_s30  ;;  %vm462_vm7 = vcmp.lt.s32.totalorder %v461_v43, 5 }
 0x1cb   : > { %v937_v49 = vadd.f32 %v936_v47, %v582_v45  ;;  %v912_v52 = vpop.f32.mrf.mxu0  ;;  %v925_v53 = vpop.f32.mrf.mxu1  ;;  %v5328_v45 = vsel %vm462_vm7, 0.0, %v4990_v44 }
 0x1cd   : > { %v950_v54 = vadd.f32 %v949_v48, %v937_v49 }
 0x1cf   : > { %v5302_v55 = vpack.c.bf16 %v950_v54, %v950_v54 }
 0x1d1   : > { %1059 = vrot.lane.b32.xlu2 %v5302_v55, %s4989_s30 }
 0x1d2   : > { %v938_v56 = vpop.f32.mrf.mxu2  ;;  %v951_v57 = vpop.f32.mrf.mxu3 }
 0x1d3   : > { %v962_v60 = vpop.f32.mrf.mxu1  ;;  %v988_v61 = vpop.f32.mrf.mxu0  ;;  %v4582_v57 = vld [vmem:[%s5131_s21 + $0x74] sm:$0xf] }
 0x1d4   : > { %v963_v0 = vadd.f32 %v962_v60, %v583_v62  ;;  %v989_v1 = vadd.f32 %v988_v61, %v584_v63  ;;  %v3697_v59 = vor.u32 %v4582_v57, %v3694_v58 }
 0x1da   : > { %v975_v2 = vpop.f32.mrf.mxu3  ;;  %v1001_v3 = vpop.f32.mrf.mxu2 }
 0x1db   : > { %v976_v4 = vadd.f32 %v975_v2, %v963_v0  ;;  %v1002_v5 = vadd.f32 %v1001_v3, %v989_v1  ;;  %v964_v30 = vpop.f32.mrf.mxu1  ;;  %v990_v31 = vpop.f32.mrf.mxu0 }
 0x1dc   : > { %v4580_v30 = vld [vmem:[%s5131_s21 + $0x64] sm:$0xf]  ;;  %v3686_v31 = vld [vmem:[%s5131_s21 + $0x68] sm:$0xf0] }
 0x1dd   : > { %v1114_v6 = vpack.c.bf16 %v976_v4, %v976_v4  ;;  %v1057_v7 = vpack.c.bf16 %v1002_v5, %v1002_v5 }
 0x1df   : > { %v1122_v8 = vsel %vm464_vm1, %v1114_v6, 0  ;;  %v1098_v9 = vsel %vm1096_vm6, %v1057_v7, 0  ;;  %1150 = vrot.lane.b32.xlu0 %v1057_v7, %s4989_s30  ;;  %v4578_v7 = vld [vmem:[%s5131_s21 + $0x54] sm:$0xf] }
 0x1e0   : > { %1107 = vmatpush.bf16.msra.mxu0 %v1098_v9  ;;  %1131 = vmatpush.bf16.xpose.msrb.mxu1 %v1122_v8  ;;  %v3678_v8 = vld [vmem:[%s5131_s21 + $0x58] sm:$0xf0] }
 0x1e1   : > { %v3681_v9 = vor.u32 %v4578_v7, %v3678_v8 }
 0x1e2   : > { %v977_v10 = vpop.f32.mrf.mxu3  ;;  %v1003_v11 = vpop.f32.mrf.mxu2 }
 0x1e3   : > { %v1027_v12 = vpop.f32.mrf.mxu1  ;;  %v4576_v10 = vld [vmem:[%s5131_s21 + $0x44] sm:$0xf]  ;;  %v3670_v11 = vld [vmem:[%s5131_s21 + $0x48] sm:$0xf0] }
 0x1e4   : > { %1232 = vmatpush.bf16.msrb.mxu0 %v3697_v59 }
 0x1e7   : > { %1312 = vrot.lane.b32.xlu0 %v1114_v6, %s4989_s30  ;;  %v3689_v6 = vor.u32 %v4580_v30, %v3686_v31 }
 0x1e9   : > { %1233 = vmatpush.bf16.msrb.mxu0 %v3689_v6 }
 0x1ea   : > { %v1014_v15 = vpop.f32.mrf.mxu3 }
 0x1eb   : > { %v1015_v16 = vadd.f32 %v1014_v15, %v585_v14  ;;  %v1029_v17 = vpop.f32.mrf.mxu1  ;;  %v4575_v14 = vld [vmem:[%s5131_s21 + $0x34] sm:$0xf0]  ;;  %v4574_v15 = vld [vmem:[%s5131_s21 + $0x34] sm:$0xf] }
 0x1ec   : > { %v3728_v17 = vld [vmem:[%s5131_s21 + $0x38] sm:$0xf0] }
 0x1ed   : > { %v5313_v18 = vadd.f32 %v1027_v12, %v1015_v16  ;;  %1234 = vmatpush.bf16.msrb.mxu0 %v3681_v9  ;;  %v3673_v12 = vor.u32 %v4576_v10, %v3670_v11  ;;  %v3727_v16 = vor.u32 %v4575_v14, %v3726_v13  ;;  %v3731_v21 = vor.u32 %v4574_v15, %v3728_v17  ;;  %v3762_v13 = vld [vmem:[%s5131_s21 + $0xb0] sm:$0xf]  ;;  %v4591_v15 = vld [vmem:[%s5131_s21 + $0xb4] sm:$0xf0]  ;;  %v3756_v17 = vld [vmem:[%s5131_s21 + $0xa8] sm:$0xf0] }
 0x1ef   : > { %1288 = vmatpush.bf16.msra.mxu1 %v3727_v16  ;;  %v4588_v16 = vld [vmem:[%s5131_s21 + $0xa4] sm:$0xf] }
 0x1f1   : > { %1235 = vmatpush.bf16.msrb.mxu0 %v3673_v12  ;;  %v4590_v12 = vld [vmem:[%s5131_s21 + $0xb4] sm:$0xf] }
 0x1f2   : > { %v1016_v19 = vpop.f32.mrf.mxu3 }
 0x1f3   : > { %v3718_v19 = vld [vmem:[%s5131_s21 + $0x20] sm:$0xf] }
 0x22b   : > { %v1060_v23 = vpop.permute.xlu2 %1059 }
 0x22c   : > { %v1065_v24 = vsel %vm464_vm1, %v1060_v23, 0  ;;  %v3720_v23 = vld [vmem:[%s5131_s21 + $0x28] sm:$0xf0] }
 0x22d   : > { %1074 = vmatpush.bf16.xpose.msra.mxu2 %v1065_v24  ;;  %v3719_v24 = vor.u32 %v4573_v20, %v3718_v19  ;;  %v3723_v25 = vor.u32 %v4572_v22, %v3720_v23  ;;  %v3763_v19 = vor.u32 %v4591_v15, %v3762_v13  ;;  %v3754_v20 = vld [vmem:[%s5131_s21 + $0xa0] sm:$0xf]  ;;  %v3759_v22 = vor.u32 %v4588_v16, %v3756_v17 }
 0x22e   : > { %v3868_v13 = vld [vmem:[%s5136_s0 + $0xc0] sm:$0xf] }
 0x22f   : > { %1289 = vmatpush.bf16.msra.mxu1 %v3719_v24  ;;  %v4586_v24 = vld [vmem:[%s5131_s21 + $0x94] sm:$0xf] }
 0x233   : > { %1290 = vmatpush.bf16.msra.mxu1 %v3711_v33  ;;  %v4584_v33 = vld [vmem:[%s5131_s21 + $0x84] sm:$0xf] }
 0x234   : > { %3662 = vmatmul.msk.bf16.vlgmr.msra.gmra.mxu2 %vm464_vm1, %v1055_v46 }
 0x23c   : > { %v1117_v37 = vpop.permute.xlu1 %1116 }
 0x23d   : > { %3664 = vmatmul.msk.bf16.vlgmr.msrb.gmra.mxu1 %vm464_vm1, %v1117_v37 }
 0x251   : > { %v1151_v38 = vpop.permute.xlu0 %1150 }
 0x252   : > { %v1156_v39 = vsel %vm1096_vm6, %v1151_v38, 0  ;;  %v1310_v38 = vpack.c.bf16 %v5313_v18, %v5313_v18 }
 0x253   : > { %1165 = vmatpush.bf16.msrb.mxu2 %v1156_v39 }
 0x254   : > { %v1349_v43 = vsel %vm1096_vm6, %v1310_v38, 0 }
 0x257   : > { %1301 = vmatpush.bf16.msra.mxu2 %v3731_v21  ;;  %v4589_v21 = vld [vmem:[%s5131_s21 + $0xa4] sm:$0xf0] }
 0x258   : > { %v3755_v23 = vor.u32 %v4589_v21, %v3754_v20 }
 0x259   : > { %v1313_v40 = vpop.permute.xlu0 %1312 }
 0x25a   : > { %v1318_v41 = vsel %vm464_vm1, %v1313_v40, 0 }
 0x25b   : > { %1327 = vmatpush.bf16.xpose.msra.mxu3 %v1318_v41  ;;  %1302 = vmatpush.bf16.msra.mxu2 %v3723_v25  ;;  %v3748_v25 = vld [vmem:[%s5131_s21 + $0x98] sm:$0xf0] }
 0x25c   : > { %v3751_v29 = vor.u32 %v4586_v24, %v3748_v25  ;;  %v4616_v25 = vld [vmem:[%s5136_s0 + $0xc4] sm:$0xf] }
 0x25d   : > { %v3873_v28 = vor.u32 %v4616_v25, %v3870_v26  ;;  %v4659_v26 = vld [vmem:[%s5136_s0 + $0x21c] sm:$0xf] }
 0x25f   : > { %1303 = vmatpush.bf16.msra.mxu2 %v3715_v34  ;;  %v3740_v34 = vld [vmem:[%s5131_s21 + $0x88] sm:$0xf0] }
 0x2b7   : > { %v1076_v46 = vpop.f32.mrf.mxu2 }
 0x2b8   : > { %v1077_v47 = vadd.f32 %v1076_v46, %v5328_v45  ;;  %v3702_v46 = vld [vmem:[%s5131_s21] sm:$0xf] }
 0x2ba   : > { %v1133_v48 = vpop.f32.mrf.mxu1  ;;  %v1081_v49 = vsel %vm1080_vm8, %v1077_v47, -inf }
 0x2bb   : > { %v1134_v52 = vadd.f32 %v1133_v48, %v5328_v45  ;;  %1082 = vmax.xlane.f32.xlu0 %v1081_v49  ;;  %v4568_v48 = vld [vmem:[%s5131_s21 + $0x4] sm:$0xf] }
 0x2bd   : > { %v1137_v53 = vsel %vm1080_vm8, %v1134_v52, -inf }
 0x2be   : > { %1138 = vmax.xlane.f32.xlu1 %v1137_v53 }
 0x2bf   : > { %v1078_v54 = vpop.f32.mrf.mxu2 }
 0x2c2   : > { %v1135_v56 = vpop.f32.mrf.mxu1 }
 0x32e   : > { %v1083_v60 = vpop.xlane.xlu0 %1082 }
 0x32f   : > { %v1084_v61 = vsub.f32 %v1077_v47, %v1083_v60  ;;  %v4569_v47 = vld [vmem:[%s5131_s21 + $0x4] sm:$0xf0] }
 0x330   : > { %v3703_v49 = vor.u32 %v4569_v47, %v3702_v46 }
 0x331   : > { %v1085_v62 = vmul.f32 1.442695, %v1084_v61  ;;  %v1139_v63 = vpop.xlane.xlu1 %1138 }
 0x332   : > { %v1140_v0 = vsub.f32 %v1134_v52, %v1139_v63  ;;  %v3704_v52 = vld [vmem:[%s5131_s21 + $0x8] sm:$0xf0]  ;;  %1291 = vmatpush.bf16.msra.mxu1 %v3703_v49 }
 0x333   : > { %4855 = vpow2.f32 %v1085_v62  ;;  %v3707_v53 = vor.u32 %v4568_v48, %v3704_v52 }
 0x334   : > { %v1141_v1 = vmul.f32 1.442695, %v1140_v0 }
 0x335   : > { %1304 = vmatpush.bf16.msra.mxu2 %v3707_v53  ;;  %v1439_v53 = vperm.slane %v5262_v51, 4 }
 0x336   : > { %4857 = vpow2.f32 %v1141_v1  ;;  %1412 = vmatpush.bf16.msrb.mxu1 %v3763_v19 }
 0x339   : > { %v4856_v2 = vpop.eup %4855 }
 0x33a   : > { %v1087_v3 = vsel %vm1080_vm8, %v4856_v2, 0.0  ;;  %1413 = vmatpush.bf16.msrb.mxu1 %v3755_v23 }
 0x33b   : > { %1088 = vadd.xlane.f32.xlu1 %v1087_v3 }
 0x33c   : > { %v4858_v4 = vpop.eup %4857 }
 0x33d   : > { %v1143_v5 = vsel %vm1080_vm8, %v4858_v4, 0.0 }
 0x33e   : > { %1144 = vadd.xlane.f32.xlu2 %v1143_v5  ;;  %1414 = vmatpush.bf16.msrb.mxu1 %v3747_v32  ;;  %v4613_v32 = vld [vmem:[%s5136_s0 + $0xa4] sm:$0xf0] }
 0x3ae   : > { %v1089_v35 = vpop.xlane.xlu1 %1088 }
 0x3af   : > { %4859 = vrcp.f32 %v1089_v35  ;;  %v3743_v35 = vor.u32 %v4584_v33, %v3740_v34  ;;  %v4036_v33 = vld [vmem:[%s5136_s0 + $0x210] sm:$0xf] }
 0x3b1   : > { %v1145_v36 = vpop.xlane.xlu2 %1144 }
 0x3b2   : > { %4861 = vrcp.f32 %v1145_v36 }
 0x3b5   : > { %v4860_v37 = vpop.eup %4859 }
 0x3b6   : > { %v1091_v39 = vmul.f32 %v4860_v37, %v4856_v2 }
 0x3b8   : > { %v4862_v40 = vpop.eup %4861  ;;  %v1092_v41 = vpack.c.bf16 %v1091_v39, %v1091_v39 }
 0x3b9   : > { %v1147_v42 = vmul.f32 %v4862_v40, %v4858_v4  ;;  %v3738_v40 = vld [vmem:[%s5131_s21 + $0x80] sm:$0xf] }
 0x3ba   : > { %3663 = vmatmul.msk.bf16.vlgmr.msra.gmra.mxu0 %vm1080_vm8, %v1092_v41  ;;  %v4585_v41 = vld [vmem:[%s5131_s21 + $0x84] sm:$0xf0] }
 0x3bb   : > { %v1148_v44 = vpack.c.bf16 %v1147_v42, %v1147_v42  ;;  %1358 = vmatpush.bf16.msra.mxu0 %v1349_v43  ;;  %v3739_v42 = vor.u32 %v4585_v41, %v3738_v40  ;;  %v4038_v41 = vld [vmem:[%s5136_s0 + $0x228] sm:$0xf0] }
 0x3bd   : > { %3665 = vmatmul.msk.bf16.vlgmr.msrb.gmra.mxu2 %vm1080_vm8, %v1148_v44  ;;  %1415 = vmatpush.bf16.msrb.mxu1 %v3739_v42  ;;  %v3820_v42 = vld [vmem:[%s5136_s0 + $0x60] sm:$0xf] }
 0x437   : > { %v1109_v18 = vpop.f32.mrf.mxu0 }
 0x438   : > { %v1113_v54 = vpack.c.bf16 %v1109_v18, %v1109_v18  ;;  %v4881_v18 = vld [vmem:[#allocation2] sm:$0xff] }
 0x43a   : > { %3732 = vmatmul.msk.bf16.vlgmr.msra.gmra.mxu1 %vm464_vm1, %v1113_v54  ;;  %3733 = vmatmul.msk.bf16.vlgmr.msra.gmra.mxu2 %vm464_vm1, %v1113_v54 }
 0x43f   : > { %v1111_v56 = vpop.f32.mrf.mxu0 }
 0x440   : > { %v1167_v57 = vpop.f32.mrf.mxu2  ;;  %v1438_v56 = vperm.slane %v5259_v50, 4  ;;  %v3940_v50 = vld [vmem:[%s5136_s0 + $0x150] sm:$0xf] }
 0x441   : > { %v1171_v58 = vpack.c.bf16 %v1167_v57, %v1167_v57 }
 0x443   : > { %3698 = vmatmul.msk.bf16.vlgmr.msrb.gmra.mxu3 %vm464_vm1, %v1171_v58  ;;  %3699 = vmatmul.msk.bf16.vlgmr.msrb.gmra.mxu0 %vm464_vm1, %v1171_v58  ;;  %v4882_v58 = vld [vmem:[#allocation2 + $0x8] sm:$0xff] }
 0x448   : > { %v1169_v59 = vpop.f32.mrf.mxu2 }
 0x453   : > { %3734 = vmatmul.msk.bf16.vlgmr.msra.gmra.mxu3 %vm464_vm1, %v5302_v55 }
 0x4b7   : > { %v1293_v60 = vpop.f32.mrf.mxu1 }
 0x4bd   : > { %v1306_v61 = vpop.f32.mrf.mxu2 }
 0x4bf   : > { %v1295_v62 = vpop.f32.mrf.mxu1 }
 0x4c0   : > { %v1237_v63 = vpop.f32.mrf.mxu0 }
 0x4c1   : > { %v5371_v0 = vadd.f32 %v1306_v61, %v1237_v63 }
 0x4c5   : > { %v1308_v1 = vpop.f32.mrf.mxu2 }
 0x4c6   : > { %v1224_v2 = vpop.f32.mrf.mxu3  ;;  %v4634_v1 = vld [vmem:[%s5136_s0 + $0x154] sm:$0xf] }
 0x4c7   : > { %v1294_v3 = vadd.f32 %v1293_v60, %v1224_v2 }
 0x4c8   : > { %v1239_v4 = vpop.f32.mrf.mxu0 }
 0x4c9   : > { %v3916_v4 = vld [vmem:[%s5136_s0 + $0x120] sm:$0xf] }
 0x4ce   : > { %v1226_v5 = vpop.f32.mrf.mxu3 }
 0x4cf   : > { %v4631_v5 = vld [vmem:[%s5136_s0 + $0x134] sm:$0xf0] }
 0x4d6   : > { %v1329_v30 = vpop.f32.mrf.mxu3 }
 0x4d7   : > { %v1330_v31 = vadd.f32 %v1329_v30, %v5328_v45  ;;  %v3764_v45 = vld [vmem:[%s5131_s21 + $0xb8] sm:$0xf0] }
 0x4d8   : > { %v3767_v14 = vor.u32 %v4590_v12, %v3764_v45 }
 0x4d9   : > { %v1333_v55 = vsel %vm1080_vm8, %v1330_v31, -inf }
 0x4da   : > { %1334 = vmax.xlane.f32.xlu2 %v1333_v55  ;;  %1425 = vmatpush.bf16.msrb.mxu2 %v3767_v14  ;;  %v3918_v55 = vld [vmem:[%s5136_s0 + $0x138] sm:$0xf0]  ;;  %v4619_v14 = vld [vmem:[%s5136_s0 + $0xd4] sm:$0xf0] }
 0x4db   : > { %v3869_v15 = vor.u32 %v4619_v14, %v3868_v13  ;;  %v4592_v14 = vld [vmem:[%s5136_s0 + $0x4] sm:$0xf] }
 0x4de   : > { %v1331_v6 = vpop.f32.mrf.mxu3  ;;  %1426 = vmatpush.bf16.msrb.mxu2 %v3759_v22 }
 0x4df   : > { %v3917_v6 = vor.u32 %v4631_v5, %v3916_v4  ;;  %v3990_v4 = vld [vmem:[%s5136_s0 + $0x1c8] sm:$0xf0]  ;;  %v3772_v5 = vld [vmem:[%s5136_s0] sm:$0xf] }
 0x4e2   : > { %1427 = vmatpush.bf16.msrb.mxu2 %v3751_v29  ;;  %v3844_v29 = vld [vmem:[%s5136_s0 + $0x90] sm:$0xf] }
 0x4e3   : > { %v3845_v34 = vor.u32 %v4613_v32, %v3844_v29  ;;  %v3924_v29 = vld [vmem:[%s5136_s0 + $0x128] sm:$0xf] }
 0x4e6   : > { %1428 = vmatpush.bf16.msrb.mxu2 %v3743_v35  ;;  %v4661_v35 = vld [vmem:[%s5136_s0 + $0x224] sm:$0xf0] }
 0x54d   : > { %v1335_v7 = vpop.xlane.xlu2 %1334 }
 0x54e   : > { %v1336_v8 = vsub.f32 %v1330_v31, %v1335_v7  ;;  %v4628_v31 = vld [vmem:[%s5136_s0 + $0x124] sm:$0xf] }
 0x54f   : > { %v3921_v7 = vor.u32 %v4628_v31, %v3918_v55 }
 0x550   : > { %v1337_v9 = vmul.f32 1.442695, %v1336_v8  ;;  %v3892_v8 = vld [vmem:[%s5136_s0 + $0xf0] sm:$0xf] }
 0x552   : > { %4863 = vpow2.f32 %v1337_v9  ;;  %v4625_v9 = vld [vmem:[%s5136_s0 + $0x104] sm:$0xf0] }
 0x553   : > { %v3893_v12 = vor.u32 %v4625_v9, %v3892_v8  ;;  %v3948_v8 = vld [vmem:[%s5136_s0 + $0x158] sm:$0xf] }
 0x558   : > { %v4864_v10 = vpop.eup %4863 }
 0x559   : > { %v1339_v11 = vsel %vm1080_vm8, %v4864_v10, 0.0 }
 0x55a   : > { %1340 = vadd.xlane.f32.xlu2 %v1339_v11  ;;  %v3894_v11 = vld [vmem:[%s5136_s0 + $0x108] sm:$0xf0] }
 0x5cd   : > { %v1341_v36 = vpop.xlane.xlu2 %1340 }
 0x5ce   : > { %4865 = vrcp.f32 %v1341_v36  ;;  %v4037_v36 = vor.u32 %v4661_v35, %v4036_v33  ;;  %v4632_v33 = vld [vmem:[%s5136_s0 + $0x13c] sm:$0xf0]  ;;  %v3926_v35 = vld [vmem:[%s5136_s0 + $0x140] sm:$0xf0] }
 0x5d0   : > { %1937 = vmatpush.bf16.msrb.mxu0 %v4037_v36  ;;  %v3925_v36 = vor.u32 %v4632_v33, %v3924_v29  ;;  %v4596_v29 = vld [vmem:[%s5136_s0 + $0x1c] sm:$0xf0]  ;;  %v3782_v33 = vld [vmem:[%s5136_s0 + $0x20] sm:$0xf0] }
 0x5d4   : > { %v4866_v37 = vpop.eup %4865 }
 0x5d5   : > { %v1343_v38 = vmul.f32 %v4866_v37, %v4864_v10  ;;  %v4622_v10 = vld [vmem:[%s5136_s0 + $0xf4] sm:$0xf] }
 0x5d6   : > { %v3897_v45 = vor.u32 %v4622_v10, %v3894_v11  ;;  %v4610_v37 = vld [vmem:[%s5136_s0 + $0x94] sm:$0xf]  ;;  %v4638_v10 = vld [vmem:[%s5136_s0 + $0x16c] sm:$0xf0]  ;;  %v4635_v11 = vld [vmem:[%s5136_s0 + $0x15c] sm:$0xf] }
 0x5d7   : > { %v1344_v39 = vpack.c.bf16 %v1343_v38, %v1343_v38  ;;  %v3846_v38 = vld [vmem:[%s5136_s0 + $0xa8] sm:$0xf0] }
 0x5d8   : > { %v3849_v40 = vor.u32 %v4610_v37, %v3846_v38  ;;  %v4020_v38 = vld [vmem:[%s5136_s0 + $0x1e8] sm:$0xf] }
 0x5d9   : > { %3735 = vmatmul.msk.bf16.vlgmr.msra.gmra.mxu0 %vm1080_vm8, %v1344_v39  ;;  %v4658_v39 = vld [vmem:[%s5136_s0 + $0x214] sm:$0xf] }
 0x656   : > { %v1360_v43 = vpop.f32.mrf.mxu0 }
 0x657   : > { %v1364_v44 = vpack.c.bf16 %v1360_v43, %v1360_v43  ;;  %v4607_v43 = vld [vmem:[%s5136_s0 + $0x74] sm:$0xf0] }
 0x659   : > { %3768 = vmatmul.msk.bf16.vlgmr.msrb.gmra.mxu1 %vm464_vm1, %v1364_v44  ;;  %3769 = vmatmul.msk.bf16.vlgmr.msrb.gmra.mxu2 %vm464_vm1, %v1364_v44  ;;  %v4041_v44 = vor.u32 %v4658_v39, %v4038_v41  ;;  %v4656_v39 = vld [vmem:[%s5136_s0 + $0x1fc] sm:$0xf0] }
 0x65a   : > { %v4021_v41 = vor.u32 %v4656_v39, %v4020_v38 }
 0x65b   : > { %1963 = vmatpush.bf16.msra.mxu2 %v4041_v44  ;;  %v4626_v44 = vld [vmem:[%s5136_s0 + $0x10c] sm:$0xf0] }
 0x65e   : > { %v1362_v46 = vpop.f32.mrf.mxu0 }
 0x65f   : > { %v3821_v46 = vor.u32 %v4607_v43, %v3820_v42  ;;  %v4022_v42 = vld [vmem:[%s5136_s0 + $0x200] sm:$0xf0]  ;;  %v3900_v43 = vld [vmem:[%s5136_s0 + $0xf8] sm:$0xf] }
 0x6d6   : > { %v1417_v47 = vpop.f32.mrf.mxu1 }
 0x6d7   : > { %v1434_v48 = vadd.f32 %v1417_v47, %v1294_v3  ;;  %v3942_v3 = vld [vmem:[%s5136_s0 + $0x168] sm:$0xf0]  ;;  %v4012_v47 = vld [vmem:[%s5136_s0 + $0x1e0] sm:$0xf] }
 0x6d8   : > { %v3945_v30 = vor.u32 %v4634_v1, %v3942_v3  ;;  %v3798_v1 = vld [vmem:[%s5136_s0 + $0x48] sm:$0xf0] }
 0x6d9   : > { %v1436_v54 = vadd.f32 %v4881_v18, %v1434_v48  ;;  %v4655_v48 = vld [vmem:[%s5136_s0 + $0x1f4] sm:$0xf0]  ;;  %v4652_v18 = vld [vmem:[%s5136_s0 + $0x1e4] sm:$0xf] }
 0x6da   : > { %1946 = vmatpush.bf16.msra.mxu1 %v3945_v30  ;;  %v4595_v30 = vld [vmem:[%s5136_s0 + $0x14] sm:$0xf0] }
 0x6db   : > { %v5400_v61 = vadd.f32 %v1438_v56, %v1436_v54  ;;  %v4014_v56 = vld [vmem:[%s5136_s0 + $0x1f8] sm:$0xf0]  ;;  %v3773_v55 = vor.u32 %v4595_v30, %v3772_v5  ;;  %v3974_v5 = vld [vmem:[%s5136_s0 + $0x1a0] sm:$0xf0]  ;;  %v3852_v30 = vld [vmem:[%s5136_s0 + $0x98] sm:$0xf] }
 0x6dc   : > { %v1430_v49 = vpop.f32.mrf.mxu2 }
 0x6dd   : > { %v1435_v52 = vadd.f32 %v1430_v49, %v5371_v0  ;;  %v4637_v0 = vld [vmem:[%s5136_s0 + $0x164] sm:$0xf0]  ;;  %v4013_v49 = vor.u32 %v4655_v48, %v4012_v47  ;;  %v3901_v47 = vor.u32 %v4626_v44, %v3900_v43  ;;  %v4623_v48 = vld [vmem:[%s5136_s0 + $0xfc] sm:$0xf] }
 0x6de   : > { %v1419_v57 = vpop.f32.mrf.mxu1  ;;  %v3941_v2 = vor.u32 %v4637_v0, %v3940_v50  ;;  %1947 = vmatpush.bf16.msra.mxu1 %v3921_v7  ;;  %v4598_v0 = vld [vmem:[%s5136_s0 + $0x34] sm:$0xf]  ;;  %v4643_v7 = vld [vmem:[%s5136_s0 + $0x194] sm:$0xf0]  ;;  %v5519_v44 = vld [vmem:[%s5121_s14 + $0x8] sm:$0xff] }
 0x6df   : > { %v1437_v59 = vadd.f32 %v4882_v58, %v1435_v52  ;;  %v4604_v52 = vld [vmem:[%s5136_s0 + $0x64] sm:$0xf]  ;;  %1938 = vmatpush.bf16.msrb.mxu0 %v4013_v49  ;;  %v3796_v57 = vld [vmem:[%s5136_s0 + $0x30] sm:$0xf]  ;;  %v4601_v58 = vld [vmem:[%s5136_s0 + $0x44] sm:$0xf0]  ;;  %v3801_v3 = vor.u32 %v4598_v0, %v3798_v1 }
 0x6e0   : > { %1920 = vmatpush.bf16.msrb.mxu3 %v3941_v2  ;;  %v4646_v2 = vld [vmem:[%s5136_s0 + $0x1b4] sm:$0xf]  ;;  %v3972_v1 = vld [vmem:[%s5136_s0 + $0x188] sm:$0xf] }
 0x6e1   : > { %v5398_v60 = vadd.f32 %v1439_v53, %v1437_v59  ;;  %v3822_v53 = vld [vmem:[%s5136_s0 + $0x78] sm:$0xf0]  ;;  %v4017_v59 = vor.u32 %v4652_v18, %v4014_v56  ;;  %v3993_v31 = vor.u32 %v4646_v2, %v3990_v4  ;;  %v3902_v49 = vld [vmem:[%s5136_s0 + $0x110] sm:$0xf0]  ;;  %v4650_v18 = vld [vmem:[%s5136_s0 + $0x1cc] sm:$0xf0] }
 0x6e2   : > { %1948 = vmatpush.bf16.msra.mxu1 %v3897_v45  ;;  %v3825_v54 = vor.u32 %v4604_v52, %v3822_v53  ;;  %v3949_v45 = vor.u32 %v4638_v10, %v3948_v8  ;;  %v3905_v52 = vor.u32 %v4623_v48, %v3902_v49  ;;  %v3996_v53 = vld [vmem:[%s5136_s0 + $0x1b8] sm:$0xf]  ;;  %v4644_v2 = vld [vmem:[%s5136_s0 + $0x19c] sm:$0xf0]  ;;  %v4611_v8 = vld [vmem:[%s5136_s0 + $0x9c] sm:$0xf] }
 0x6e3   : > { %v1442_v62 = vsel %vm464_vm1, %v5398_v60, 0.0  ;;  %1964 = vmatpush.bf16.msra.mxu2 %v4017_v59  ;;  %v3997_v56 = vor.u32 %v4650_v18, %v3996_v53  ;;  %v4620_v59 = vld [vmem:[%s5136_s0 + $0xdc] sm:$0xf0]  ;;  %v3973_v4 = vor.u32 %v4644_v2, %v3972_v1  ;;  %v1474_v49 = vperm.slane %v5519_v44, 3 }
 0x6e4   : > { %v1432_v51 = vpop.f32.mrf.mxu2  ;;  %v1443_v63 = vadd.f32 %v1442_v62, %v5400_v61  ;;  %1921 = vmatpush.bf16.msrb.mxu3 %v3917_v6  ;;  %v3797_v62 = vor.u32 %v4601_v58, %v3796_v57  ;;  %v3964_v6 = vld [vmem:[%s5136_s0 + $0x180] sm:$0xf]  ;;  %v3998_v57 = vld [vmem:[%s5136_s0 + $0x1d0] sm:$0xf0]  ;;  %v3876_v58 = vld [vmem:[%s5136_s0 + $0xc8] sm:$0xf] }
 0x6e5   : > { %v3988_v51 = vld [vmem:[%s5136_s0 + $0x1b0] sm:$0xf]  ;;  %v3965_v9 = vor.u32 %v4643_v7, %v3964_v6 }
 0x6e6   : > { %1444 = vadd.xlane.f32.xlu1 %v1443_v63  ;;  %1949 = vmatpush.bf16.msra.mxu1 %v3873_v28  ;;  %v4649_v63 = vld [vmem:[%s5136_s0 + $0x1c4] sm:$0xf0]  ;;  %v4046_v28 = vld [vmem:[%s5136_s0 + $0x230] sm:$0xf0] }
 0x6e7   : > { %v3989_v50 = vor.u32 %v4649_v63, %v3988_v51  ;;  %1965 = vmatpush.bf16.msra.mxu2 %v3993_v31  ;;  %v4049_v32 = vor.u32 %v4659_v26, %v4046_v28  ;;  %v3877_v51 = vor.u32 %v4620_v59, %v3876_v58  ;;  %v4617_v63 = vld [vmem:[%s5136_s0 + $0xcc] sm:$0xf]  ;;  %v4614_v31 = vld [vmem:[%s5136_s0 + $0xac] sm:$0xf0]  ;;  %v3780_v28 = vld [vmem:[%s5136_s0 + $0x8] sm:$0xf] }
 0x6e8   : > { %1922 = vmatpush.bf16.msrb.mxu3 %v3893_v12  ;;  %v3950_v12 = vld [vmem:[%s5136_s0 + $0x170] sm:$0xf0]  ;;  %v3853_v7 = vor.u32 %v4614_v31, %v3852_v30  ;;  %v4636_v58 = vld [vmem:[%s5136_s0 + $0x164] sm:$0xf]  ;;  %v3958_v59 = vld [vmem:[%s5136_s0 + $0x178] sm:$0xf0] }
 0x6e9   : > { %1939 = vmatpush.bf16.msrb.mxu0 %v3989_v50  ;;  %v3953_v13 = vor.u32 %v4635_v11, %v3950_v12  ;;  %v3878_v50 = vld [vmem:[%s5136_s0 + $0xe0] sm:$0xf0]  ;;  %v3828_v12 = vld [vmem:[%s5136_s0 + $0x68] sm:$0xf]  ;;  %v4630_v30 = vld [vmem:[%s5136_s0 + $0x134] sm:$0xf] }
 0x6ea   : > { %1950 = vmatpush.bf16.msra.mxu1 %v3849_v40  ;;  %v4653_v40 = vld [vmem:[%s5136_s0 + $0x1ec] sm:$0xf]  ;;  %v3881_v0 = vor.u32 %v4617_v63, %v3878_v50  ;;  %v4054_v50 = vld [vmem:[%s5136_s0 + $0x238] sm:$0xf0] }
 0x6eb   : > { %v3934_v31 = vld [vmem:[%s5136_s0 + $0x148] sm:$0xf0] }
 0x6ec   : > { %1923 = vmatpush.bf16.msrb.mxu3 %v3869_v15  ;;  %v3774_v15 = vld [vmem:[%s5136_s0 + $0x18] sm:$0xf0] }
 0x6ed   : > { %1940 = vmatpush.bf16.msrb.mxu0 %v3965_v9  ;;  %v3854_v9 = vld [vmem:[%s5136_s0 + $0xb0] sm:$0xf0] }
 0x6ee   : > { %1951 = vmatpush.bf16.msra.mxu1 %v3825_v54  ;;  %v4647_v54 = vld [vmem:[%s5136_s0 + $0x1bc] sm:$0xf]  ;;  %v3857_v11 = vor.u32 %v4611_v8, %v3854_v9  ;;  %v4030_v8 = vld [vmem:[%s5136_s0 + $0x208] sm:$0xf0]  ;;  %v4028_v9 = vld [vmem:[%s5136_s0 + $0x1f0] sm:$0xf] }
 0x6f0   : > { %1924 = vmatpush.bf16.msrb.mxu3 %v3845_v34  ;;  %v4629_v34 = vld [vmem:[%s5136_s0 + $0x12c] sm:$0xf] }
 0x6f1   : > { %1972 = vmatpush.bf16.msra.mxu0 %v3949_v45  ;;  %v3929_v37 = vor.u32 %v4629_v34, %v3926_v35  ;;  %v4608_v45 = vld [vmem:[%s5136_s0 + $0x7c] sm:$0xf0]  ;;  %v3781_v35 = vor.u32 %v4596_v29, %v3780_v28  ;;  %v3884_v28 = vld [vmem:[%s5136_s0 + $0xd0] sm:$0xf]  ;;  %v4621_v29 = vld [vmem:[%s5136_s0 + $0xe4] sm:$0xf0] }
 0x6f2   : > { %1952 = vmatpush.bf16.msra.mxu1 %v3801_v3  ;;  %v4641_v3 = vld [vmem:[%s5136_s0 + $0x18c] sm:$0xf] }
 0x6f3   : > { %v3977_v6 = vor.u32 %v4641_v3, %v3974_v5  ;;  %v3961_v3 = vor.u32 %v4636_v58, %v3958_v59  ;;  %v4633_v5 = vld [vmem:[%s5136_s0 + $0x144] sm:$0xf0]  ;;  %v3838_v58 = vld [vmem:[%s5136_s0 + $0x88] sm:$0xf0] }
 0x6f4   : > { %1925 = vmatpush.bf16.msrb.mxu3 %v3821_v46  ;;  %v4025_v46 = vor.u32 %v4653_v40, %v4022_v42  ;;  %v5515_v42 = vld [vmem:[%s5121_s14] sm:$0xff] }
 0x6f5   : > { %1973 = vmatpush.bf16.msra.mxu0 %v3925_v36  ;;  %v1469_v43 = vperm.slane %v5515_v42, 2  ;;  %v1473_v48 = vperm.slane %v5515_v42, 3 }
 0x6f8   : > { %1926 = vmatpush.bf16.msrb.mxu3 %v3797_v62  ;;  %v4001_v62 = vor.u32 %v4647_v54, %v3998_v57  ;;  %v4639_v57 = vld [vmem:[%s5136_s0 + $0x174] sm:$0xf0] }
 0x6f9   : > { %1974 = vmatpush.bf16.msra.mxu0 %v3901_v47 }
 0x6fc   : > { %1927 = vmatpush.bf16.msrb.mxu3 %v3773_v55 }
 0x6fd   : > { %1975 = vmatpush.bf16.msra.mxu0 %v3877_v51 }
 0x700   : > { %1998 = vmatpush.bf16.msra.mxu3 %v3953_v13  ;;  %v4605_v13 = vld [vmem:[%s5136_s0 + $0x6c] sm:$0xf] }
 0x701   : > { %1976 = vmatpush.bf16.msra.mxu0 %v3853_v7  ;;  %v4654_v7 = vld [vmem:[%s5136_s0 + $0x1f4] sm:$0xf] }
 0x704   : > { %1999 = vmatpush.bf16.msra.mxu3 %v3929_v37 }
 0x708   : > { %2000 = vmatpush.bf16.msra.mxu3 %v3905_v52 }
 0x70c   : > { %2001 = vmatpush.bf16.msra.mxu3 %v3881_v0  ;;  %v4052_v0 = vld [vmem:[%s5136_s0 + $0x220] sm:$0xf] }
 0x710   : > { %2002 = vmatpush.bf16.msra.mxu3 %v3857_v11 }
 0x759   : > { %v1445_v16 = vpop.xlane.xlu1 %1444 }
 0x75a   : > { %v1446_v17 = vmul.f32 %v1445_v16, %v5159_v27  ;;  %v4640_v16 = vld [vmem:[%s5136_s0 + $0x184] sm:$0xf] }
 0x75c   : > { %v5421_v19 = vsub.f32 %v5400_v61, %v1446_v17  ;;  %v5424_v20 = vsub.f32 %v5398_v60, %v1446_v17  ;;  %v3777_v17 = vor.u32 %v4592_v14, %v3774_v15  ;;  %v3829_v15 = vor.u32 %v4608_v45, %v3828_v12  ;;  %v3908_v45 = vld [vmem:[%s5136_s0 + $0x100] sm:$0xf] }
 0x75d   : > { %v3937_v12 = vor.u32 %v4630_v30, %v3934_v31  ;;  %v3790_v30 = vld [vmem:[%s5136_s0 + $0x28] sm:$0xf0] }
 0x75e   : > { %v1449_v21 = vmul.f32 %v5421_v19, %v5421_v19  ;;  %v1450_v22 = vmul.f32 %v5424_v20, %v5424_v20  ;;  %1953 = vmatpush.bf16.msra.mxu1 %v3777_v17  ;;  %1977 = vmatpush.bf16.msra.mxu0 %v3829_v15  ;;  %v3910_v15 = vld [vmem:[%s5136_s0 + $0x118] sm:$0xf0] }
 0x760   : > { %v1451_v23 = vsel %vm464_vm1, %v1450_v22, 0.0  ;;  %v4044_v22 = vld [vmem:[%s5136_s0 + $0x218] sm:$0xf] }
 0x761   : > { %v1452_v24 = vadd.f32 %v1451_v23, %v1449_v21  ;;  %v3966_v21 = vld [vmem:[%s5136_s0 + $0x198] sm:$0xf0]  ;;  %v4662_v23 = vld [vmem:[%s5136_s0 + $0x22c] sm:$0xf0] }
 0x762   : > { %v4045_v25 = vor.u32 %v4662_v23, %v4044_v22  ;;  %2015 = vmatpush.bf16.msrb.mxu1 %v4049_v32  ;;  %v4602_v22 = vld [vmem:[%s5136_s0 + $0x4c] sm:$0xf0]  ;;  %v4599_v23 = vld [vmem:[%s5136_s0 + $0x3c] sm:$0xf]  ;;  %v4593_v32 = vld [vmem:[%s5136_s0 + $0xc] sm:$0xf] }
 0x763   : > { %1453 = vadd.xlane.f32.xlu2 %v1452_v24  ;;  %v3969_v24 = vor.u32 %v4640_v16, %v3966_v21  ;;  %v3830_v16 = vld [vmem:[%s5136_s0 + $0x80] sm:$0xf0]  ;;  %v3804_v21 = vld [vmem:[%s5136_s0 + $0x38] sm:$0xf]  ;;  %v3785_v36 = vor.u32 %v4593_v32, %v3782_v33  ;;  %v4618_v32 = vld [vmem:[%s5136_s0 + $0xd4] sm:$0xf] }
 0x764   : > { %v3833_v17 = vor.u32 %v4605_v13, %v3830_v16  ;;  %v4627_v13 = vld [vmem:[%s5136_s0 + $0x114] sm:$0xf0]  ;;  %v4033_v16 = vor.u32 %v4654_v7, %v4030_v8  ;;  %v3886_v33 = vld [vmem:[%s5136_s0 + $0xe8] sm:$0xf0]  ;;  %v4256_v8 = vld [vmem:[%s5141_s23 + $0x170] sm:$0xf] }
 0x765   : > { %1966 = vmatpush.bf16.msra.mxu2 %v3969_v24  ;;  %v3806_v24 = vld [vmem:[%s5136_s0 + $0x50] sm:$0xf0]  ;;  %v4695_v7 = vld [vmem:[%s5141_s23 + $0xf4] sm:$0xf0] }
 0x766   : > { %2016 = vmatpush.bf16.msrb.mxu1 %v4025_v46  ;;  %2003 = vmatpush.bf16.msra.mxu3 %v3833_v17  ;;  %v3809_v26 = vor.u32 %v4599_v23, %v3806_v24  ;;  %v1470_v46 = vperm.slane %v5519_v44, 2  ;;  %v4004_v23 = vld [vmem:[%s5136_s0 + $0x1c0] sm:$0xf]  ;;  %v4651_v24 = vld [vmem:[%s5136_s0 + $0x1d4] sm:$0xf0] }
 0x769   : > { %1989 = vmatpush.bf16.msrb.mxu2 %v4045_v25  ;;  %v3805_v25 = vor.u32 %v4602_v22, %v3804_v21  ;;  %v4648_v21 = vld [vmem:[%s5136_s0 + $0x1c4] sm:$0xf]  ;;  %v4006_v22 = vld [vmem:[%s5136_s0 + $0x1d8] sm:$0xf0] }
 0x76a   : > { %2017 = vmatpush.bf16.msrb.mxu1 %v4001_v62  ;;  %2004 = vmatpush.bf16.msra.mxu3 %v3809_v26  ;;  %v4660_v62 = vld [vmem:[%s5136_s0 + $0x224] sm:$0xf] }
 0x76b   : > { %1978 = vmatpush.bf16.msra.mxu0 %v3805_v25  ;;  %v3909_v25 = vor.u32 %v4627_v13, %v3908_v45  ;;  %v4320_v13 = vld [vmem:[%s5141_s23 + $0x1f0] sm:$0xf] }
 0x76d   : > { %1990 = vmatpush.bf16.msrb.mxu2 %v4021_v41 }
 0x76e   : > { %2018 = vmatpush.bf16.msrb.mxu1 %v3977_v6  ;;  %2005 = vmatpush.bf16.msra.mxu3 %v3785_v36  ;;  %v4642_v36 = vld [vmem:[%s5136_s0 + $0x194] sm:$0xf] }
 0x76f   : > { %1979 = vmatpush.bf16.msra.mxu0 %v3781_v35  ;;  %v4005_v35 = vor.u32 %v4651_v24, %v4004_v23 }
 0x771   : > { %1991 = vmatpush.bf16.msrb.mxu2 %v3997_v56  ;;  %v3956_v56 = vld [vmem:[%s5136_s0 + $0x160] sm:$0xf] }
 0x772   : > { %v3957_v2 = vor.u32 %v4639_v57, %v3956_v56  ;;  %v4609_v56 = vld [vmem:[%s5136_s0 + $0x84] sm:$0xf0]  ;;  %v4606_v57 = vld [vmem:[%s5136_s0 + $0x74] sm:$0xf] }
 0x775   : > { %1992 = vmatpush.bf16.msrb.mxu2 %v3973_v4  ;;  %v3932_v4 = vld [vmem:[%s5136_s0 + $0x130] sm:$0xf] }
 0x776   : > { %v3933_v11 = vor.u32 %v4633_v5, %v3932_v4  ;;  %v4597_v4 = vld [vmem:[%s5136_s0 + $0x24] sm:$0xf0]  ;;  %v4594_v5 = vld [vmem:[%s5136_s0 + $0x14] sm:$0xf] }
 0x7d6   : > { %v1454_v55 = vpop.xlane.xlu2 %1453 }
 0x7d7   : > { %v1455_v10 = vmul.f32 %v1454_v55, %v5159_v27  ;;  %v4057_v55 = vor.u32 %v4660_v62, %v4054_v50  ;;  %v3841_v62 = vor.u32 %v4606_v57, %v3838_v58  ;;  %v4600_v50 = vld [vmem:[%s5136_s0 + $0x44] sm:$0xf] }
 0x7d9   : > { %v1456_v14 = vadd.f32 1e-06, %v1455_v10  ;;  %v4657_v10 = vld [vmem:[%s5136_s0 + $0x204] sm:$0xf0] }
 0x7da   : > { %v4029_v17 = vor.u32 %v4657_v10, %v4028_v9  ;;  %v4711_v10 = vld [vmem:[%s5141_s23 + $0x174] sm:$0xf0] }
 0x7db   : > { %4867 = vrsqrt.f32 %v1456_v14  ;;  %vm1463_vm10 = vweird.f32 %v1456_v14 }
 0x7e1   : > { %v4868_v34 = vpop.eup %4867 }
 0x7e2   : > { %v1458_v37 = vmul.f32 %v4868_v34, %v1456_v14  ;;  %vm1464_vm9 = vweird.f32 %v4868_v34  ;;  %v4624_v14 = vld [vmem:[%s5136_s0 + $0x104] sm:$0xf] }
 0x7e3   : > { %vm1465_vm11 = vmor %vm1463_vm10, %vm1464_vm9  ;;  %v3913_v26 = vor.u32 %v4624_v14, %v3910_v15  ;;  %v4727_v14 = vld [vmem:[%s5141_s23 + $0x1f4] sm:$0xf0]  ;;  %v4184_v15 = vld [vmem:[%s5141_s23 + $0xe0] sm:$0xf] }
 0x7e4   : > { %v1459_v38 = vmul.f32 %v4868_v34, %v1458_v37  ;;  %v3982_v37 = vld [vmem:[%s5136_s0 + $0x1a8] sm:$0xf0] }
 0x7e6   : > { %v1460_v39 = vmul.f32 0.5, %v1459_v38  ;;  %v3980_v38 = vld [vmem:[%s5136_s0 + $0x190] sm:$0xf] }
 0x7e8   : > { %v1461_v40 = vsub.f32 1.5, %v1460_v39  ;;  %v4645_v39 = vld [vmem:[%s5136_s0 + $0x1a4] sm:$0xf0] }
 0x7ea   : > { %v1462_v41 = vmul.f32 %v4868_v34, %v1461_v40  ;;  %v3885_v40 = vor.u32 %v4621_v29, %v3884_v28  ;;  %v4312_v28 = vld [vmem:[%s5141_s23 + $0x1e0] sm:$0xf]  ;;  %v1552_v29 = vperm.slane %v5519_v44, 7  ;;  %v4707_v44 = vld [vmem:[%s5141_s23 + $0x154] sm:$0xf0] }
 0x7ec   : > { %v1466_v47 = vsel %vm1465_vm11, %v4868_v34, %v1462_v41  ;;  %v4009_v34 = vor.u32 %v4648_v21, %v4006_v22  ;;  %v3889_v41 = vor.u32 %v4618_v32, %v3886_v33  ;;  %v4709_v22 = vld [vmem:[%s5141_s23 + $0x164] sm:$0xf0] }
 0x7ed   : > { %v1467_v52 = vmul.f32 %v1466_v47, %v5421_v19  ;;  %v1468_v53 = vmul.f32 %v1466_v47, %v5424_v20  ;;  %v4663_v19 = vld [vmem:[%s5136_s0 + $0x234] sm:$0xf0]  ;;  %v4612_v47 = vld [vmem:[%s5136_s0 + $0xa4] sm:$0xf] }
 0x7ee   : > { %v4053_v6 = vor.u32 %v4663_v19, %v4052_v0  ;;  %v3814_v0 = vld [vmem:[%s5136_s0 + $0x58] sm:$0xf0] }
 0x7ef   : > { %v1471_v18 = vmul.f32 %v1469_v43, %v1467_v52  ;;  %v1472_v54 = vmul.f32 %v1470_v46, %v1468_v53  ;;  %v3860_v43 = vld [vmem:[%s5136_s0 + $0xa0] sm:$0xf]  ;;  %v4615_v46 = vld [vmem:[%s5136_s0 + $0xb4] sm:$0xf0]  ;;  %v3981_v52 = vor.u32 %v4645_v39, %v3980_v38  ;;  %v4240_v38 = vld [vmem:[%s5141_s23 + $0x150] sm:$0xf] }
 0x7f0   : > { %v3861_v53 = vor.u32 %v4615_v46, %v3860_v43  ;;  %v1551_v39 = vperm.slane %v5515_v42, 7  ;;  %v4112_v43 = vld [vmem:[%s5141_s23 + $0x50] sm:$0xf]  ;;  %v4675_v46 = vld [vmem:[%s5141_s23 + $0x54] sm:$0xf0] }
 0x7f1   : > { %v1475_v51 = vadd.f32 %v1473_v48, %v1471_v18  ;;  %v1476_v63 = vadd.f32 %v1474_v49, %v1472_v54  ;;  %v3862_v48 = vld [vmem:[%s5136_s0 + $0xb8] sm:$0xf0]  ;;  %v3985_v49 = vor.u32 %v4642_v36, %v3982_v37  ;;  %v3836_v54 = vld [vmem:[%s5136_s0 + $0x70] sm:$0xf]  ;;  %v4691_v37 = vld [vmem:[%s5141_s23 + $0xd4] sm:$0xf0] }
 0x7f2   : > { %v3865_v18 = vor.u32 %v4612_v47, %v3862_v48  ;;  %v3837_v59 = vor.u32 %v4609_v56, %v3836_v54  ;;  %v4176_v36 = vld [vmem:[%s5141_s23 + $0xd0] sm:$0xf]  ;;  %v4113_v48 = vor.u32 %v4675_v46, %v4112_v43  ;;  %v4689_v54 = vld [vmem:[%s5141_s23 + $0xc4] sm:$0xf0] }
 0x7f3   : > { %v5534_v20 = vpack.c.bf16 %v1475_v51, %v1475_v51  ;;  %v5536_v1 = vpack.c.bf16 %v1476_v63, %v1476_v63  ;;  %v3812_v51 = vld [vmem:[%s5136_s0 + $0x40] sm:$0xf]  ;;  %v4603_v63 = vld [vmem:[%s5136_s0 + $0x54] sm:$0xf0]  ;;  %v4304_v47 = vld [vmem:[%s5141_s23 + $0x1d0] sm:$0xf] }
 0x7f4   : > { %v3813_v19 = vor.u32 %v4603_v63, %v3812_v51 }
 0x7f5   : > { %1928 = vmatmul.bf16.vlgmr.msrb.gmra.mxu3 %v5534_v20  ;;  %4058 = vmatmul.msk.bf16.vlgmr.msrb.gmra.mxu0 %vm464_vm1, %v5536_v1 }
 0x7f6   : > { %1954 = vmatmul.bf16.vlgmr.msra.gmra.mxu1 %v5534_v20  ;;  %4059 = vmatmul.msk.bf16.vlgmr.msra.gmra.mxu2 %vm464_vm1, %v5536_v1 }
 0x7f7   : > { %2024 = vmatpush.bf16.msra.mxu2 %v3957_v2  ;;  %2050 = vmatpush.bf16.msra.mxu1 %v3961_v3  ;;  %v3817_v2 = vor.u32 %v4600_v50, %v3814_v0  ;;  %v3788_v3 = vld [vmem:[%s5136_s0 + $0x10] sm:$0xf]  ;;  %v4104_v0 = vld [vmem:[%s5141_s23 + $0x40] sm:$0xf] }
 0x7f8   : > { %2067 = vmatpush.bf16.msrb.mxu3 %v4057_v55  ;;  %2041 = vmatpush.bf16.msrb.mxu0 %v4053_v6  ;;  %v3789_v31 = vor.u32 %v4597_v4, %v3788_v3  ;;  %v3793_v55 = vor.u32 %v4594_v5, %v3790_v30  ;;  %v4192_v6 = vld [vmem:[%s5141_s23 + $0xf0] sm:$0xf]  ;;  %v4721_v30 = vld [vmem:[%s5141_s23 + $0x1c4] sm:$0xf0] }
 0x7f9   : > { %v4193_v9 = vor.u32 %v4695_v7, %v4192_v6  ;;  %v4160_v6 = vld [vmem:[%s5141_s23 + $0xb0] sm:$0xf] }
 0x7fb   : > { %2025 = vmatpush.bf16.msra.mxu2 %v3933_v11  ;;  %2051 = vmatpush.bf16.msra.mxu1 %v3937_v12  ;;  %v4257_v11 = vor.u32 %v4711_v10, %v4256_v8  ;;  %v4128_v12 = vld [vmem:[%s5141_s23 + $0x70] sm:$0xf]  ;;  %v4687_v8 = vld [vmem:[%s5141_s23 + $0xb4] sm:$0xf0] }
 0x7fc   : > { %2068 = vmatpush.bf16.msrb.mxu3 %v4033_v16  ;;  %2042 = vmatpush.bf16.msrb.mxu0 %v4029_v17  ;;  %v4693_v16 = vld [vmem:[%s5141_s23 + $0xe4] sm:$0xf0]  ;;  %v4248_v17 = vld [vmem:[%s5141_s23 + $0x160] sm:$0xf]  ;;  %v4161_v10 = vor.u32 %v4687_v8, %v4160_v6 }
 0x7fd   : > { %v4185_v21 = vor.u32 %v4693_v16, %v4184_v15  ;;  %v4249_v24 = vor.u32 %v4709_v22, %v4248_v17  ;;  %v4088_v6 = vld [vmem:[%s5141_s23 + $0x20] sm:$0xf]  ;;  %v4669_v8 = vld [vmem:[%s5141_s23 + $0x24] sm:$0xf0] }
 0x7ff   : > { %2026 = vmatpush.bf16.msra.mxu2 %v3909_v25  ;;  %2052 = vmatpush.bf16.msra.mxu1 %v3913_v26  ;;  %v4120_v25 = vld [vmem:[%s5141_s23 + $0x60] sm:$0xf]  ;;  %v4677_v26 = vld [vmem:[%s5141_s23 + $0x64] sm:$0xf0] }
 0x800   : > { %2069 = vmatpush.bf16.msrb.mxu3 %v4009_v34  ;;  %2043 = vmatpush.bf16.msrb.mxu0 %v4005_v35  ;;  %v4121_v33 = vor.u32 %v4677_v26, %v4120_v25  ;;  %v4725_v34 = vld [vmem:[%s5141_s23 + $0x1e4] sm:$0xf0] }
 0x801   : > { %v4313_v35 = vor.u32 %v4725_v34, %v4312_v28  ;;  %v4885_v28 = vld [vmem:[%s5121_s14 + $0x10] sm:$0xff]  ;;  %v4886_v34 = vld [vmem:[%s5121_s14 + $0x18] sm:$0xff] }
 0x803   : > { %2027 = vmatpush.bf16.msra.mxu2 %v3885_v40  ;;  %2053 = vmatpush.bf16.msra.mxu1 %v3889_v41  ;;  %v4177_v40 = vor.u32 %v4691_v37, %v4176_v36  ;;  %v4241_v41 = vor.u32 %v4707_v44, %v4240_v38  ;;  %v4671_v44 = vld [vmem:[%s5141_s23 + $0x34] sm:$0xf0] }
 0x804   : > { %2070 = vmatpush.bf16.msrb.mxu3 %v3985_v49  ;;  %2044 = vmatpush.bf16.msrb.mxu0 %v3981_v52  ;;  %v4723_v49 = vld [vmem:[%s5141_s23 + $0x1d4] sm:$0xf0] }
 0x805   : > { %1980 = vmatmul.bf16.vlgmr.msra.gmra.mxu0 %v5534_v20  ;;  %2006 = vmatmul.bf16.vlgmr.msra.gmra.mxu3 %v5534_v20  ;;  %v4305_v42 = vor.u32 %v4723_v49, %v4304_v47 }
 0x806   : > { %4060 = vmatmul.msk.bf16.vlgmr.msrb.gmra.mxu2 %vm464_vm1, %v5536_v1  ;;  %4061 = vmatmul.msk.bf16.vlgmr.msrb.gmra.mxu1 %vm464_vm1, %v5536_v1 }
 0x807   : > { %2028 = vmatpush.bf16.msra.mxu2 %v3861_v53  ;;  %2054 = vmatpush.bf16.msra.mxu1 %v3865_v18  ;;  %v4168_v18 = vld [vmem:[%s5141_s23 + $0xc0] sm:$0xf] }
 0x808   : > { %2950 = vmatpush.bf16.msra.mxu3 %v4257_v11  ;;  %v4169_v58 = vor.u32 %v4689_v54, %v4168_v18  ;;  %v4224_v11 = vld [vmem:[%s5141_s23 + $0x130] sm:$0xf] }
 0x80b   : > { %2029 = vmatpush.bf16.msra.mxu2 %v3837_v59  ;;  %2055 = vmatpush.bf16.msra.mxu1 %v3841_v62  ;;  %v4232_v59 = vld [vmem:[%s5141_s23 + $0x140] sm:$0xf]  ;;  %v4705_v62 = vld [vmem:[%s5141_s23 + $0x144] sm:$0xf0] }
 0x80c   : > { %2951 = vmatpush.bf16.msra.mxu3 %v4249_v24  ;;  %v4233_v50 = vor.u32 %v4705_v62, %v4232_v59 }
 0x80f   : > { %2030 = vmatpush.bf16.msra.mxu2 %v3813_v19  ;;  %2056 = vmatpush.bf16.msra.mxu1 %v3817_v2  ;;  %v4673_v19 = vld [vmem:[%s5141_s23 + $0x44] sm:$0xf0]  ;;  %v4296_v2 = vld [vmem:[%s5141_s23 + $0x1c0] sm:$0xf] }
 0x810   : > { %2952 = vmatpush.bf16.msra.mxu3 %v4241_v41  ;;  %v4105_v5 = vor.u32 %v4673_v19, %v4104_v0  ;;  %v4288_v41 = vld [vmem:[%s5141_s23 + $0x1b0] sm:$0xf]  ;;  %v4216_v0 = vld [vmem:[%s5141_s23 + $0x120] sm:$0xf]  ;;  %v4701_v19 = vld [vmem:[%s5141_s23 + $0x124] sm:$0xf0] }
 0x813   : > { %2031 = vmatpush.bf16.msra.mxu2 %v3789_v31  ;;  %2057 = vmatpush.bf16.msra.mxu1 %v3793_v55  ;;  %v4297_v55 = vor.u32 %v4721_v30, %v4296_v2 }
 0x814   : > { %2953 = vmatpush.bf16.msra.mxu3 %v4233_v50  ;;  %v4685_v50 = vld [vmem:[%s5141_s23 + $0xa4] sm:$0xf0] }
 0x815   : > { %4062 = vmatmul.msk.bf16.vlgmr.msrb.gmra.mxu0 %vm464_vm1, %v5536_v1  ;;  %4063 = vmatmul.msk.bf16.vlgmr.msrb.gmra.mxu3 %vm464_vm1, %v5536_v1  ;;  %v4679_v1 = vld [vmem:[%s5141_s23 + $0x74] sm:$0xf0] }
 0x816   : > { %2032 = vmatmul.bf16.vlgmr.msra.gmra.mxu2 %v5534_v20  ;;  %2058 = vmatmul.bf16.vlgmr.msra.gmra.mxu1 %v5534_v20  ;;  %v4129_v45 = vor.u32 %v4679_v1, %v4128_v12  ;;  %v4321_v20 = vor.u32 %v4727_v14, %v4320_v13  ;;  %v4703_v12 = vld [vmem:[%s5141_s23 + $0x134] sm:$0xf0] }
 0x817   : > { %2937 = vmatpush.bf16.msrb.mxu2 %v4193_v9 }
 0x818   : > { %2924 = vmatpush.bf16.msra.mxu0 %v4129_v45  ;;  %2963 = vmatpush.bf16.msrb.mxu1 %v4321_v20  ;;  %v4225_v45 = vor.u32 %v4703_v12, %v4224_v11  ;;  %v4217_v11 = vor.u32 %v4701_v19, %v4216_v0  ;;  %v4280_v12 = vld [vmem:[%s5141_s23 + $0x1a0] sm:$0xf] }
 0x81a   : > { %2954 = vmatpush.bf16.msra.mxu3 %v4225_v45 }
 0x81b   : > { %2938 = vmatpush.bf16.msrb.mxu2 %v4185_v21 }
 0x81c   : > { %2925 = vmatpush.bf16.msra.mxu0 %v4121_v33  ;;  %2964 = vmatpush.bf16.msrb.mxu1 %v4313_v35  ;;  %v1554_v35 = vperm.slane %v4886_v34, 7 }
 0x81e   : > { %2955 = vmatpush.bf16.msra.mxu3 %v4217_v11 }
 0x81f   : > { %2939 = vmatpush.bf16.msrb.mxu2 %v4177_v40  ;;  %v4096_v40 = vld [vmem:[%s5141_s23 + $0x30] sm:$0xf] }
 0x820   : > { %2926 = vmatpush.bf16.msra.mxu0 %v4113_v48  ;;  %2965 = vmatpush.bf16.msrb.mxu1 %v4305_v42  ;;  %v4097_v49 = vor.u32 %v4671_v44, %v4096_v40 }
 0x823   : > { %2940 = vmatpush.bf16.msrb.mxu2 %v4169_v58 }
 0x824   : > { %2927 = vmatpush.bf16.msra.mxu0 %v4105_v5  ;;  %2966 = vmatpush.bf16.msrb.mxu1 %v4297_v55 }
 0x827   : > { %2941 = vmatpush.bf16.msrb.mxu2 %v4161_v10 }
 0x828   : > { %2928 = vmatpush.bf16.msra.mxu0 %v4097_v49 }
 0x872   : > { %v1942_v23 = vpop.f32.mrf.mxu0 }
 0x873   : > { %v1955_v32 = vpop.f32.mrf.mxu1 }
 0x874   : > { %v1956_v52 = vadd.f32 %v1955_v32, %v1552_v29  ;;  %v1553_v29 = vperm.slane %v4885_v28, 7 }
 0x878   : > { %v1929_v53 = vpop.f32.mrf.mxu3 }
 0x879   : > { %v1930_v56 = vadd.f32 %v1929_v53, %v1551_v39  ;;  %v1968_v57 = vpop.f32.mrf.mxu2 }
 0x87a   : > { %v5626_v51 = vadd.f32 %v1968_v57, %v1956_v52  ;;  %v1944_v63 = vpop.f32.mrf.mxu0  ;;  %v4719_v52 = vld [vmem:[%s5141_s23 + $0x1b4] sm:$0xf0]  ;;  %v4152_v57 = vld [vmem:[%s5141_s23 + $0xa0] sm:$0xf] }
 0x87b   : > { %v5631_v3 = vadd.f32 %v1942_v23, %v1930_v56  ;;  %v1957_v4 = vpop.f32.mrf.mxu1  ;;  %v4289_v56 = vor.u32 %v4719_v52, %v4288_v41  ;;  %v4153_v55 = vor.u32 %v4685_v50, %v4152_v57 }
 0x87c   : > { %v5635_v31 = vmul.f32 0.70710677, %v5626_v51 }
 0x87d   : > { %v5639_v7 = vmul.f32 0.70710677, %v5631_v3  ;;  %2967 = vmatpush.bf16.msrb.mxu1 %v4289_v56  ;;  %2942 = vmatpush.bf16.msrb.mxu2 %v4153_v55 }
 0x87e   : > { %v2128_v9 = vmul.f32 %v5635_v31, %v5635_v31 }
 0x87f   : > { %v2088_v1 = vmul.f32 %v5639_v7, %v5639_v7 }
 0x880   : > { %v5648_v13 = vmin.f32 %v2128_v9, 16.0  ;;  %v1931_v14 = vpop.f32.mrf.mxu3 }
 0x881   : > { %v5650_v20 = vmin.f32 %v2088_v1, 16.0  ;;  %v1970_v15 = vpop.f32.mrf.mxu2 }
 0x882   : > { %v2130_v16 = vmul.f32 2.1237322e-06, %v5648_v13  ;;  %v2141_v17 = vmul.f32 3.8918573e-05, %v5648_v13  ;;  %v1981_v21 = vpop.f32.mrf.mxu0  ;;  %v4089_v15 = vor.u32 %v4669_v8, %v4088_v6 }
 0x883   : > { %v2090_v22 = vmul.f32 2.1237322e-06, %v5650_v20  ;;  %v2101_v23 = vmul.f32 3.8918573e-05, %v5650_v20  ;;  %v2020_v24 = vpop.f32.mrf.mxu1  ;;  %v1982_v47 = vadd.f32 %v1981_v21, %v1553_v29  ;;  %v4144_v29 = vld [vmem:[%s5141_s23 + $0x90] sm:$0xf] }
 0x884   : > { %v2131_v25 = vadd.f32 0.00028619796, %v2130_v16  ;;  %v2142_v26 = vadd.f32 0.001143296, %v2141_v17  ;;  %2929 = vmatpush.bf16.msra.mxu0 %v4089_v15 }
 0x885   : > { %v2091_v32 = vadd.f32 0.00028619796, %v2090_v22  ;;  %v2102_v33 = vadd.f32 0.001143296, %v2101_v23  ;;  %v457_v22 = vld [vmem:[%s5121_s14 + $0x28] sm:$0xff] }
 0x886   : > { %v2132_v36 = vmul.f32 %v2131_v25, %v5648_v13  ;;  %v2143_v37 = vmul.f32 %v2142_v26, %v5648_v13  ;;  %v4717_v23 = vld [vmem:[%s5141_s23 + $0x1a4] sm:$0xf0]  ;;  %v1556_v57 = vperm.slane %v457_v22, 7 }
 0x887   : > { %v2092_v38 = vmul.f32 %v2091_v32, %v5650_v20  ;;  %v2103_v39 = vmul.f32 %v2102_v33, %v5650_v20  ;;  %v4281_v28 = vor.u32 %v4717_v23, %v4280_v12  ;;  %v4683_v32 = vld [vmem:[%s5141_s23 + $0x94] sm:$0xf0]  ;;  %v4208_v33 = vld [vmem:[%s5141_s23 + $0x110] sm:$0xf] }
 0x888   : > { %v2133_v43 = vadd.f32 0.0036580483, %v2132_v36  ;;  %v2144_v46 = vadd.f32 0.014752088, %v2143_v37  ;;  %v2007_v48 = vpop.f32.mrf.mxu3 }
 0x889   : > { %v2093_v53 = vadd.f32 0.0036580483, %v2092_v38  ;;  %v2104_v42 = vadd.f32 0.014752088, %v2103_v39  ;;  %v1994_v18 = vpop.f32.mrf.mxu2  ;;  %v2008_v54 = vadd.f32 %v2007_v48, %v1554_v35  ;;  %v4145_v38 = vor.u32 %v4683_v32, %v4144_v29  ;;  %v4699_v39 = vld [vmem:[%s5141_s23 + $0x114] sm:$0xf0]  ;;  %2968 = vmatpush.bf16.msrb.mxu1 %v4281_v28 }
 0x88a   : > { %v2134_v58 = vmul.f32 %v2133_v43, %v5648_v13  ;;  %v2145_v59 = vmul.f32 %v2144_v46, %v5648_v13  ;;  %v5669_v62 = vadd.f32 %v1994_v18, %v1982_v47  ;;  %v1983_v63 = vpop.f32.mrf.mxu0  ;;  %v4209_v46 = vor.u32 %v4699_v39, %v4208_v33 }
 0x88b   : > { %v2094_v2 = vmul.f32 %v2093_v53, %v5650_v20  ;;  %v2105_v4 = vmul.f32 %v2104_v42, %v5650_v20  ;;  %v5676_v5 = vadd.f32 %v2020_v24, %v2008_v54  ;;  %v2022_v30 = vpop.f32.mrf.mxu1  ;;  %2943 = vmatpush.bf16.msrb.mxu2 %v4145_v38  ;;  %v4080_v53 = vld [vmem:[%s5141_s23 + $0x10] sm:$0xf]  ;;  %v4667_v42 = vld [vmem:[%s5141_s23 + $0x14] sm:$0xf0]  ;;  %v2076_v39 = vmul.f32 0.5, %v5631_v3 }
 0x88c   : > { %v2135_v9 = vadd.f32 0.05243302, %v2134_v58  ;;  %v2146_v10 = vadd.f32 0.112945676, %v2145_v59  ;;  %v5682_v14 = vmul.f32 0.70710677, %v5669_v62  ;;  %2956 = vmatpush.bf16.msra.mxu3 %v4209_v46 }
 0x88d   : > { %v2095_v1 = vadd.f32 0.05243302, %v2094_v2  ;;  %v2106_v45 = vadd.f32 0.112945676, %v2105_v4  ;;  %v5687_v21 = vmul.f32 0.70710677, %v5676_v5  ;;  %v4081_v2 = vor.u32 %v4667_v42, %v4080_v53 }
 0x88e   : > { %v2136_v16 = vmul.f32 %v2135_v9, %v5648_v13  ;;  %v2147_v17 = vmul.f32 %v2146_v10, %v5648_v13  ;;  %v2168_v26 = vmul.f32 %v5682_v14, %v5682_v14  ;;  %v4887_v30 = vld [vmem:[%s5121_s14 + $0x20] sm:$0xff]  ;;  %v4272_v10 = vld [vmem:[%s5141_s23 + $0x190] sm:$0xf] }
 0x88f   : > { %v2096_v24 = vmul.f32 %v2095_v1, %v5650_v20  ;;  %v2107_v25 = vmul.f32 %v2106_v45, %v5650_v20  ;;  %v2208_v36 = vmul.f32 %v5687_v21, %v5687_v21  ;;  %v1555_v55 = vperm.slane %v4887_v30, 7  ;;  %2930 = vmatpush.bf16.msra.mxu0 %v4081_v2 }
 0x890   : > { %v2137_v34 = vadd.f32 0.18741608, %v2136_v16  ;;  %v2148_v35 = vadd.f32 0.4994258, %v2147_v17  ;;  %v2009_v37 = vpop.f32.mrf.mxu3  ;;  %v5701_v41 = vmin.f32 %v2168_v26, 16.0 }
 0x891   : > { %v2097_v40 = vadd.f32 0.18741608, %v2096_v24  ;;  %v2108_v44 = vadd.f32 0.4994258, %v2107_v25  ;;  %v1996_v43 = vpop.f32.mrf.mxu2  ;;  %v5705_v49 = vmin.f32 %v2208_v36, 16.0 }
 0x892   : > { %v2138_v47 = vmul.f32 %v2137_v34, %v5648_v13  ;;  %v2149_v48 = vmul.f32 %v2148_v35, %v5648_v13  ;;  %v5707_v52 = vpop.f32.mrf.mxu0  ;;  %v2170_v56 = vmul.f32 2.1237322e-06, %v5701_v41  ;;  %v2181_v13 = vmul.f32 3.8918573e-05, %v5701_v41  ;;  %v4715_v16 = vld [vmem:[%s5141_s23 + $0x194] sm:$0xf0] }
 0x893   : > { %v2098_v18 = vmul.f32 %v2097_v40, %v5650_v20  ;;  %v2109_v54 = vmul.f32 %v2108_v44, %v5650_v20  ;;  %v2059_v58 = vpop.f32.mrf.mxu1  ;;  %v2210_v19 = vmul.f32 2.1237322e-06, %v5705_v49  ;;  %v2221_v24 = vmul.f32 3.8918573e-05, %v5705_v49 }
 0x894   : > { %v2139_v59 = vadd.f32 1.1283791, %v2138_v47  ;;  %v5714_v63 = vadd.f32 1.0, %v2149_v48  ;;  %v2171_v0 = vadd.f32 0.00028619796, %v2170_v56  ;;  %v2060_v20 = vadd.f32 %v2059_v58, %v1556_v57 }
 0x895   : > { %v5717_v50 = vadd.f32 1.0, %v2109_v54  ;;  %v2099_v4 = vadd.f32 1.1283791, %v2098_v18  ;;  %v2182_v12 = vadd.f32 0.001143296, %v2181_v13  ;;  %v4273_v36 = vor.u32 %v4715_v16, %v4272_v10 }
 0x896   : > { %4869 = vrcp.f32 %v5714_v63  ;;  %v2160_v6 = vand.u32 2147483647, %v5714_v63  ;;  %v2172_v8 = vmul.f32 %v2171_v0, %v5701_v41  ;;  %v5727_v11 = vmul.f32 %v2139_v59, %v5635_v31 }
 0x897   : > { %4871 = vrcp.f32 %v5717_v50  ;;  %v2211_v1 = vadd.f32 0.00028619796, %v2210_v19  ;;  %v5733_v17 = vmul.f32 %v2099_v4, %v5639_v7  ;;  %v2120_v22 = vand.u32 2147483647, %v5717_v50  ;;  %2969 = vmatpush.bf16.msrb.mxu1 %v4273_v36 }
 0x898   : > { %v2072_v9 = vpop.f32.mrf.mxu3  ;;  %v2173_v23 = vadd.f32 0.0036580483, %v2172_v8  ;;  %v2122_v26 = vand.u32 2147483648, %v5717_v50  ;;  %vm2156_vm12 = vweird.f32 %v5714_v63  ;;  %v2183_v31 = vmul.f32 %v2182_v12, %v5701_v41 }
 0x899   : > { %v2033_v45 = vpop.f32.mrf.mxu2  ;;  %v5729_v15 = vadd.f32 %v2072_v9, %v2060_v20  ;;  %v2212_v28 = vmul.f32 %v2211_v1, %v5705_v49  ;;  %vm2116_vm13 = vweird.f32 %v5717_v50  ;;  %v2222_v34 = vadd.f32 0.001143296, %v2221_v24 }
 0x89a   : > { %v2048_v25 = vpop.f32.mrf.mxu0  ;;  %v2034_v29 = vadd.f32 %v2033_v45, %v1555_v55  ;;  %v2174_v7 = vmul.f32 %v2173_v23, %v5701_v41  ;;  %vm5747_vm14 = vcmp.eq.f32.partialorder %v2160_v6, 8.507059e+37  ;;  %v2162_v40 = vand.u32 2147483648, %v5714_v63 }
 0x89b   : > { %v2061_v32 = vpop.f32.mrf.mxu1  ;;  %v5744_v35 = vmul.f32 0.70710677, %v5729_v15  ;;  %v2184_v44 = vadd.f32 0.014752088, %v2183_v31  ;;  %v2213_v43 = vadd.f32 0.0036580483, %v2212_v28  ;;  %v2223_v53 = vmul.f32 %v2222_v34, %v5705_v49 }
 0x89c   : > { %v4870_v33 = vpop.eup %4869  ;;  %vm5753_vm15 = vcmp.eq.f32.partialorder %v2120_v22, 8.507059e+37  ;;  %v2175_v48 = vadd.f32 0.05243302, %v2174_v7  ;;  %v5761_v56 = vadd.f32 %v5707_v52, %v2034_v29  ;;  %v2163_v9 = vor.u32 1.1754944e-38, %v2162_v40 }
 0x89d   : > { %v4872_v37 = vpop.eup %4871  ;;  %v2152_v38 = vmul.f32 %v4870_v33, %v5714_v63  ;;  %vm2157_vm0 = vweird.f32 %v4870_v33  ;;  %v2185_v18 = vmul.f32 %v2184_v44, %v5701_v41  ;;  %v2214_v54 = vmul.f32 %v2213_v43, %v5705_v49 }
 0x89e   : > { %v2112_v46 = vmul.f32 %v4872_v37, %v5717_v50  ;;  %v2176_v58 = vmul.f32 %v2175_v48, %v5701_v41  ;;  %v2224_v59 = vadd.f32 0.014752088, %v2223_v53  ;;  %v2288_v13 = vmul.f32 %v5744_v35, %v5744_v35  ;;  %vm2158_vm3 = vmor %vm2156_vm12, %vm2157_vm0 }
 0x89f   : > { %v2153_v42 = vsub.f32 1.0, %v2152_v38  ;;  %vm2117_vm2 = vweird.f32 %v4872_v37  ;;  %v2186_v2 = vadd.f32 0.112945676, %v2185_v18  ;;  %v2215_v4 = vadd.f32 0.05243302, %v2214_v54 }
 0x8a0   : > { %v2113_v57 = vsub.f32 1.0, %v2112_v46  ;;  %v2074_v0 = vpop.f32.mrf.mxu3  ;;  %v2177_v55 = vadd.f32 0.18741608, %v2176_v58  ;;  %v2225_v6 = vmul.f32 %v2224_v59, %v5705_v49  ;;  %v5768_v52 = vmul.f32 0.70710677, %v5761_v56  ;;  %vm2118_vm4 = vmor %vm2116_vm13, %vm2117_vm2 }
 0x8a1   : > { %v2154_v19 = vmul.f32 %v4870_v33, %v2153_v42  ;;  %v2035_v20 = vpop.f32.mrf.mxu2  ;;  %v2187_v10 = vmul.f32 %v2186_v2, %v5701_v41  ;;  %v2216_v12 = vmul.f32 %v2215_v4, %v5705_v49  ;;  %v5777_v22 = vmin.f32 %v2288_v13, 16.0  ;;  %v4136_v18 = vld [vmem:[%s5141_s23 + $0x80] sm:$0xf]  ;;  %v4681_v13 = vld [vmem:[%s5141_s23 + $0x84] sm:$0xf0] }
 0x8a2   : > { %v2114_v30 = vmul.f32 %v4872_v37, %v2113_v57  ;;  %v2226_v45 = vadd.f32 0.112945676, %v2225_v6  ;;  %v2248_v16 = vmul.f32 %v5768_v52, %v5768_v52  ;;  %v2123_v23 = vor.u32 1.1754944e-38, %v2122_v26  ;;  %v4200_v0 = vld [vmem:[%s5141_s23 + $0x100] sm:$0xf] }
 0x8a3   : > { %v2155_v8 = vadd.f32 %v4870_v33, %v2154_v19  ;;  %v2188_v25 = vadd.f32 0.4994258, %v2187_v10  ;;  %v2217_v31 = vadd.f32 0.18741608, %v2216_v12  ;;  %v2178_v63 = vmul.f32 %v2177_v55, %v5701_v41  ;;  %v4697_v20 = vld [vmem:[%s5141_s23 + $0x104] sm:$0xf0] }
 0x8a4   : > { %v2115_v1 = vadd.f32 %v4872_v37, %v2114_v30  ;;  %v2227_v32 = vmul.f32 %v2226_v45, %v5705_v49  ;;  %v2290_v38 = vmul.f32 2.1237322e-06, %v5777_v22  ;;  %v2077_v40 = vmul.f32 0.5, %v5626_v51  ;;  %v4448_v30 = vld [vmem:[%s5141_s23 + $0x2f0] sm:$0xf] }
 0x8a5   : > { %v2159_v24 = vsel %vm2158_vm3, %v4870_v33, %v2155_v8  ;;  %v2189_v50 = vmul.f32 %v2188_v25, %v5701_v41  ;;  %v2218_v26 = vmul.f32 %v2217_v31, %v5705_v49  ;;  %v2179_v48 = vadd.f32 1.1283791, %v2178_v63  ;;  %v4759_v55 = vld [vmem:[%s5141_s23 + $0x2f4] sm:$0xf0]  ;;  %v4678_v10 = vld [vmem:[%s5141_s23 + $0x74] sm:$0xf] }
 0x8a6   : > { %v2119_v28 = vsel %vm2118_vm4, %v4872_v37, %v2115_v1  ;;  %v2164_v29 = vsel %vm5747_vm14, %v2163_v9, %v2159_v24  ;;  %v2228_v36 = vadd.f32 0.4994258, %v2227_v32  ;;  %v5792_v37 = vmin.f32 %v2248_v16, 16.0  ;;  %v4130_v12 = vld [vmem:[%s5141_s23 + $0x78] sm:$0xf0] }
 0x8a7   : > { %v2124_v7 = vsel %vm5753_vm15, %v2123_v23, %v2119_v28  ;;  %v2165_v34 = vmul.f32 %v2164_v29, %v5727_v11  ;;  %v5797_v43 = vadd.f32 1.0, %v2189_v50  ;;  %v2219_v53 = vadd.f32 1.1283791, %v2218_v26  ;;  %v4072_v24 = vld [vmem:[%s5141_s23] sm:$0xf] }
 0x8a8   : > { %v2125_v33 = vmul.f32 %v2124_v7, %v5733_v17  ;;  %v2229_v41 = vmul.f32 %v2228_v36, %v5705_v49  ;;  %v2250_v46 = vmul.f32 2.1237322e-06, %v5792_v37  ;;  %v2261_v17 = vmul.f32 3.8918573e-05, %v5792_v37  ;;  %v4665_v25 = vld [vmem:[%s5141_s23 + $0x4] sm:$0xf0] }
 0x8a9   : > { %v4065_v44 = vclamps-f32 %v2165_v34, 1.0  ;;  %4873 = vrcp.f32 %v5797_v43  ;;  %v2291_v42 = vadd.f32 0.00028619796, %v2290_v38  ;;  %v2202_v54 = vand.u32 2147483648, %v5797_v43  ;;  %v4713_v36 = vld [vmem:[%s5141_s23 + $0x184] sm:$0xf0] }
 0x8aa   : > { %v4064_v11 = vclamps-f32 %v2125_v33, 1.0  ;;  %v5803_v51 = vadd.f32 1.0, %v2229_v41  ;;  %v2251_v57 = vadd.f32 0.00028619796, %v2250_v46  ;;  %v2262_v58 = vadd.f32 0.001143296, %v2261_v17 }
 0x8ab   : > { %v2329_v47 = vadd.f32 1.0, %v4065_v44  ;;  %v2200_v59 = vand.u32 2147483647, %v5797_v43  ;;  %v5812_v19 = vmul.f32 %v2179_v48, %v5682_v14  ;;  %v5815_v2 = vmul.f32 %v2219_v53, %v5687_v21  ;;  %v4264_v33 = vld [vmem:[%s5141_s23 + $0x180] sm:$0xf] }
 0x8ac   : > { %v2328_v3 = vadd.f32 1.0, %v4064_v11  ;;  %4875 = vrcp.f32 %v5803_v51  ;;  %v2252_v4 = vmul.f32 %v2251_v57, %v5792_v37  ;;  %vm2196_vm5 = vweird.f32 %v5797_v43  ;;  %v4384_v41 = vld [vmem:[%s5141_s23 + $0x270] sm:$0xf]  ;;  %v4743_v46 = vld [vmem:[%s5141_s23 + $0x274] sm:$0xf0] }
 0x8ad   : > { %v2335_v49 = vmul.f32 %v2329_v47, %v2077_v40  ;;  %v2263_v8 = vmul.f32 %v2262_v58, %v5792_v37  ;;  %v2292_v9 = vmul.f32 %v2291_v42, %v5777_v22  ;;  %v2301_v14 = vmul.f32 3.8918573e-05, %v5777_v22  ;;  %v4194_v42 = vld [vmem:[%s5141_s23 + $0xf8] sm:$0xf0]  ;;  %v4440_v57 = vld [vmem:[%s5141_s23 + $0x2e0] sm:$0xf] }
 0x8ae   : > { %v2334_v6 = vmul.f32 %v2328_v3, %v2076_v39  ;;  %v5831_v45 = vor.u32 1.1754944e-38, %v2202_v54  ;;  %v2253_v16 = vadd.f32 0.0036580483, %v2252_v4  ;;  %v4137_v23 = vor.u32 %v4681_v13, %v4136_v18  ;;  %v4694_v3 = vld [vmem:[%s5141_s23 + $0xf4] sm:$0xf] }
 0x8af   : > { %v5827_v21 = vpop.eup %4873  ;;  %v5829_v1 = vpack.c.bf16 %v2335_v49, %v2335_v49  ;;  %vm5837_vm6 = vcmp.eq.f32.partialorder %v2200_v59, 8.507059e+37  ;;  %v2240_v29 = vand.u32 2147483647, %v5803_v51  ;;  %v2264_v63 = vadd.f32 0.014752088, %v2263_v8 }
 0x8b0   : > { %v2192_v31 = vmul.f32 %v5827_v21, %v5797_v43  ;;  %v2293_v32 = vadd.f32 0.0036580483, %v2292_v9  ;;  %vm2236_vm7 = vweird.f32 %v5803_v51  ;;  %v2254_v7 = vmul.f32 %v2253_v16, %v5792_v37  ;;  %2944 = vmatpush.bf16.msrb.mxu2 %v4137_v23  ;;  %v4757_v58 = vld [vmem:[%s5141_s23 + $0x2e4] sm:$0xf0]  ;;  %v4376_v16 = vld [vmem:[%s5141_s23 + $0x260] sm:$0xf] }
 0x8b1   : > { %v2302_v34 = vadd.f32 0.001143296, %v2301_v14  ;;  %v4201_v50 = vor.u32 %v4697_v20, %v4200_v0  ;;  %v4449_v26 = vor.u32 %v4759_v55, %v4448_v30  ;;  %v5848_v39 = vpack.c.bf16 %v2334_v6, %v2334_v6  ;;  %v4676_v6 = vld [vmem:[%s5141_s23 + $0x64] sm:$0xf] }
 0x8b2   : > { %v5846_v38 = vpop.eup %4875  ;;  %v2193_v40 = vsub.f32 1.0, %v2192_v31  ;;  %v2265_v44 = vmul.f32 %v2264_v63, %v5792_v37  ;;  %v4133_v11 = vor.u32 %v4678_v10, %v4130_v12  ;;  %v2242_v47 = vand.u32 2147483648, %v5803_v51  ;;  %v4122_v12 = vld [vmem:[%s5141_s23 + $0x68] sm:$0xf0]  ;;  %v4741_v31 = vld [vmem:[%s5141_s23 + $0x264] sm:$0xf0] }
 0x8b3   : > { %v2232_v17 = vmul.f32 %v5846_v38, %v5803_v51  ;;  %v2294_v48 = vmul.f32 %v2293_v32, %v5777_v22  ;;  %v2303_v53 = vmul.f32 %v2302_v34, %v5777_v22  ;;  %2957 = vmatpush.bf16.msra.mxu3 %v4201_v50  ;;  %vm2197_vm8 = vweird.f32 %v5827_v21  ;;  %2945 = vmatmul.bf16.vlgmr.msrb.gmra.mxu2 %v5829_v1 }
 0x8b4   : > { %2989 = vmatpush.bf16.msra.mxu2 %v4449_v26  ;;  %v2194_v18 = vmul.f32 %v5827_v21, %v2193_v40  ;;  %v2266_v49 = vadd.f32 0.112945676, %v2265_v44  ;;  %v4073_v54 = vor.u32 %v4665_v25, %v4072_v24  ;;  %v2255_v13 = vadd.f32 0.05243302, %v2254_v7  ;;  %vm2198_vm10 = vmor %vm2196_vm5, %vm2197_vm8  ;;  %v4692_v26 = vld [vmem:[%s5141_s23 + $0xe4] sm:$0xf] }
 0x8b5   : > { %v2233_v59 = vsub.f32 1.0, %v2232_v17  ;;  %v2304_v0 = vadd.f32 0.014752088, %v2303_v53  ;;  %v4265_v4 = vor.u32 %v4713_v36, %v4264_v33  ;;  %vm2237_vm9 = vweird.f32 %v5846_v38  ;;  %v4186_v33 = vld [vmem:[%s5141_s23 + $0xe8] sm:$0xf0] }
 0x8b6   : > { %v2195_v20 = vadd.f32 %v5827_v21, %v2194_v18  ;;  %v2267_v30 = vmul.f32 %v2266_v49, %v5792_v37  ;;  %2931 = vmatpush.bf16.msra.mxu0 %v4073_v54  ;;  %v4385_v55 = vor.u32 %v4743_v46, %v4384_v41  ;;  %v2295_v9 = vadd.f32 0.05243302, %v2294_v48  ;;  %vm5894_vm12 = vmor %vm2236_vm7, %vm2237_vm9  ;;  %v4432_v44 = vld [vmem:[%s5141_s23 + $0x2d0] sm:$0xf]  ;;  %v4674_v41 = vld [vmem:[%s5141_s23 + $0x54] sm:$0xf] }
 0x8b7   : > { %3002 = vmatpush.bf16.msrb.mxu3 %v4133_v11  ;;  %v2234_v8 = vmul.f32 %v5846_v38, %v2233_v59  ;;  %v2305_v14 = vmul.f32 %v2304_v0, %v5777_v22  ;;  %2970 = vmatpush.bf16.msrb.mxu1 %v4265_v4  ;;  %v4197_v10 = vor.u32 %v4694_v3, %v4194_v42  ;;  %vm5878_vm11 = vcmp.eq.f32.partialorder %v2240_v29, 8.507059e+37  ;;  %v4755_v11 = vld [vmem:[%s5141_s23 + $0x2d4] sm:$0xf0]  ;;  %v4114_v46 = vld [vmem:[%s5141_s23 + $0x58] sm:$0xf0] }
 0x8b8   : > { %v2199_v23 = vsel %vm2198_vm10, %v5827_v21, %v2195_v20  ;;  %v2268_v25 = vadd.f32 0.4994258, %v2267_v30  ;;  %v4441_v43 = vor.u32 %v4757_v58, %v4440_v57  ;;  %v2256_v7 = vmul.f32 %v2255_v13, %v5792_v37  ;;  %v4739_v53 = vld [vmem:[%s5141_s23 + $0x254] sm:$0xf0]  ;;  %v4690_v54 = vld [vmem:[%s5141_s23 + $0xd4] sm:$0xf] }
 0x8b9   : > { %v2204_v63 = vsel %vm5837_vm6, %v5831_v45, %v2199_v23  ;;  %v2235_v32 = vadd.f32 %v5846_v38, %v2234_v8  ;;  %v2306_v21 = vadd.f32 0.112945676, %v2305_v14  ;;  %2932 = vmatmul.bf16.vlgmr.msra.gmra.mxu0 %v5848_v39  ;;  %v2243_v28 = vor.u32 1.1754944e-38, %v2242_v47  ;;  %v4178_v57 = vld [vmem:[%s5141_s23 + $0xd8] sm:$0xf0] }
 0x8ba   : > { %2976 = vmatpush.bf16.msrb.mxu0 %v4385_v55  ;;  %v2205_v29 = vmul.f32 %v2204_v63, %v5812_v19  ;;  %v2269_v34 = vmul.f32 %v2268_v25, %v5792_v37  ;;  %2990 = vmatpush.bf16.msra.mxu2 %v4441_v43  ;;  %v4125_v50 = vor.u32 %v4676_v6, %v4122_v12  ;;  %v2257_v42 = vadd.f32 0.18741608, %v2256_v7  ;;  %v4424_v13 = vld [vmem:[%s5141_s23 + $0x2c0] sm:$0xf]  ;;  %v4753_v0 = vld [vmem:[%s5141_s23 + $0x2c4] sm:$0xf0] }
 0x8bb   : > { %3015 = vmatpush.bf16.msra.mxu1 %v4197_v10  ;;  %v2239_v19 = vsel %vm5894_vm12, %v5846_v38, %v2235_v32  ;;  %v2296_v36 = vmul.f32 %v2295_v9, %v5777_v22  ;;  %v2307_v51 = vmul.f32 %v2306_v21, %v5777_v22  ;;  %v4377_v40 = vor.u32 %v4741_v31, %v4376_v16  ;;  %v4368_v38 = vld [vmem:[%s5141_s23 + $0x250] sm:$0xf]  ;;  %v4672_v55 = vld [vmem:[%s5141_s23 + $0x44] sm:$0xf]  ;;  %v4106_v9 = vld [vmem:[%s5141_s23 + $0x48] sm:$0xf0] }
 0x8bc   : > { %v4066_v17 = vclamps-f32 %v2205_v29, 1.0  ;;  %v2244_v47 = vsel %vm5878_vm11, %v2243_v28, %v2239_v19  ;;  %v5912_v48 = vadd.f32 1.0, %v2269_v34  ;;  %3003 = vmatpush.bf16.msrb.mxu3 %v4125_v50  ;;  %v4189_v49 = vor.u32 %v4692_v26, %v4186_v33  ;;  %v4360_v14 = vld [vmem:[%s5141_s23 + $0x240] sm:$0xf]  ;;  %v4737_v10 = vld [vmem:[%s5141_s23 + $0x244] sm:$0xf0] }
 0x8bd   : > { %v2245_v3 = vmul.f32 %v2244_v47, %v5815_v2  ;;  %v2308_v18 = vadd.f32 0.4994258, %v2307_v51  ;;  %v2078_v58 = vmul.f32 0.5, %v5669_v62  ;;  %v2079_v4 = vmul.f32 0.5, %v5676_v5  ;;  %v4688_v24 = vld [vmem:[%s5141_s23 + $0xc4] sm:$0xf] }
 0x8be   : > { %2977 = vmatpush.bf16.msrb.mxu0 %v4377_v40  ;;  %v2330_v59 = vadd.f32 1.0, %v4066_v17  ;;  %4877 = vrcp.f32 %v5912_v48  ;;  %v2297_v20 = vadd.f32 0.18741608, %v2296_v36  ;;  %v4433_v8 = vor.u32 %v4755_v11, %v4432_v44  ;;  %v4170_v25 = vld [vmem:[%s5141_s23 + $0xc8] sm:$0xf0] }
 0x8bf   : > { %v4067_v2 = vclamps-f32 %v2245_v3, 1.0  ;;  %v2309_v30 = vmul.f32 %v2308_v18, %v5777_v22  ;;  %3016 = vmatpush.bf16.msra.mxu1 %v4189_v49  ;;  %v4117_v62 = vor.u32 %v4674_v41, %v4114_v46  ;;  %v2258_v16 = vmul.f32 %v2257_v42, %v5792_v37  ;;  %v4416_v32 = vld [vmem:[%s5141_s23 + $0x2b0] sm:$0xf]  ;;  %v4751_v21 = vld [vmem:[%s5141_s23 + $0x2b4] sm:$0xf0] }
 0x8c0   : > { %v2336_v6 = vmul.f32 %v2330_v59, %v2078_v58  ;;  %v4369_v23 = vor.u32 %v4739_v53, %v4368_v38  ;;  %2991 = vmatpush.bf16.msra.mxu2 %v4433_v8  ;;  %v4181_v31 = vor.u32 %v4690_v54, %v4178_v57  ;;  %v4425_v63 = vor.u32 %v4753_v0, %v4424_v13  ;;  %v4670_v29 = vld [vmem:[%s5141_s23 + $0x34] sm:$0xf]  ;;  %v4098_v45 = vld [vmem:[%s5141_s23 + $0x38] sm:$0xf0]  ;;  %v4352_v33 = vld [vmem:[%s5141_s23 + $0x230] sm:$0xf] }
 0x8c1   : > { %v2331_v12 = vadd.f32 1.0, %v4067_v2  ;;  %v5930_v5 = vadd.f32 1.0, %v2309_v30  ;;  %3004 = vmatpush.bf16.msrb.mxu3 %v4117_v62  ;;  %v2298_v37 = vmul.f32 %v2297_v20, %v5777_v22  ;;  %v4109_v34 = vor.u32 %v4672_v55, %v4106_v9  ;;  %v4735_v19 = vld [vmem:[%s5141_s23 + $0x234] sm:$0xf0]  ;;  %v4686_v22 = vld [vmem:[%s5141_s23 + $0xb4] sm:$0xf] }
 0x8c2   : > { %v5934_v43 = vpack.c.bf16 %v2336_v6, %v2336_v6  ;;  %2978 = vmatpush.bf16.msrb.mxu0 %v4369_v23  ;;  %v4361_v50 = vor.u32 %v4737_v10, %v4360_v14  ;;  %v4173_v26 = vor.u32 %v4688_v24, %v4170_v25  ;;  %v4162_v40 = vld [vmem:[%s5141_s23 + $0xb8] sm:$0xf0]  ;;  %v4408_v44 = vld [vmem:[%s5141_s23 + $0x2a0] sm:$0xf]  ;;  %v4749_v11 = vld [vmem:[%s5141_s23 + $0x2a4] sm:$0xf0]  ;;  %v4417_v46 = vor.u32 %v4751_v21, %v4416_v32 }
 0x8c3   : > { %v2337_v7 = vmul.f32 %v2331_v12, %v2079_v4  ;;  %4879 = vrcp.f32 %v5930_v5  ;;  %3017 = vmatpush.bf16.msra.mxu1 %v4181_v31  ;;  %v2259_v41 = vadd.f32 1.1283791, %v2258_v16  ;;  %v4101_v17 = vor.u32 %v4670_v29, %v4098_v45  ;;  %v4668_v47 = vld [vmem:[%s5141_s23 + $0x24] sm:$0xf]  ;;  %v4090_v38 = vld [vmem:[%s5141_s23 + $0x28] sm:$0xf0] }
 0x8c4   : > { %v5942_v28 = vpop.eup %4877  ;;  %2958 = vmatmul.bf16.vlgmr.msra.gmra.mxu3 %v5934_v43  ;;  %2992 = vmatpush.bf16.msra.mxu2 %v4425_v63  ;;  %v4353_v3 = vor.u32 %v4735_v19, %v4352_v33  ;;  %v4344_v42 = vld [vmem:[%s5141_s23 + $0x220] sm:$0xf]  ;;  %v4733_v18 = vld [vmem:[%s5141_s23 + $0x224] sm:$0xf0]  ;;  %v2282_v49 = vand.u32 2147483648, %v5912_v48  ;;  %v4165_v57 = vor.u32 %v4686_v22, %v4162_v40  ;;  %v4409_v30 = vor.u32 %v4749_v11, %v4408_v44 }
 0x8c5   : > { %v5948_v36 = vpack.c.bf16 %v2337_v7, %v2337_v7  ;;  %v2272_v51 = vmul.f32 %v5942_v28, %v5912_v48  ;;  %3005 = vmatpush.bf16.msrb.mxu3 %v4109_v34  ;;  %v5961_v54 = vadd.f32 1.1283791, %v2298_v37  ;;  %v4684_v58 = vld [vmem:[%s5141_s23 + $0xa4] sm:$0xf]  ;;  %vm2277_vm13 = vweird.f32 %v5942_v28  ;;  %v4154_v4 = vld [vmem:[%s5141_s23 + $0xa8] sm:$0xf0] }
 0x8c6   : > { %2979 = vmatpush.bf16.msrb.mxu0 %v4361_v50  ;;  %v2280_v0 = vand.u32 2147483647, %v5912_v48  ;;  %v4400_v2 = vld [vmem:[%s5141_s23 + $0x290] sm:$0xf]  ;;  %v4093_v55 = vor.u32 %v4668_v47, %v4090_v38  ;;  %v4747_v6 = vld [vmem:[%s5141_s23 + $0x294] sm:$0xf0]  ;;  %vm2276_vm14 = vweird.f32 %v5912_v48  ;;  %v4345_v10 = vor.u32 %v4733_v18, %v4344_v42 }
 0x8c7   : > { %v2273_v53 = vsub.f32 1.0, %v2272_v51  ;;  %2971 = vmatmul.bf16.vlgmr.msrb.gmra.mxu1 %v5948_v36  ;;  %v4666_v8 = vld [vmem:[%s5141_s23 + $0x14] sm:$0xf]  ;;  %v4082_v62 = vld [vmem:[%s5141_s23 + $0x18] sm:$0xf0]  ;;  %v2260_v23 = vmul.f32 %v2259_v41, %v5768_v52  ;;  %vm2278_vm15 = vmor %vm2276_vm14, %vm2277_vm13  ;;  %v2283_v24 = vor.u32 1.1754944e-38, %v2282_v49  ;;  %v4157_v31 = vor.u32 %v4684_v58, %v4154_v4 }
 0x8c8   : > { %3018 = vmatpush.bf16.msra.mxu1 %v4173_v26  ;;  %2993 = vmatpush.bf16.msra.mxu2 %v4417_v46  ;;  %v2320_v14 = vand.u32 2147483647, %v5930_v5  ;;  %v4336_v12 = vld [vmem:[%s5141_s23 + $0x210] sm:$0xf]  ;;  %v4731_v16 = vld [vmem:[%s5141_s23 + $0x214] sm:$0xf0]  ;;  %v4401_v37 = vor.u32 %v4747_v6, %v4400_v2  ;;  %v4085_v50 = vor.u32 %v4666_v8, %v4082_v62  ;;  %vm2316_vm4 = vweird.f32 %v5930_v5 }
 0x8c9   : > { %v5964_v59 = vpop.eup %4879  ;;  %v2274_v13 = vmul.f32 %v5942_v28, %v2273_v53  ;;  %3006 = vmatpush.bf16.msrb.mxu3 %v4101_v17  ;;  %v4682_v48 = vld [vmem:[%s5141_s23 + $0x94] sm:$0xf]  ;;  %v4146_v63 = vld [vmem:[%s5141_s23 + $0x98] sm:$0xf0]  ;;  %vm2281_vm0 = vcmp.eq.f32.partialorder %v2280_v0, 8.507059e+37  ;;  %v2322_v7 = vand.u32 2147483648, %v5930_v5  ;;  %v4337_v40 = vor.u32 %v4731_v16, %v4336_v12 }
 0x8ca   : > { %v2312_v20 = vmul.f32 %v5964_v59, %v5930_v5  ;;  %2980 = vmatpush.bf16.msrb.mxu0 %v4353_v3  ;;  %v4392_v21 = vld [vmem:[%s5141_s23 + $0x280] sm:$0xf]  ;;  %v4745_v52 = vld [vmem:[%s5141_s23 + $0x284] sm:$0xf0]  ;;  %v4664_v29 = vld [vmem:[%s5141_s23 + $0x4] sm:$0xf]  ;;  %vm2317_vm2 = vweird.f32 %v5964_v59  ;;  %v4149_v46 = vor.u32 %v4682_v48, %v4146_v63  ;;  %v2300_v53 = vmul.f32 %v5961_v54, %v5744_v35 }
 0x8cb   : > { %v2275_v9 = vadd.f32 %v5942_v28, %v2274_v13  ;;  %v4726_v26 = vld [vmem:[%s5141_s23 + $0x1f4] sm:$0xf]  ;;  %v4322_v33 = vld [vmem:[%s5141_s23 + $0x1f8] sm:$0xf0]  ;;  %v2080_v19 = vmul.f32 0.5, %v5761_v56  ;;  %vm5997_vm3 = vcmp.eq.f32.partialorder %v2320_v14, 8.507059e+37  ;;  %vm2318_vm5 = vmor %vm2316_vm4, %vm2317_vm2  ;;  %v4393_v49 = vor.u32 %v4745_v52, %v4392_v21 }
 0x8cc   : > { %v2313_v25 = vsub.f32 1.0, %v2312_v20  ;;  %3019 = vmatpush.bf16.msra.mxu1 %v4165_v57  ;;  %2994 = vmatpush.bf16.msra.mxu2 %v4409_v30  ;;  %v4742_v44 = vld [vmem:[%s5141_s23 + $0x274] sm:$0xf]  ;;  %v4386_v11 = vld [vmem:[%s5141_s23 + $0x278] sm:$0xf0]  ;;  %v2323_v3 = vor.u32 1.1754944e-38, %v2322_v7  ;;  %v4325_v4 = vor.u32 %v4726_v26, %v4322_v33 }
 0x8cd   : > { %v2279_v32 = vsel %vm2278_vm15, %v5942_v28, %v2275_v9  ;;  %3007 = vmatpush.bf16.msrb.mxu3 %v4093_v55  ;;  %v4074_v28 = vld [vmem:[%s5141_s23 + $0x8] sm:$0xf0]  ;;  %v4328_v56 = vld [vmem:[%s5141_s23 + $0x200] sm:$0xf]  ;;  %v4729_v17 = vld [vmem:[%s5141_s23 + $0x204] sm:$0xf0]  ;;  %v4389_v2 = vor.u32 %v4742_v44, %v4386_v11 }
 0x8ce   : > { %v2284_v45 = vsel %vm2281_vm0, %v2283_v24, %v2279_v32  ;;  %v2314_v34 = vmul.f32 %v5964_v59, %v2313_v25  ;;  %2981 = vmatpush.bf16.msrb.mxu0 %v4345_v10  ;;  %v4680_v47 = vld [vmem:[%s5141_s23 + $0x84] sm:$0xf]  ;;  %v4138_v42 = vld [vmem:[%s5141_s23 + $0x88] sm:$0xf0]  ;;  %v4710_v18 = vld [vmem:[%s5141_s23 + $0x174] sm:$0xf]  ;;  %v4077_v57 = vor.u32 %v4664_v29, %v4074_v28  ;;  %v4329_v30 = vor.u32 %v4729_v17, %v4328_v56 }
 0x8cf   : > { %v2285_v22 = vmul.f32 %v2284_v45, %v2260_v23  ;;  %v4258_v58 = vld [vmem:[%s5141_s23 + $0x178] sm:$0xf0]  ;;  %v4758_v13 = vld [vmem:[%s5141_s23 + $0x2f4] sm:$0xf]  ;;  %v4141_v55 = vor.u32 %v4680_v47, %v4138_v42  ;;  %v4314_v6 = vld [vmem:[%s5141_s23 + $0x1e8] sm:$0xf0] }
 0x8d0   : > { %v2315_v41 = vadd.f32 %v5964_v59, %v2314_v34  ;;  %3020 = vmatpush.bf16.msra.mxu1 %v4157_v31  ;;  %2995 = vmatpush.bf16.msra.mxu2 %v4401_v37  ;;  %v4450_v0 = vld [vmem:[%s5141_s23 + $0x2f8] sm:$0xf0]  ;;  %v4740_v8 = vld [vmem:[%s5141_s23 + $0x264] sm:$0xf]  ;;  %v4378_v62 = vld [vmem:[%s5141_s23 + $0x268] sm:$0xf0]  ;;  %v4261_v14 = vor.u32 %v4710_v18, %v4258_v58 }
 0x8d1   : > { %v4068_v38 = vclamps-f32 %v2285_v22, 1.0  ;;  %3008 = vmatpush.bf16.msrb.mxu3 %v4085_v50  ;;  %v4453_v10 = vor.u32 %v4758_v13, %v4450_v0  ;;  %v4708_v12 = vld [vmem:[%s5141_s23 + $0x164] sm:$0xf]  ;;  %v4250_v16 = vld [vmem:[%s5141_s23 + $0x168] sm:$0xf0]  ;;  %v4381_v48 = vor.u32 %v4740_v8, %v4378_v62  ;;  %v2081_v37 = vmul.f32 0.5, %v5729_v15 }
 0x8d2   : > { %v2319_v5 = vsel %vm2318_vm5, %v5964_v59, %v2315_v41  ;;  %2982 = vmatpush.bf16.msrb.mxu0 %v4337_v40  ;;  %v4724_v59 = vld [vmem:[%s5141_s23 + $0x1e4] sm:$0xf]  ;;  %v4442_v25 = vld [vmem:[%s5141_s23 + $0x2e8] sm:$0xf0]  ;;  %v4722_v63 = vld [vmem:[%s5141_s23 + $0x1d4] sm:$0xf]  ;;  %v4253_v45 = vor.u32 %v4708_v12, %v4250_v16 }
 0x8d3   : > { %v2332_v35 = vadd.f32 1.0, %v4068_v38  ;;  %v2324_v54 = vsel %vm5997_vm3, %v2323_v3, %v2319_v5  ;;  %v4756_v24 = vld [vmem:[%s5141_s23 + $0x2e4] sm:$0xf]  ;;  %v4317_v31 = vor.u32 %v4724_v59, %v4314_v6  ;;  %v4306_v32 = vld [vmem:[%s5141_s23 + $0x1d8] sm:$0xf0] }
 0x8d4   : > { %v2325_v20 = vmul.f32 %v2324_v54, %v2300_v53  ;;  %3021 = vmatpush.bf16.msra.mxu1 %v4149_v46  ;;  %2996 = vmatpush.bf16.msra.mxu2 %v4393_v49  ;;  %v4738_v52 = vld [vmem:[%s5141_s23 + $0x254] sm:$0xf]  ;;  %v4370_v29 = vld [vmem:[%s5141_s23 + $0x258] sm:$0xf0]  ;;  %v4445_v34 = vor.u32 %v4756_v24, %v4442_v25  ;;  %v4309_v15 = vor.u32 %v4722_v63, %v4306_v32  ;;  %v4720_v51 = vld [vmem:[%s5141_s23 + $0x1c4] sm:$0xf] }
 0x8d5   : > { %v2338_v9 = vmul.f32 %v2332_v35, %v2080_v19  ;;  %3009 = vmatpush.bf16.msrb.mxu3 %v4077_v57  ;;  %v4706_v50 = vld [vmem:[%s5141_s23 + $0x154] sm:$0xf]  ;;  %v4242_v26 = vld [vmem:[%s5141_s23 + $0x158] sm:$0xf0]  ;;  %v4373_v22 = vor.u32 %v4738_v52, %v4370_v29  ;;  %v4298_v44 = vld [vmem:[%s5141_s23 + $0x1c8] sm:$0xf0] }
 0x8d6   : > { %v4069_v23 = vclamps-f32 %v2325_v20, 1.0  ;;  %2983 = vmatpush.bf16.msrb.mxu0 %v4329_v30  ;;  %v4754_v33 = vld [vmem:[%s5141_s23 + $0x2d4] sm:$0xf]  ;;  %v4434_v19 = vld [vmem:[%s5141_s23 + $0x2d8] sm:$0xf0]  ;;  %v4301_v53 = vor.u32 %v4720_v51, %v4298_v44 }
 0x8d7   : > { %v6030_v7 = vpack.c.bf16 %v2338_v9, %v2338_v9  ;;  %v4736_v11 = vld [vmem:[%s5141_s23 + $0x244] sm:$0xf]  ;;  %v4362_v41 = vld [vmem:[%s5141_s23 + $0x248] sm:$0xf0]  ;;  %v4437_v46 = vor.u32 %v4754_v33, %v4434_v19  ;;  %v4718_v3 = vld [vmem:[%s5141_s23 + $0x1b4] sm:$0xf] }
 0x8d8   : > { %3041 = vmatpush.bf16.msrb.mxu2 %v4325_v4  ;;  %v2333_v21 = vadd.f32 1.0, %v4069_v23  ;;  %3022 = vmatpush.bf16.msra.mxu1 %v4141_v55  ;;  %v4704_v56 = vld [vmem:[%s5141_s23 + $0x144] sm:$0xf]  ;;  %v4234_v17 = vld [vmem:[%s5141_s23 + $0x148] sm:$0xf0] }
 0x8d9   : > { %3054 = vmatpush.bf16.msra.mxu3 %v4389_v2  ;;  %2984 = vmatmul.bf16.vlgmr.msrb.gmra.mxu0 %v6030_v7  ;;  %v4752_v47 = vld [vmem:[%s5141_s23 + $0x2c4] sm:$0xf]  ;;  %v4426_v38 = vld [vmem:[%s5141_s23 + $0x2c8] sm:$0xf0]  ;;  %v4290_v42 = vld [vmem:[%s5141_s23 + $0x1b8] sm:$0xf0]  ;;  %v4237_v49 = vor.u32 %v4704_v56, %v4234_v17 }
 0x8da   : > { %3028 = vmatpush.bf16.msra.mxu0 %v4261_v14  ;;  %v2339_v28 = vmul.f32 %v2333_v21, %v2081_v37  ;;  %3010 = vmatmul.bf16.vlgmr.msrb.gmra.mxu3 %v5848_v39  ;;  %v4245_v39 = vor.u32 %v4706_v50, %v4242_v26  ;;  %v4734_v18 = vld [vmem:[%s5141_s23 + $0x234] sm:$0xf]  ;;  %v4354_v5 = vld [vmem:[%s5141_s23 + $0x238] sm:$0xf0]  ;;  %v4429_v57 = vor.u32 %v4752_v47, %v4426_v38  ;;  %v4716_v2 = vld [vmem:[%s5141_s23 + $0x1a4] sm:$0xf] }
 0x8db   : > { %3023 = vmatmul.bf16.vlgmr.msra.gmra.mxu1 %v5829_v1  ;;  %v4365_v1 = vor.u32 %v4736_v11, %v4362_v41  ;;  %v4702_v58 = vld [vmem:[%s5141_s23 + $0x134] sm:$0xf]  ;;  %v4226_v13 = vld [vmem:[%s5141_s23 + $0x138] sm:$0xf0]  ;;  %v4293_v54 = vor.u32 %v4718_v3, %v4290_v42  ;;  %v4357_v4 = vor.u32 %v4734_v18, %v4354_v5  ;;  %v4282_v59 = vld [vmem:[%s5141_s23 + $0x1a8] sm:$0xf0] }
 0x8dc   : > { %3067 = vmatpush.bf16.msrb.mxu1 %v4453_v10  ;;  %3042 = vmatpush.bf16.msrb.mxu2 %v4317_v31  ;;  %v6041_v40 = vpack.c.bf16 %v2339_v28, %v2339_v28  ;;  %v4750_v0 = vld [vmem:[%s5141_s23 + $0x2b4] sm:$0xf]  ;;  %v4418_v35 = vld [vmem:[%s5141_s23 + $0x2b8] sm:$0xf0]  ;;  %v4732_v20 = vld [vmem:[%s5141_s23 + $0x224] sm:$0xf]  ;;  %v4229_v55 = vor.u32 %v4702_v58, %v4226_v13  ;;  %v4285_v10 = vor.u32 %v4716_v2, %v4282_v59 }
 0x8dd   : > { %3055 = vmatpush.bf16.msra.mxu3 %v4381_v48  ;;  %v4346_v30 = vld [vmem:[%s5141_s23 + $0x228] sm:$0xf0]  ;;  %v4421_v6 = vor.u32 %v4750_v0, %v4418_v35  ;;  %v4700_v8 = vld [vmem:[%s5141_s23 + $0x124] sm:$0xf]  ;;  %v4714_v16 = vld [vmem:[%s5141_s23 + $0x194] sm:$0xf] }
 0x8de   : > { %3029 = vmatpush.bf16.msra.mxu0 %v4253_v45  ;;  %2997 = vmatmul.bf16.vlgmr.msra.gmra.mxu2 %v6041_v40  ;;  %v4218_v62 = vld [vmem:[%s5141_s23 + $0x128] sm:$0xf0]  ;;  %v4748_v9 = vld [vmem:[%s5141_s23 + $0x2a4] sm:$0xf]  ;;  %v4349_v12 = vor.u32 %v4732_v20, %v4346_v30  ;;  %v4274_v23 = vld [vmem:[%s5141_s23 + $0x198] sm:$0xf0] }
 0x8df   : > { %v4410_v14 = vld [vmem:[%s5141_s23 + $0x2a8] sm:$0xf0]  ;;  %v4730_v24 = vld [vmem:[%s5141_s23 + $0x214] sm:$0xf]  ;;  %v4338_v25 = vld [vmem:[%s5141_s23 + $0x218] sm:$0xf0]  ;;  %v4221_v31 = vor.u32 %v4700_v8, %v4218_v62  ;;  %v4277_v52 = vor.u32 %v4714_v16, %v4274_v23 }
 0x8e0   : > { %3068 = vmatpush.bf16.msrb.mxu1 %v4445_v34  ;;  %3043 = vmatpush.bf16.msrb.mxu2 %v4309_v15  ;;  %v4413_v48 = vor.u32 %v4748_v9, %v4410_v14  ;;  %v4698_v63 = vld [vmem:[%s5141_s23 + $0x114] sm:$0xf]  ;;  %v4210_v32 = vld [vmem:[%s5141_s23 + $0x118] sm:$0xf0]  ;;  %v4341_v29 = vor.u32 %v4730_v24, %v4338_v25  ;;  %v4712_v45 = vld [vmem:[%s5141_s23 + $0x184] sm:$0xf] }
 0x8e1   : > { %3056 = vmatpush.bf16.msra.mxu3 %v4373_v22  ;;  %v4746_v37 = vld [vmem:[%s5141_s23 + $0x294] sm:$0xf]  ;;  %v4402_v21 = vld [vmem:[%s5141_s23 + $0x298] sm:$0xf0]  ;;  %v4266_v34 = vld [vmem:[%s5141_s23 + $0x188] sm:$0xf0]  ;;  %v4213_v26 = vor.u32 %v4698_v63, %v4210_v32 }
 0x8e2   : > { %3030 = vmatpush.bf16.msra.mxu0 %v4245_v39  ;;  %v4728_v50 = vld [vmem:[%s5141_s23 + $0x204] sm:$0xf]  ;;  %v4330_v28 = vld [vmem:[%s5141_s23 + $0x208] sm:$0xf0]  ;;  %v4405_v33 = vor.u32 %v4746_v37, %v4402_v21  ;;  %v4269_v44 = vor.u32 %v4712_v45, %v4266_v34 }
 0x8e3   : > { %v4696_v19 = vld [vmem:[%s5141_s23 + $0x104] sm:$0xf]  ;;  %v4202_v15 = vld [vmem:[%s5141_s23 + $0x108] sm:$0xf0]  ;;  %v4333_v11 = vor.u32 %v4728_v50, %v4330_v28 }
 0x8e4   : > { %3069 = vmatpush.bf16.msrb.mxu1 %v4437_v46  ;;  %3044 = vmatpush.bf16.msrb.mxu2 %v4301_v53  ;;  %v4744_v22 = vld [vmem:[%s5141_s23 + $0x284] sm:$0xf]  ;;  %v4394_v51 = vld [vmem:[%s5141_s23 + $0x288] sm:$0xf0]  ;;  %v4205_v41 = vor.u32 %v4696_v19, %v4202_v15 }
 0x8e5   : > { %3057 = vmatpush.bf16.msra.mxu3 %v4365_v1  ;;  %v4397_v39 = vor.u32 %v4744_v22, %v4394_v51  ;;  %v4888_v42 = vld [vmem:[%s5121_s14] sm:$0xff]  ;;  %v4889_v20 = vld [vmem:[%s5121_s14 + $0x8] sm:$0xff] }
 0x8e6   : > { %3031 = vmatpush.bf16.msra.mxu0 %v4237_v49  ;;  %v2442_v18 = vperm.slane %v4888_v42, 5  ;;  %v2443_v30 = vperm.slane %v4889_v20, 5 }
 0x8e8   : > { %3070 = vmatpush.bf16.msrb.mxu1 %v4429_v57  ;;  %3045 = vmatpush.bf16.msrb.mxu2 %v4293_v54 }
 0x8e9   : > { %3058 = vmatpush.bf16.msra.mxu3 %v4357_v4 }
 0x8ea   : > { %3032 = vmatpush.bf16.msra.mxu0 %v4229_v55 }
 0x8ec   : > { %3071 = vmatpush.bf16.msrb.mxu1 %v4421_v6  ;;  %3046 = vmatpush.bf16.msrb.mxu2 %v4285_v10 }
 0x8ed   : > { %3059 = vmatpush.bf16.msra.mxu3 %v4349_v12 }
 0x8ee   : > { %3033 = vmatpush.bf16.msra.mxu0 %v4221_v31 }
 0x8f0   : > { %3072 = vmatpush.bf16.msrb.mxu1 %v4413_v48  ;;  %3047 = vmatpush.bf16.msrb.mxu2 %v4277_v52 }
 0x8f1   : > { %3060 = vmatpush.bf16.msra.mxu3 %v4341_v29 }
 0x8f2   : > { %3034 = vmatpush.bf16.msra.mxu0 %v4213_v26 }
 0x8f4   : > { %3073 = vmatpush.bf16.msrb.mxu1 %v4405_v33  ;;  %3048 = vmatpush.bf16.msrb.mxu2 %v4269_v44 }
 0x8f5   : > { %3061 = vmatpush.bf16.msra.mxu3 %v4333_v11 }
 0x8f6   : > { %3035 = vmatpush.bf16.msra.mxu0 %v4205_v41 }
 0x8f7   : > { %3049 = vmatmul.bf16.vlgmr.msrb.gmra.mxu2 %v5948_v36 }
 0x8f8   : > { %3074 = vmatpush.bf16.msrb.mxu1 %v4397_v39  ;;  %3062 = vmatmul.bf16.vlgmr.msra.gmra.mxu3 %v6030_v7 }
 0x8f9   : > { %3036 = vmatmul.bf16.vlgmr.msra.gmra.mxu0 %v5934_v43 }
 0x8fb   : > { %3075 = vmatmul.bf16.vlgmr.msrb.gmra.mxu1 %v6041_v40 }
 0x936   : > { %v2933_v46 = vpop.f32.mrf.mxu0  ;;  %v2946_v56 = vpop.f32.mrf.mxu2 }
 0x937   : > { %v2934_v5 = vadd.f32 %v2933_v46, %v2442_v18 }
 0x939   : > { %v2947_v49 = vadd.f32 %v2946_v56, %v2934_v5 }
 0x93e   : > { %v2935_v17 = vpop.f32.mrf.mxu0  ;;  %v2948_v47 = vpop.f32.mrf.mxu2 }
 0x944   : > { %v2972_v38 = vpop.f32.mrf.mxu1 }
 0x947   : > { %v2959_v53 = vpop.f32.mrf.mxu3 }
 0x948   : > { %v2960_v7 = vadd.f32 %v2959_v53, %v2947_v49 }
 0x94a   : > { %v2973_v43 = vadd.f32 %v2972_v38, %v2960_v7 }
 0x94c   : > { %v2974_v1 = vpop.f32.mrf.mxu1 }
 0x94f   : > { %v2961_v3 = vpop.f32.mrf.mxu3 }
 0x956   : > { %v2985_v36 = vpop.f32.mrf.mxu0 }
 0x957   : > { %v2986_v13 = vadd.f32 %v2985_v36, %v2973_v43 }
 0x958   : > { %v3024_v57 = vpop.f32.mrf.mxu1 }
 0x95d   : > { %v3011_v58 = vpop.f32.mrf.mxu3 }
 0x95e   : > { %v2987_v0 = vpop.f32.mrf.mxu0  ;;  %v3012_v55 = vadd.f32 %v3011_v58, %v2443_v30 }
 0x960   : > { %v3026_v54 = vpop.f32.mrf.mxu1  ;;  %v3025_v62 = vadd.f32 %v3024_v57, %v3012_v55 }
 0x961   : > { %v2998_v40 = vpop.f32.mrf.mxu2 }
 0x962   : > { %v2999_v35 = vadd.f32 %v2998_v40, %v2986_v13 }
 0x964   : > { %v3080_v4 = vadd.f32 %v2999_v35, %v5400_v61 }
 0x965   : > { %v3013_v2 = vpop.f32.mrf.mxu3 }
 0x966   : > { %3082 = vst [vmem:[#allocation2] sm:$0xff] %v3080_v4 }
 0x969   : > { %v3000_v59 = vpop.f32.mrf.mxu2 }
 0x976   : > { %v3037_v6 = vpop.f32.mrf.mxu0 }
 0x977   : > { %v3038_v9 = vadd.f32 %v3037_v6, %v3025_v62 }
 0x978   : > { %v3076_v8 = vpop.f32.mrf.mxu1 }
 0x97a   : > { %v3050_v14 = vpop.f32.mrf.mxu2 }
 0x97b   : > { %v3063_v10 = vpop.f32.mrf.mxu3  ;;  %v3051_v12 = vadd.f32 %v3050_v14, %v3038_v9 }
 0x97d   : > { %v3064_v16 = vadd.f32 %v3063_v10, %v3051_v12 }
 0x97e   : > { %v3039_v23 = vpop.f32.mrf.mxu0 }
 0x97f   : > { %v3077_v25 = vadd.f32 %v3076_v8, %v3064_v16  ;;  %3087 = sbr.rel (%p4454_p1) target bundleno = 2845 (0xb1d), region = 64 }
 0x980   : > { %v3078_v24 = vpop.f32.mrf.mxu1 }
 0x981   : > { %v3081_v31 = vadd.f32 %v3077_v25, %v5398_v60 }
 0x982   : > { %v3052_v61 = vpop.f32.mrf.mxu2 }
 0x983   : > { %v3065_v48 = vpop.f32.mrf.mxu3  ;;  %3083 = vst.msk [vmem:[#allocation2 + $0x8] sm:$0xff] %vm464_vm1, %v3081_v31 }
 0x984   : > { %vm3091_vm6 = vcmask 1040384   ;;  %vm3093_vm7 = vcmask 516096   ;;  %v4767_v21 = vld [vmem:[%s6196_s7 + $0x38] sm:$0xff]  ;;  %v4766_v19 = vld [vmem:[%s6196_s7 + $0x30] sm:$0xff]  ;;  %v4765_v15 = vld [vmem:[%s6196_s7 + $0x28] sm:$0xff] }
 0x985   : > { %v3092_v63 = vsel %vm3091_vm6, %v3080_v4, 0.0  ;;  %v3094_v32 = vsel %vm3093_vm7, %v3081_v31, 0.0  ;;  %3238 = vmatpush.bf16.msra.mxu0 %v4767_v21  ;;  %v4764_v22 = vld [vmem:[%s6196_s7 + $0x20] sm:$0xff]  ;;  %v4763_v51 = vld [vmem:[%s6196_s7 + $0x18] sm:$0xff]  ;;  %v4762_v11 = vld [vmem:[%s6196_s7 + $0x10] sm:$0xff] }
 0x986   : > { %v3095_v37 = vadd.f32 %v3094_v32, %v3092_v63  ;;  %v4771_v44 = vld [vmem:[%s6196_s7 + $0x58] sm:$0xff]  ;;  %v4770_v41 = vld [vmem:[%s6196_s7 + $0x50] sm:$0xff]  ;;  %v4761_v39 = vld [vmem:[%s6196_s7 + $0x8] sm:$0xff] }
 0x987   : > { %3255 = vmatpush.bf16.msra.mxu1 %v4771_v44  ;;  %v4769_v46 = vld [vmem:[%s6196_s7 + $0x48] sm:$0xff]  ;;  %v4760_v56 = vld [vmem:[%s6196_s7] sm:$0xff] }
 0x988   : > { %3096 = vadd.xlane.f32.xlu0 %v3095_v37  ;;  %v4768_v17 = vld [vmem:[%s6196_s7 + $0x40] sm:$0xff] }
 0x989   : > { %3239 = vmatpush.bf16.msra.mxu0 %v4766_v19  ;;  %v3088_v49 = vld [vmem:[%s6195_s6] ss:$2 sm:$0x3]  ;;  %v4455_v57 = vld [vmem:[%s6195_s6 + $0x1] ss:$2 sm:$0x3] }
 0x98a   : > { %v3124_v7 = vperm.slane %v3088_v49, 1  ;;  %v3130_v13 = vperm.slane %v4455_v57, 0  ;;  %v3131_v0 = vperm.slane %v4455_v57, 1  ;;  %v3162_v30 = vld [vmem:[%s6197_s8] sm:$0x1] }
 0x98b   : > { %3256 = vmatpush.bf16.msra.mxu1 %v4770_v41 }
 0x98d   : > { %3240 = vmatpush.bf16.msra.mxu0 %v4765_v15 }
 0x98f   : > { %3257 = vmatpush.bf16.msra.mxu1 %v4769_v46 }
 0x991   : > { %3241 = vmatpush.bf16.msra.mxu0 %v4764_v22 }
 0x993   : > { %3258 = vmatpush.bf16.msra.mxu1 %v4768_v17 }
 0x995   : > { %3242 = vmatpush.bf16.msra.mxu0 %v4763_v51 }
 0x999   : > { %3243 = vmatpush.bf16.msra.mxu0 %v4762_v11 }
 0x99d   : > { %3244 = vmatpush.bf16.msra.mxu0 %v4761_v39 }
 0x9a1   : > { %3245 = vmatpush.bf16.msra.mxu0 %v4760_v56 }
 0x9fb   : > { %v3097_v52 = vpop.xlane.xlu0 %3096 }
 0x9fc   : > { %v3098_v60 = vmul.f32 %v3097_v52, %v5159_v27 }
 0x9fe   : > { %v3099_v29 = vsub.f32 %v3080_v4, %v3098_v60  ;;  %v3100_v45 = vsub.f32 %v3081_v31, %v3098_v60 }
 0xa00   : > { %v3101_v34 = vmul.f32 %v3099_v29, %v3099_v29  ;;  %v3102_v50 = vmul.f32 %v3100_v45, %v3100_v45 }
 0xa02   : > { %v3103_v28 = vsel %vm3091_vm6, %v3101_v34, 0.0  ;;  %v3104_v26 = vsel %vm3093_vm7, %v3102_v50, 0.0 }
 0xa03   : > { %v3105_v33 = vadd.f32 %v3104_v26, %v3103_v28 }
 0xa05   : > { %3106 = vadd.xlane.f32.xlu0 %v3105_v33 }
 0xa78   : > { %v3107_v47 = vpop.xlane.xlu0 %3106 }
 0xa79   : > { %v3108_v38 = vmul.f32 %v3107_v47, %v5159_v27  ;;  %v3123_v27 = vperm.slane %v3088_v49, 0 }
 0xa7b   : > { %v3109_v53 = vadd.f32 1e-06, %v3108_v38 }
 0xa7d   : > { %4890 = vrsqrt.f32 %v3109_v53  ;;  %vm3116_vm9 = vweird.f32 %v3109_v53 }
 0xa83   : > { %v4891_v1 = vpop.eup %4890 }
 0xa84   : > { %v3111_v3 = vmul.f32 %v4891_v1, %v3109_v53  ;;  %vm3117_vm8 = vweird.f32 %v4891_v1 }
 0xa85   : > { %vm3118_vm10 = vmor %vm3116_vm9, %vm3117_vm8 }
 0xa86   : > { %v3112_v42 = vmul.f32 %v4891_v1, %v3111_v3 }
 0xa88   : > { %v3113_v18 = vmul.f32 0.5, %v3112_v42 }
 0xa8a   : > { %v3114_v5 = vsub.f32 1.5, %v3113_v18 }
 0xa8c   : > { %v3115_v36 = vmul.f32 %v4891_v1, %v3114_v5 }
 0xa8e   : > { %v3119_v58 = vsel %vm3118_vm10, %v4891_v1, %v3115_v36 }
 0xa8f   : > { %v3120_v43 = vmul.f32 %v3119_v58, %v3099_v29  ;;  %v3121_v40 = vmul.f32 %v3119_v58, %v3100_v45 }
 0xa91   : > { %v3127_v35 = vmul.f32 %v3123_v27, %v3120_v43  ;;  %v3128_v54 = vmul.f32 %v3124_v7, %v3121_v40 }
 0xa93   : > { %v3134_v4 = vadd.f32 %v3130_v13, %v3127_v35  ;;  %v3135_v2 = vadd.f32 %v3131_v0, %v3128_v54 }
 0xa95   : > { %v3136_v59 = vpack.c.bf16 %v3134_v4, %v3134_v4  ;;  %v3137_v20 = vpack.c.bf16 %v3135_v2, %v3135_v2 }
 0xa97   : > { %3246 = vmatmul.bf16.vlgmr.msra.gmra.mxu0 %v3136_v59  ;;  %4504 = vmatmul.msk.bf16.vlgmr.msra.gmra.mxu1 %vm464_vm1, %v3137_v20 }
 0xb14   : > { %v3247_v55 = vpop.f32.mrf.mxu0  ;;  %v3260_v6 = vpop.f32.mrf.mxu1 }
 0xb15   : > { %v3248_v8 = vadd.f32 %v3247_v55, %v3162_v30 }
 0xb17   : > { %v3261_v62 = vadd.f32 %v3260_v6, %v3248_v8 }
 0xb19   : > { %3264 = vst [vmem:[%s5145_s26] sm:$0x1] %v3261_v62 }
 0xb1c   : > { %v3249_v9 = vpop.f32.mrf.mxu0  ;;  %v3262_v14 = vpop.f32.mrf.mxu1 }
 0xb1d PF: > { %s3274_s15 = scalar_lea.hbm %s6198_s9, %s4974_s13  ;;  %s3276_s19 = sshll.u32 %s5145_s26, 4  ;;  %s3277_s19 = int_to_ptr.vmem [resolvable:$true] %s3276_s19 }
 0xb1e   : > { %s3278_s23 = sshll.u32 %s3274_s15, 4  ;;  %s6237_s11 = sand.u32 1, %s4962_s10   ;;  %s3279_s23 = int_to_ptr.hbm [resolvable:$true] %s3278_s23 }
 0xb1f   : > { %s3266_s30 = scalar_lea.sflag [#allocation4], %s6237_s11  ;;  %s4906_s0 = sshra.s32 %s3279_s23, 4  ;;  %s4907_s0 = int_to_ptr.hbm [resolvable:$true] %s4906_s0 }
 0xb20   : > { %s4908_s14 = scalar_lea.hbm %s4907_s0, 1  ;;  %s4912_s20 = scalar_lea.hbm %s6198_s9, 2 }
 0xb21   : > { %p4909_p2 = scmp.ne.s32.totalorder %s4907_s0, %s4908_s14  ;;  %p4913_p6 = scmp.lt.s32.totalorder %s4907_s0, %s6198_s9 }
 0xb22   : > { %p4914_p7 = scmp.lt.s32.totalorder %s4912_s20, %s4908_s14 }
 0xb23   : > { %p4910_p4 = pnand %p4909_p2, %p5090_p3 }
 0xb24   : > { %p4915_p8 = por %p4914_p7, %p4913_p6 }
 0xb25   : > { %p4911_p5 = pneg %p4910_p4 }
 0xb27   : > { %p4916_p10 = pnand %p4915_p8, %p4911_p5 }
 0xb29   : > { %4919 = shalt.err (!%p4916_p10)
}
 0xb2a   : > { %4777 = dma.vmem_to_hbm [thread:$0]  (%p5090_p3), %s3277_s19, 16, %s3279_s23, %s3266_s30  }
 0xb2b PF: > { %s6238_s13 = sld [smem:[#allocation10_spill]] }
 0xb2c   : > { %s6239_s26 = sld [smem:[#allocation6_spill]] }
 0xb31   : > { %p4783_p11 = scmp.ge.s32.totalorder %s6238_s13, 2 }
 0xb32   : > { %s3290_s28 = sand.u32 1, %s6239_s26  }
 0xb33   : > { %p4780_p12 = pnand %p4783_p11, %p5100_p9  ;;  %s3291_s24 = scalar_lea.sflag [#allocation4], %s3290_s28 }
 0xb35   : > { %p4781_p13 = pneg %p4780_p12 }
 0xb37   : > { %4953 = dma.done.wait (%p4781_p13), %s3291_s24, 16  }
 0xb38   : > { %4955 = vsyncadd (%p4781_p13), %s3291_s24, 4294967280  ;;  %s22_s16 = sadd.s32 1, %s6238_s13   ;;  %s6241_s27 = sld [smem:[#allocation7_spill]] }
 0xb39   : > { %p19_p0 = scmp.ge.s32.totalorder %s22_s16, 26   ;;  %s6242_s11 = sld [smem:[#allocation15_spill]] }
 0xb3a   : > { %s6243_s12 = sld [smem:[#allocation8_spill]]  ;;  %s6247_s30 = smov %s4962_s10 }
 0xb3b   : > { %s6244_s13 = sld [smem:[#allocation9_spill]]  ;;  %21 = sbr.rel (!%p19_p0) target bundleno = 7 (0x7), region = 115 }
 0xb3c   : > { %s6245_s14 = sld [smem:[#allocation11_spill]] }
 0xb3d   : > { %s6246_s15 = sld [smem:[#allocation13_spill]] }
 0xb3e   : > { %s6248_s10 = smov %s6241_s27 }
 0xb40   :  { %3296 = vsyncpa [#allocation4], 1 }
 0xb41   :  { %3298 = vsyncpa [#allocation4 + $0x1], 1 }

</bundles_post_ra>
